<compile_context>
chip_gen: v7x
topology: tpu7x:2x2x1
jax: 0.10.0
libtpu: 0.0.40
codegen_flags: <defaults>
</compile_context>

<pallas_src>
import math

import jax
import jax.numpy as jnp
import numpy as np
from jax.experimental import pallas as pl
from jax.experimental.pallas import tpu as pltpu

B = 8              # batch
Z_DIM = 2          # Encoder z_dim
BN_EPS = 1e-5
LOG2PI = math.log(2.0 * math.pi)
OUT_LANES = 128    # lane-dense packed output width
MATMUL_DTYPE = jnp.bfloat16   # MXU operand dtype for the 2 merged big matmuls
APPROX_RECIP = True           # EUP approx reciprocal for sigmoid / softmax-sum

# ---------------------------------------------------------------------------
# Static packing layout (compile-time constants used inside the kernel)
# ---------------------------------------------------------------------------
# 64-lane small-weight slab (rows):
W64_BLOCKS = [("enc_w2", 128),   # block-diag mu/sigma heads, cols 0:8 used
              ("uni_w2", 256),   # block-diag (ut_w2, ui_w2), cols 0:32 used
              ("cm_w", 64),
              ("cl_w1", 96),
              ("cl_w2", 64),
              ("cl_w3", 64)]     # cols 0:2 used


def _offsets(blocks):
    offs, o = {}, 0
    for name, rows in blocks:
        offs[name] = (o, rows)
        o += rows
    return offs, o


W64_OFF, W64_ROWS = _offsets(W64_BLOCKS)

# 256-lane vector slab (one row per bias / BN-gamma / BN-beta group):
VEC_LANES = 256
VEC_BLOCKS = [
    ("b_t192", 192), ("b_i192", 192),          # [ut_b1|tp_b], [ui_b1|ip_b]
    ("g_uni1", 256), ("be_uni1", 256),         # fused first-layer BN
    ("b_enc1", 128), ("b_enc2", 8),            # fused encoder biases
    ("b_uni2", 32), ("g_uni2", 32), ("be_uni2", 32),
    ("cm_b", 64), ("cm_g", 64), ("cm_be", 64),
    ("cl_b1", 64), ("cl_g1", 64), ("cl_be1", 64),
    ("cl_b2", 64), ("cl_g2", 64), ("cl_be2", 64),
    ("cl_b3", 2),
]
VEC_ROW = {name: i for i, (name, _) in enumerate(VEC_BLOCKS)}
VEC_DIM = dict(VEC_BLOCKS)
VEC_PAD_ROWS = 24   # 19 rows, padded to a sublane multiple


def pack_params(p, mm_dtype=MATMUL_DTYPE):
    """Pack the per-tensor param dict into 5 kernel inputs."""
    f32 = jnp.float32
    # merged big projection weights (bf16 MXU operands)
    wt_big = jnp.concatenate([p["ut_w1"], p["tp_w"]], axis=1).astype(mm_dtype)  # [512,192]
    wi_big = jnp.concatenate([p["ui_w1"], p["ip_w"]], axis=1).astype(mm_dtype)  # [768,192]

    # block-diagonal encoder first layer [128,128]
    z64 = jnp.zeros((64, 64), f32)
    enc_w1_bd = jnp.concatenate(
        [jnp.concatenate([p["et_w1"].astype(f32), z64], axis=1),
         jnp.concatenate([z64, p["ei_w1"].astype(f32)], axis=1)], axis=0)

    # 64-lane small-weight slab
    enc_w2_bd = jnp.zeros((128, 64), f32)
    enc_w2_bd = enc_w2_bd.at[0:64, 0:4].set(p["et_w2"])      # cols 0:2 mu_t, 2:4 sig_t
    enc_w2_bd = enc_w2_bd.at[64:128, 4:8].set(p["ei_w2"])    # cols 4:6 mu_i, 6:8 sig_i
    uni_w2_bd = jnp.zeros((256, 64), f32)
    uni_w2_bd = uni_w2_bd.at[0:128, 0:16].set(p["ut_w2"])
    uni_w2_bd = uni_w2_bd.at[128:256, 16:32].set(p["ui_w2"])
    cl_w3_blk = jnp.zeros((64, 64), f32).at[:, 0:2].set(p["cl_w3"])
    w64 = jnp.concatenate([enc_w2_bd, uni_w2_bd, p["cm_w"].astype(f32),
                           p["cl_w1"].astype(f32), p["cl_w2"].astype(f32),
                           cl_w3_blk], axis=0)               # [672, 64]

    # 256-lane vector slab
    vec_vals = {
        "b_t192": jnp.concatenate([p["ut_b1"], p["tp_b"]], axis=1),
        "b_i192": jnp.concatenate([p["ui_b1"], p["ip_b"]], axis=1),
        "g_uni1": jnp.concatenate([p["ut_g1"], p["ui_g1"]], axis=1),
        "be_uni1": jnp.concatenate([p["ut_be1"], p["ui_be1"]], axis=1),
        "b_enc1": jnp.concatenate([p["et_b1"], p["ei_b1"]], axis=1),
        "b_enc2": jnp.concatenate([p["et_b2"], p["ei_b2"]], axis=1),
        "b_uni2": jnp.concatenate([p["ut_b2"], p["ui_b2"]], axis=1),
        "g_uni2": jnp.concatenate([p["ut_g2"], p["ui_g2"]], axis=1),
        "be_uni2": jnp.concatenate([p["ut_be2"], p["ui_be2"]], axis=1),
        "cm_b": p["cm_b"], "cm_g": p["cm_g"], "cm_be": p["cm_be"],
        "cl_b1": p["cl_b1"], "cl_g1": p["cl_g1"], "cl_be1": p["cl_be1"],
        "cl_b2": p["cl_b2"], "cl_g2": p["cl_g2"], "cl_be2": p["cl_be2"],
        "cl_b3": p["cl_b3"],
    }
    rows = [jnp.pad(vec_vals[n].reshape(1, -1).astype(f32),
                    ((0, 0), (0, VEC_LANES - VEC_DIM[n])))
            for n, _ in VEC_BLOCKS]
    vecs = jnp.concatenate(rows, axis=0)
    vecs = jnp.pad(vecs, ((0, VEC_PAD_ROWS - vecs.shape[0]), (0, 0)))
    return (wt_big, wi_big, enc_w1_bd, w64, vecs)


# ---------------------------------------------------------------------------
# Pallas kernel
# ---------------------------------------------------------------------------
def albef_head_kernel(txt_ref, img_ref, aux_ref, wt_ref, wi_ref, encw1_ref,
                      w64_ref, vec_ref, out_ref):
    f32 = jnp.float32
    txt = txt_ref[...]
    img = img_ref[...]
    aux = aux_ref[...]
    nb = txt.shape[0]
    eps1 = aux[:, 0:2]
    eps2 = aux[:, 2:4]
    onehot = aux[:, 4:6]

    w64 = w64_ref[...]
    vecs = vec_ref[...]

    # static slab unpacking (compile-time slices)
    def W(name):
        o, r = W64_OFF[name]
        return w64[o:o + r, :]

    def V(name):
        r = VEC_ROW[name]
        return vecs[r:r + 1, 0:VEC_DIM[name]]

    def mm(a, b):
        return jnp.dot(a, b, preferred_element_type=f32)

    def recip(x):
        return pl.reciprocal(x, approx=True) if APPROX_RECIP else 1.0 / x

    def bn_relu(x, gamma, beta):
        # train-mode BN as per-feature scale/shift (rsqrt on the EUP)
        mean = jnp.mean(x, axis=0, keepdims=True)
        var = jnp.mean(jnp.square(x - mean), axis=0, keepdims=True)
        scale = gamma * jax.lax.rsqrt(var + BN_EPS)
        shift = beta - mean * scale
        return jnp.maximum(x * scale + shift, 0.0)

    def softplus(x):
        return jnp.maximum(x, 0.0) + jnp.log(1.0 + jnp.exp(-jnp.abs(x)))

    # ---------------- merged projections (2 big MXU pushes) ----------------
    rt = mm(txt.astype(MATMUL_DTYPE), wt_ref[...]) + V("b_t192")   # [B,192]
    ri = mm(img.astype(MATMUL_DTYPE), wi_ref[...]) + V("b_i192")   # [B,192]
    am_out = rt[:, 128:192]                                        # text_proj  [B,64]
    am_ima = ri[:, 128:192]                                        # image_proj [B,64]

    # ---------------- AmbiguityLearning (block-diag fused encoders) --------
    h_cat = jnp.maximum(
        mm(jnp.concatenate([am_out, am_ima], axis=1), encw1_ref[...])
        + V("b_enc1"), 0.0)                                        # [B,128]
    heads = mm(h_cat, W("enc_w2"))[:, 0:8] + V("b_enc2")           # [B,8]
    mu1, s1p = heads[:, 0:2], heads[:, 2:4]
    mu2, s2p = heads[:, 4:6], heads[:, 6:8]
    s1 = softplus(s1p) + 1e-7
    s2 = softplus(s2p) + 1e-7
    z1 = mu1 + s1 * eps1                                           # rsample
    z2 = mu2 + s2 * eps2

    def logprob(z, mu, sigma):
        t = (z - mu) / sigma
        return jnp.sum(-0.5 * t * t - jnp.log(sigma) - 0.5 * LOG2PI,
                       axis=1, keepdims=True)

    kl = 0.5 * ((logprob(z1, mu1, s1) - logprob(z1, mu2, s2))
                + (logprob(z2, mu2, s2) - logprob(z2, mu1, s1)))
    skl = recip(1.0 + jnp.exp(-kl))                                # sigmoid [B,1]

    # ---------------- UnimodalDetection (fused 256-wide / 32-wide) ---------
    u1 = bn_relu(jnp.concatenate([rt[:, 0:128], ri[:, 0:128]], axis=1),
                 V("g_uni1"), V("be_uni1"))                        # [B,256]
    uni = bn_relu(mm(u1, W("uni_w2"))[:, 0:32] + V("b_uni2"),
                  V("g_uni2"), V("be_uni2"))                       # [B,32] = [tprime|iprime]

    # ---------------- CrossModule4Batch ----------------
    # sim[b,i,j] = text[b,i]*image[b,j]/sqrt(64)
    # max_j softmax_j(sim[b,i,:]) == 1 / sum_j exp(sim[b,i,j] - row_max[b,i])
    # row_max computed analytically (exact): sign-dependent max/min of am_ima.
    inv_sqrt = 1.0 / math.sqrt(64.0)
    ima_max = jnp.max(am_ima, axis=1, keepdims=True)               # [B,1]
    ima_min = jnp.min(am_ima, axis=1, keepdims=True)
    row_max = (am_out * inv_sqrt) * jnp.where(am_out >= 0.0, ima_max, ima_min)
    sim = (am_out[:, :, None] * inv_sqrt) * am_ima[:, None, :]     # [B,64,64]
    row_sum = jnp.sum(jnp.exp(sim - row_max[:, :, None]), axis=-1)  # [B,64]
    corr_p = recip(row_sum)                                        # AdaptiveMaxPool1d(1)
    correlation = bn_relu(mm(corr_p, W("cm_w")) + V("cm_b"),
                          V("cm_g"), V("cm_be"))                   # [B,64]

    # ---------------- fusion + classifier (single 96-wide matmul) ----------
    final = jnp.concatenate([(1.0 - skl) * uni, skl * correlation], axis=1)  # [B,96]
    h = bn_relu(mm(final, W("cl_w1")) + V("cl_b1"), V("cl_g1"), V("cl_be1"))
    h = bn_relu(mm(h, W("cl_w2")) + V("cl_b2"), V("cl_g2"), V("cl_be2"))
    pred = mm(h, W("cl_w3"))[:, 0:2] + V("cl_b3")                  # [B,2]

    # cross-entropy (mean over batch), targets one-hot encoded outside
    mx = jnp.max(pred, axis=1, keepdims=True)
    logz = mx + jnp.log(jnp.sum(jnp.exp(pred - mx), axis=1, keepdims=True))
    per_ex = -jnp.sum(onehot * (pred - logz), axis=1, keepdims=True)
    loss = jnp.mean(per_ex, axis=0, keepdims=True)                 # [1,1]

    # lane-dense output slab: cols 0-1 logits, col 2 mean loss, rest zero
    out_ref[...] = jnp.concatenate(
        [pred, jnp.broadcast_to(loss, (nb, 1)),
         jnp.zeros((nb, OUT_LANES - 3), f32)], axis=1)


def albef_head(txt, img, eps1, eps2, onehot, packed_params):
    # TODO(synk): for larger batches (v7x megacore) add a leading batch-tile
    # grid axis with dimension_semantics=("parallel",); at B=8 grid=() is best.
    nb = txt.shape[0]
    aux = jnp.concatenate(
        [eps1, eps2, onehot, jnp.zeros((nb, OUT_LANES - 6), jnp.float32)], axis=1)
    args = (txt, img, aux) + tuple(packed_params)
    vmem = pl.BlockSpec(memory_space=pltpu.MemorySpace.VMEM)
    out = pl.pallas_call(
        albef_head_kernel,
        out_shape=jax.ShapeDtypeStruct((nb, OUT_LANES), jnp.float32),
        in_specs=[vmem] * len(args),
        out_specs=vmem,
    )(*args)
    pred = out[:, 0:2]
    loss = out[0:1, 2:3]
    return loss, pred


# ---------------------------------------------------------------------------
# Pure-JAX reference: original (unfused) math — softmax + max, lane concat,
# exact sigmoid/reciprocal.  Mirrors only the bf16 cast of the 4 big matmuls
# so the check isolates the kernel's structural optimizations.
# ---------------------------------------------------------------------------
def _forward_ref(txt, img, eps1, eps2, onehot, p, mm_dtype=MATMUL_DTYPE):
    def lin(x, w, b, cast=False):
        if cast:
            x, w = x.astype(mm_dtype), w.astype(mm_dtype)
        return jnp.dot(x, w, preferred_element_type=jnp.float32) + b

    def bn(x, g, be):
        m = jnp.mean(x, axis=0, keepdims=True)
        v = jnp.mean(jnp.square(x - m), axis=0, keepdims=True)
        return g * (x - m) * jax.lax.rsqrt(v + BN_EPS) + be

    relu = lambda x: jnp.maximum(x, 0.0)
    softplus = lambda x: jnp.maximum(x, 0.0) + jnp.log(1.0 + jnp.exp(-jnp.abs(x)))

    am_out = lin(txt, p["tp_w"], p["tp_b"], cast=True)
    am_ima = lin(img, p["ip_w"], p["ip_b"], cast=True)

    def encoder(x, w1, b1, w2, b2):
        h = relu(lin(x, w1, b1))
        prm = lin(h, w2, b2)
        return prm[:, :Z_DIM], softplus(prm[:, Z_DIM:]) + 1e-7

    mu1, s1 = encoder(am_out, p["et_w1"], p["et_b1"], p["et_w2"], p["et_b2"])
    mu2, s2 = encoder(am_ima, p["ei_w1"], p["ei_b1"], p["ei_w2"], p["ei_b2"])
    z1, z2 = mu1 + s1 * eps1, mu2 + s2 * eps2

    def logprob(z, mu, sigma):
        t = (z - mu) / sigma
        return jnp.sum(-0.5 * t * t - jnp.log(sigma) - 0.5 * LOG2PI,
                       axis=1, keepdims=True)

    skl = jax.nn.sigmoid(0.5 * ((logprob(z1, mu1, s1) - logprob(z1, mu2, s2))
                                + (logprob(z2, mu2, s2) - logprob(z2, mu1, s1))))

    def uni(x, w1, b1, g1, be1, w2, b2, g2, be2):
        h = relu(bn(lin(x, w1, b1, cast=True), g1, be1))
        return relu(bn(lin(h, w2, b2), g2, be2))

    tprime = uni(txt, p["ut_w1"], p["ut_b1"], p["ut_g1"], p["ut_be1"],
                 p["ut_w2"], p["ut_b2"], p["ut_g2"], p["ut_be2"])
    iprime = uni(img, p["ui_w1"], p["ui_b1"], p["ui_g1"], p["ui_be1"],
                 p["ui_w2"], p["ui_b2"], p["ui_g2"], p["ui_be2"])

    sim = am_out[:, :, None] * am_ima[:, None, :] / math.sqrt(64.0)
    corr_p = jnp.max(jax.nn.softmax(sim, axis=-1), axis=-1)
    correlation = relu(bn(lin(corr_p, p["cm_w"], p["cm_b"]), p["cm_g"], p["cm_be"]))

    final = jnp.concatenate([(1.0 - skl) * tprime, (1.0 - skl) * iprime,
                             skl * correlation], axis=1)
    h = relu(bn(lin(final, p["cl_w1"], p["cl_b1"]), p["cl_g1"], p["cl_be1"]))
    h = relu(bn(lin(h, p["cl_w2"], p["cl_b2"]), p["cl_g2"], p["cl_be2"]))
    pred = lin(h, p["cl_w3"], p["cl_b3"])

    mx = jnp.max(pred, axis=1, keepdims=True)
    logz = mx + jnp.log(jnp.sum(jnp.exp(pred - mx), axis=1, keepdims=True))
    per_ex = -jnp.sum(onehot * (pred - logz), axis=1, keepdims=True)
    loss = jnp.mean(per_ex, axis=0, keepdims=True)
    return loss, pred


# ---------------------------------------------------------------------------
# Deterministic parameter init (shapes from the module's __init__).
# Weights stored [in, out] (PyTorch stores [out, in]; pre-transposed here).
# ---------------------------------------------------------------------------
def init_params(key):
    linear_dims = [
        ("tp_w", "tp_b", 512, 64),        # text_proj
        ("ip_w", "ip_b", 768, 64),        # image_proj
        ("et_w1", "et_b1", 64, 64),       # Encoder (text) layer 1
        ("et_w2", "et_b2", 64, 2 * Z_DIM),
        ("ei_w1", "ei_b1", 64, 64),       # Encoder (image) layer 1
        ("ei_w2", "ei_b2", 64, 2 * Z_DIM),
        ("ut_w1", "ut_b1", 512, 128),     # UnimodalDetection text
        ("ut_w2", "ut_b2", 128, 16),
        ("ui_w1", "ui_b1", 768, 128),     # UnimodalDetection image
        ("ui_w2", "ui_b2", 128, 16),
        ("cm_w", "cm_b", 64, 64),         # CrossModule4Batch c_specific_2
        ("cl_w1", "cl_b1", 96, 64),       # classifier_corre
        ("cl_w2", "cl_b2", 64, 64),
        ("cl_w3", "cl_b3", 64, 2),
    ]
    bn_dims = [
        ("ut_g1", "ut_be1", 128), ("ut_g2", "ut_be2", 16),
        ("ui_g1", "ui_be1", 128), ("ui_g2", "ui_be2", 16),
        ("cm_g", "cm_be", 64),
        ("cl_g1", "cl_be1", 64), ("cl_g2", "cl_be2", 64),
    ]
    p = {}
    keys = jax.random.split(key, len(linear_dims))
    for (wn, bn_name, fi, fo), k in zip(linear_dims, keys):
        k1, k2 = jax.random.split(k)
        p[wn] = (jax.random.normal(k1, (fi, fo)) / math.sqrt(fi)).astype(jnp.float32)
        p[bn_name] = (jax.random.normal(k2, (1, fo)) * 0.02).astype(jnp.float32)
    for gn, ben, d in bn_dims:
        p[gn] = jnp.ones((1, d), jnp.float32)
        p[ben] = jnp.zeros((1, d), jnp.float32)
    return p


# TODO(synk): the pretrained CLIPVisionModel / CLIPTextModel backbones and the
# tokenizer are external checkpoints with no in-script equivalent; the kernel
# consumes their pooled outputs directly.
if __name__ == "__main__":
    key = jax.random.PRNGKey(0)
    k_p, k_t, k_i, k_e1, k_e2, k_tg = jax.random.split(key, 6)

    params = init_params(k_p)
    txt_pool = jax.random.normal(k_t, (B, 512), jnp.float32)   # text pooler_output
    img_pool = jax.random.normal(k_i, (B, 768), jnp.float32)   # image pooler_output
    eps1 = jax.random.normal(k_e1, (B, Z_DIM), jnp.float32)    # rsample noise (text)
    eps2 = jax.random.normal(k_e2, (B, Z_DIM), jnp.float32)    # rsample noise (image)
    targets = jax.random.randint(k_tg, (B,), 0, 2)
    onehot = jax.nn.one_hot(targets, 2, dtype=jnp.float32)

    packed = pack_params(params, MATMUL_DTYPE)
    loss, pred = albef_head(txt_pool, img_pool, eps1, eps2, onehot, packed)
    jax.block_until_ready((loss, pred))

    # pure-JAX reference check (original un-fused math); atol gives headroom for
    # the documented EUP approx-reciprocal paths.
    ref_loss, ref_pred = _forward_ref(txt_pool, img_pool, eps1, eps2, onehot, params)
    np.testing.assert_allclose(np.asarray(loss), np.asarray(ref_loss),
                               rtol=2e-2, atol=5e-3)
    np.testing.assert_allclose(np.asarray(pred), np.asarray(ref_pred),
                               rtol=2e-2, atol=5e-3)
    print("KERNEL_OK")
</pallas_src>

<mosaic_0001>
module attributes {stable_mosaic.version = 11 : i64} {
  func.func @albef_head_kernel(%arg0: memref<8x512xf32, #tpu.memory_space<vmem>>, %arg1: memref<8x768xf32, #tpu.memory_space<vmem>>, %arg2: memref<8x128xf32, #tpu.memory_space<vmem>>, %arg3: memref<512x192xbf16, #tpu.memory_space<vmem>>, %arg4: memref<768x192xbf16, #tpu.memory_space<vmem>>, %arg5: memref<128x128xf32, #tpu.memory_space<vmem>>, %arg6: memref<672x64xf32, #tpu.memory_space<vmem>>, %arg7: memref<24x256xf32, #tpu.memory_space<vmem>>, %arg8: memref<8x128xf32, #tpu.memory_space<vmem>>) attributes {dimension_semantics = [], scalar_prefetch = 0 : i64, scratch_operands = 0 : i64, tpu.core_type = #tpu.core_type<tc>} {
    %c0 = arith.constant 0 : index
    %c0_0 = arith.constant 0 : index
    %0 = vector.load %arg0[%c0, %c0_0] : memref<8x512xf32, #tpu.memory_space<vmem>>, vector<8x512xf32>
    %c0_1 = arith.constant 0 : index
    %c0_2 = arith.constant 0 : index
    %1 = vector.load %arg1[%c0_1, %c0_2] : memref<8x768xf32, #tpu.memory_space<vmem>>, vector<8x768xf32>
    %c0_3 = arith.constant 0 : index
    %c0_4 = arith.constant 0 : index
    %2 = vector.load %arg2[%c0_3, %c0_4] : memref<8x128xf32, #tpu.memory_space<vmem>>, vector<8x128xf32>
    %3 = vector.extract_strided_slice %2 {offsets = [0, 0], sizes = [8, 2], strides = [1, 1]} : vector<8x128xf32> to vector<8x2xf32>
    %4 = vector.extract_strided_slice %2 {offsets = [0, 2], sizes = [8, 2], strides = [1, 1]} : vector<8x128xf32> to vector<8x2xf32>
    %5 = vector.extract_strided_slice %2 {offsets = [0, 4], sizes = [8, 2], strides = [1, 1]} : vector<8x128xf32> to vector<8x2xf32>
    %c0_5 = arith.constant 0 : index
    %c0_6 = arith.constant 0 : index
    %6 = vector.load %arg6[%c0_5, %c0_6] : memref<672x64xf32, #tpu.memory_space<vmem>>, vector<672x64xf32>
    %c0_7 = arith.constant 0 : index
    %c0_8 = arith.constant 0 : index
    %7 = vector.load %arg7[%c0_7, %c0_8] : memref<24x256xf32, #tpu.memory_space<vmem>>, vector<24x256xf32>
    %8 = arith.truncf %0 : vector<8x512xf32> to vector<8x512xbf16>
    %c0_9 = arith.constant 0 : index
    %c0_10 = arith.constant 0 : index
    %9 = vector.load %arg3[%c0_9, %c0_10] : memref<512x192xbf16, #tpu.memory_space<vmem>>, vector<512x192xbf16>
    %cst = arith.constant dense<0.000000e+00> : vector<8x192xf32>
    %10 = tpu.matmul %8, %9, %cst {dimension_numbers = #tpu.dot_dimension_numbers<[1], [0], [0], [1], [0, 0, 1, 1], [], []>} : vector<8x512xbf16>, vector<512x192xbf16>, vector<8x192xf32> -> vector<8x192xf32>
    %11 = vector.extract_strided_slice %7 {offsets = [0, 0], sizes = [1, 192], strides = [1, 1]} : vector<24x256xf32> to vector<1x192xf32>
    %12 = vector.broadcast %11 : vector<1x192xf32> to vector<8x192xf32>
    %13 = arith.addf %10, %12 : vector<8x192xf32>
    %14 = arith.truncf %1 : vector<8x768xf32> to vector<8x768xbf16>
    %c0_11 = arith.constant 0 : index
    %c0_12 = arith.constant 0 : index
    %15 = vector.load %arg4[%c0_11, %c0_12] : memref<768x192xbf16, #tpu.memory_space<vmem>>, vector<768x192xbf16>
    %cst_13 = arith.constant dense<0.000000e+00> : vector<8x192xf32>
    %16 = tpu.matmul %14, %15, %cst_13 {dimension_numbers = #tpu.dot_dimension_numbers<[1], [0], [0], [1], [0, 0, 1, 1], [], []>} : vector<8x768xbf16>, vector<768x192xbf16>, vector<8x192xf32> -> vector<8x192xf32>
    %17 = vector.extract_strided_slice %7 {offsets = [1, 0], sizes = [1, 192], strides = [1, 1]} : vector<24x256xf32> to vector<1x192xf32>
    %18 = vector.broadcast %17 : vector<1x192xf32> to vector<8x192xf32>
    %19 = arith.addf %16, %18 : vector<8x192xf32>
    %20 = vector.extract_strided_slice %13 {offsets = [0, 128], sizes = [8, 64], strides = [1, 1]} : vector<8x192xf32> to vector<8x64xf32>
    %21 = vector.extract_strided_slice %19 {offsets = [0, 128], sizes = [8, 64], strides = [1, 1]} : vector<8x192xf32> to vector<8x64xf32>
    %22 = tpu.concatenate %20, %21 in 1 : vector<8x64xf32>, vector<8x64xf32> -> vector<8x128xf32>
    %c0_14 = arith.constant 0 : index
    %c0_15 = arith.constant 0 : index
    %23 = vector.load %arg5[%c0_14, %c0_15] : memref<128x128xf32, #tpu.memory_space<vmem>>, vector<128x128xf32>
    %cst_16 = arith.constant dense<0.000000e+00> : vector<8x128xf32>
    %24 = tpu.matmul %22, %23, %cst_16 {dimension_numbers = #tpu.dot_dimension_numbers<[1], [0], [0], [1], [0, 0, 1, 1], [], []>} : vector<8x128xf32>, vector<128x128xf32>, vector<8x128xf32> -> vector<8x128xf32>
    %25 = vector.extract_strided_slice %7 {offsets = [4, 0], sizes = [1, 128], strides = [1, 1]} : vector<24x256xf32> to vector<1x128xf32>
    %26 = vector.broadcast %25 : vector<1x128xf32> to vector<8x128xf32>
    %27 = arith.addf %24, %26 : vector<8x128xf32>
    %cst_17 = arith.constant 0.000000e+00 : f32
    %28 = vector.broadcast %cst_17 : f32 to vector<8x128xf32>
    %29 = arith.maximumf %27, %28 : vector<8x128xf32>
    %30 = vector.extract_strided_slice %6 {offsets = [0, 0], sizes = [128, 64], strides = [1, 1]} : vector<672x64xf32> to vector<128x64xf32>
    %cst_18 = arith.constant dense<0.000000e+00> : vector<8x64xf32>
    %31 = tpu.matmul %29, %30, %cst_18 {dimension_numbers = #tpu.dot_dimension_numbers<[1], [0], [0], [1], [0, 0, 1, 1], [], []>} : vector<8x128xf32>, vector<128x64xf32>, vector<8x64xf32> -> vector<8x64xf32>
    %32 = vector.extract_strided_slice %31 {offsets = [0, 0], sizes = [8, 8], strides = [1, 1]} : vector<8x64xf32> to vector<8x8xf32>
    %33 = vector.extract_strided_slice %7 {offsets = [5, 0], sizes = [1, 8], strides = [1, 1]} : vector<24x256xf32> to vector<1x8xf32>
    %34 = vector.broadcast %33 : vector<1x8xf32> to vector<8x8xf32>
    %35 = arith.addf %32, %34 : vector<8x8xf32>
    %36 = vector.extract_strided_slice %35 {offsets = [0, 0], sizes = [8, 2], strides = [1, 1]} : vector<8x8xf32> to vector<8x2xf32>
    %37 = vector.extract_strided_slice %35 {offsets = [0, 2], sizes = [8, 2], strides = [1, 1]} : vector<8x8xf32> to vector<8x2xf32>
    %38 = vector.extract_strided_slice %35 {offsets = [0, 4], sizes = [8, 2], strides = [1, 1]} : vector<8x8xf32> to vector<8x2xf32>
    %39 = vector.extract_strided_slice %35 {offsets = [0, 6], sizes = [8, 2], strides = [1, 1]} : vector<8x8xf32> to vector<8x2xf32>
    %cst_19 = arith.constant 0.000000e+00 : f32
    %40 = vector.broadcast %cst_19 : f32 to vector<8x2xf32>
    %41 = arith.maximumf %37, %40 : vector<8x2xf32>
    %42 = math.absf %37 : vector<8x2xf32>
    %cst_20 = arith.constant 0.000000e+00 : f32
    %43 = vector.broadcast %cst_20 : f32 to vector<8x2xf32>
    %44 = arith.subf %43, %42 : vector<8x2xf32>
    %45 = math.exp %44 : vector<8x2xf32>
    %cst_21 = arith.constant 1.000000e+00 : f32
    %46 = vector.broadcast %cst_21 : f32 to vector<8x2xf32>
    %47 = arith.addf %46, %45 : vector<8x2xf32>
    %48 = math.log %47 : vector<8x2xf32>
    %49 = arith.addf %41, %48 : vector<8x2xf32>
    %cst_22 = arith.constant 1.000000e-07 : f32
    %50 = vector.broadcast %cst_22 : f32 to vector<8x2xf32>
    %51 = arith.addf %49, %50 : vector<8x2xf32>
    %cst_23 = arith.constant 0.000000e+00 : f32
    %52 = vector.broadcast %cst_23 : f32 to vector<8x2xf32>
    %53 = arith.maximumf %39, %52 : vector<8x2xf32>
    %54 = math.absf %39 : vector<8x2xf32>
    %cst_24 = arith.constant 0.000000e+00 : f32
    %55 = vector.broadcast %cst_24 : f32 to vector<8x2xf32>
    %56 = arith.subf %55, %54 : vector<8x2xf32>
    %57 = math.exp %56 : vector<8x2xf32>
    %cst_25 = arith.constant 1.000000e+00 : f32
    %58 = vector.broadcast %cst_25 : f32 to vector<8x2xf32>
    %59 = arith.addf %58, %57 : vector<8x2xf32>
    %60 = math.log %59 : vector<8x2xf32>
    %61 = arith.addf %53, %60 : vector<8x2xf32>
    %cst_26 = arith.constant 1.000000e-07 : f32
    %62 = vector.broadcast %cst_26 : f32 to vector<8x2xf32>
    %63 = arith.addf %61, %62 : vector<8x2xf32>
    %64 = arith.mulf %51, %3 : vector<8x2xf32>
    %65 = arith.addf %36, %64 : vector<8x2xf32>
    %66 = arith.mulf %63, %4 : vector<8x2xf32>
    %67 = arith.addf %38, %66 : vector<8x2xf32>
    %68 = arith.subf %65, %36 : vector<8x2xf32>
    %69 = arith.divf %68, %51 : vector<8x2xf32>
    %cst_27 = arith.constant -5.000000e-01 : f32
    %70 = vector.broadcast %cst_27 : f32 to vector<8x2xf32>
    %71 = arith.mulf %70, %69 : vector<8x2xf32>
    %72 = arith.mulf %71, %69 : vector<8x2xf32>
    %73 = math.log %51 : vector<8x2xf32>
    %74 = arith.subf %72, %73 : vector<8x2xf32>
    %cst_28 = arith.constant 0.918938517 : f32
    %75 = vector.broadcast %cst_28 : f32 to vector<8x2xf32>
    %76 = arith.subf %74, %75 : vector<8x2xf32>
    %cst_29 = arith.constant dense<0.000000e+00> : vector<8xf32>
    %77 = vector.multi_reduction <add>, %76, %cst_29 [1] : vector<8x2xf32> to vector<8xf32>
    %78 = vector.shape_cast %77 : vector<8xf32> to vector<8x1xf32>
    %79 = arith.subf %65, %38 : vector<8x2xf32>
    %80 = arith.divf %79, %63 : vector<8x2xf32>
    %cst_30 = arith.constant -5.000000e-01 : f32
    %81 = vector.broadcast %cst_30 : f32 to vector<8x2xf32>
    %82 = arith.mulf %81, %80 : vector<8x2xf32>
    %83 = arith.mulf %82, %80 : vector<8x2xf32>
    %84 = math.log %63 : vector<8x2xf32>
    %85 = arith.subf %83, %84 : vector<8x2xf32>
    %cst_31 = arith.constant 0.918938517 : f32
    %86 = vector.broadcast %cst_31 : f32 to vector<8x2xf32>
    %87 = arith.subf %85, %86 : vector<8x2xf32>
    %cst_32 = arith.constant dense<0.000000e+00> : vector<8xf32>
    %88 = vector.multi_reduction <add>, %87, %cst_32 [1] : vector<8x2xf32> to vector<8xf32>
    %89 = vector.shape_cast %88 : vector<8xf32> to vector<8x1xf32>
    %90 = arith.subf %78, %89 : vector<8x1xf32>
    %91 = arith.subf %67, %38 : vector<8x2xf32>
    %92 = arith.divf %91, %63 : vector<8x2xf32>
    %cst_33 = arith.constant -5.000000e-01 : f32
    %93 = vector.broadcast %cst_33 : f32 to vector<8x2xf32>
    %94 = arith.mulf %93, %92 : vector<8x2xf32>
    %95 = arith.mulf %94, %92 : vector<8x2xf32>
    %96 = math.log %63 : vector<8x2xf32>
    %97 = arith.subf %95, %96 : vector<8x2xf32>
    %cst_34 = arith.constant 0.918938517 : f32
    %98 = vector.broadcast %cst_34 : f32 to vector<8x2xf32>
    %99 = arith.subf %97, %98 : vector<8x2xf32>
    %cst_35 = arith.constant dense<0.000000e+00> : vector<8xf32>
    %100 = vector.multi_reduction <add>, %99, %cst_35 [1] : vector<8x2xf32> to vector<8xf32>
    %101 = vector.shape_cast %100 : vector<8xf32> to vector<8x1xf32>
    %102 = arith.subf %67, %36 : vector<8x2xf32>
    %103 = arith.divf %102, %51 : vector<8x2xf32>
    %cst_36 = arith.constant -5.000000e-01 : f32
    %104 = vector.broadcast %cst_36 : f32 to vector<8x2xf32>
    %105 = arith.mulf %104, %103 : vector<8x2xf32>
    %106 = arith.mulf %105, %103 : vector<8x2xf32>
    %107 = math.log %51 : vector<8x2xf32>
    %108 = arith.subf %106, %107 : vector<8x2xf32>
    %cst_37 = arith.constant 0.918938517 : f32
    %109 = vector.broadcast %cst_37 : f32 to vector<8x2xf32>
    %110 = arith.subf %108, %109 : vector<8x2xf32>
    %cst_38 = arith.constant dense<0.000000e+00> : vector<8xf32>
    %111 = vector.multi_reduction <add>, %110, %cst_38 [1] : vector<8x2xf32> to vector<8xf32>
    %112 = vector.shape_cast %111 : vector<8xf32> to vector<8x1xf32>
    %113 = arith.subf %101, %112 : vector<8x1xf32>
    %114 = arith.addf %90, %113 : vector<8x1xf32>
    %cst_39 = arith.constant 5.000000e-01 : f32
    %115 = vector.broadcast %cst_39 : f32 to vector<8x1xf32>
    %116 = arith.mulf %115, %114 : vector<8x1xf32>
    %cst_40 = arith.constant 0.000000e+00 : f32
    %117 = vector.broadcast %cst_40 : f32 to vector<8x1xf32>
    %118 = arith.subf %117, %116 : vector<8x1xf32>
    %119 = math.exp %118 : vector<8x1xf32>
    %cst_41 = arith.constant 1.000000e+00 : f32
    %120 = vector.broadcast %cst_41 : f32 to vector<8x1xf32>
    %121 = arith.addf %120, %119 : vector<8x1xf32>
    %122 = tpu.reciprocal %121 {approx = true} : vector<8x1xf32> -> vector<8x1xf32>
    %123 = vector.extract_strided_slice %13 {offsets = [0, 0], sizes = [8, 128], strides = [1, 1]} : vector<8x192xf32> to vector<8x128xf32>
    %124 = vector.extract_strided_slice %19 {offsets = [0, 0], sizes = [8, 128], strides = [1, 1]} : vector<8x192xf32> to vector<8x128xf32>
    %125 = tpu.concatenate %123, %124 in 1 : vector<8x128xf32>, vector<8x128xf32> -> vector<8x256xf32>
    %126 = vector.extract_strided_slice %7 {offsets = [2, 0], sizes = [1, 256], strides = [1, 1]} : vector<24x256xf32> to vector<1x256xf32>
    %127 = vector.extract_strided_slice %7 {offsets = [3, 0], sizes = [1, 256], strides = [1, 1]} : vector<24x256xf32> to vector<1x256xf32>
    %cst_42 = arith.constant dense<0.000000e+00> : vector<256xf32>
    %128 = vector.multi_reduction <add>, %125, %cst_42 [0] : vector<8x256xf32> to vector<256xf32>
    %129 = vector.shape_cast %128 : vector<256xf32> to vector<1x256xf32>
    %cst_43 = arith.constant 8.000000e+00 : f32
    %130 = vector.broadcast %cst_43 : f32 to vector<1x256xf32>
    %131 = arith.divf %129, %130 : vector<1x256xf32>
    %132 = vector.broadcast %131 : vector<1x256xf32> to vector<8x256xf32>
    %133 = arith.subf %125, %132 : vector<8x256xf32>
    %134 = arith.mulf %133, %133 : vector<8x256xf32>
    %cst_44 = arith.constant dense<0.000000e+00> : vector<256xf32>
    %135 = vector.multi_reduction <add>, %134, %cst_44 [0] : vector<8x256xf32> to vector<256xf32>
    %136 = vector.shape_cast %135 : vector<256xf32> to vector<1x256xf32>
    %cst_45 = arith.constant 8.000000e+00 : f32
    %137 = vector.broadcast %cst_45 : f32 to vector<1x256xf32>
    %138 = arith.divf %136, %137 : vector<1x256xf32>
    %cst_46 = arith.constant 9.99999974E-6 : f32
    %139 = vector.broadcast %cst_46 : f32 to vector<1x256xf32>
    %140 = arith.addf %138, %139 : vector<1x256xf32>
    %141 = math.rsqrt %140 : vector<1x256xf32>
    %142 = arith.mulf %126, %141 : vector<1x256xf32>
    %143 = arith.mulf %131, %142 : vector<1x256xf32>
    %144 = arith.subf %127, %143 : vector<1x256xf32>
    %145 = vector.broadcast %142 : vector<1x256xf32> to vector<8x256xf32>
    %146 = arith.mulf %125, %145 : vector<8x256xf32>
    %147 = vector.broadcast %144 : vector<1x256xf32> to vector<8x256xf32>
    %148 = arith.addf %146, %147 : vector<8x256xf32>
    %cst_47 = arith.constant 0.000000e+00 : f32
    %149 = vector.broadcast %cst_47 : f32 to vector<8x256xf32>
    %150 = arith.maximumf %148, %149 : vector<8x256xf32>
    %151 = vector.extract_strided_slice %6 {offsets = [128, 0], sizes = [256, 64], strides = [1, 1]} : vector<672x64xf32> to vector<256x64xf32>
    %cst_48 = arith.constant dense<0.000000e+00> : vector<8x64xf32>
    %152 = tpu.matmul %150, %151, %cst_48 {dimension_numbers = #tpu.dot_dimension_numbers<[1], [0], [0], [1], [0, 0, 1, 1], [], []>} : vector<8x256xf32>, vector<256x64xf32>, vector<8x64xf32> -> vector<8x64xf32>
    %153 = vector.extract_strided_slice %152 {offsets = [0, 0], sizes = [8, 32], strides = [1, 1]} : vector<8x64xf32> to vector<8x32xf32>
    %154 = vector.extract_strided_slice %7 {offsets = [6, 0], sizes = [1, 32], strides = [1, 1]} : vector<24x256xf32> to vector<1x32xf32>
    %155 = vector.broadcast %154 : vector<1x32xf32> to vector<8x32xf32>
    %156 = arith.addf %153, %155 : vector<8x32xf32>
    %157 = vector.extract_strided_slice %7 {offsets = [7, 0], sizes = [1, 32], strides = [1, 1]} : vector<24x256xf32> to vector<1x32xf32>
    %158 = vector.extract_strided_slice %7 {offsets = [8, 0], sizes = [1, 32], strides = [1, 1]} : vector<24x256xf32> to vector<1x32xf32>
    %cst_49 = arith.constant dense<0.000000e+00> : vector<32xf32>
    %159 = vector.multi_reduction <add>, %156, %cst_49 [0] : vector<8x32xf32> to vector<32xf32>
    %160 = vector.shape_cast %159 : vector<32xf32> to vector<1x32xf32>
    %cst_50 = arith.constant 8.000000e+00 : f32
    %161 = vector.broadcast %cst_50 : f32 to vector<1x32xf32>
    %162 = arith.divf %160, %161 : vector<1x32xf32>
    %163 = vector.broadcast %162 : vector<1x32xf32> to vector<8x32xf32>
    %164 = arith.subf %156, %163 : vector<8x32xf32>
    %165 = arith.mulf %164, %164 : vector<8x32xf32>
    %cst_51 = arith.constant dense<0.000000e+00> : vector<32xf32>
    %166 = vector.multi_reduction <add>, %165, %cst_51 [0] : vector<8x32xf32> to vector<32xf32>
    %167 = vector.shape_cast %166 : vector<32xf32> to vector<1x32xf32>
    %cst_52 = arith.constant 8.000000e+00 : f32
    %168 = vector.broadcast %cst_52 : f32 to vector<1x32xf32>
    %169 = arith.divf %167, %168 : vector<1x32xf32>
    %cst_53 = arith.constant 9.99999974E-6 : f32
    %170 = vector.broadcast %cst_53 : f32 to vector<1x32xf32>
    %171 = arith.addf %169, %170 : vector<1x32xf32>
    %172 = math.rsqrt %171 : vector<1x32xf32>
    %173 = arith.mulf %157, %172 : vector<1x32xf32>
    %174 = arith.mulf %162, %173 : vector<1x32xf32>
    %175 = arith.subf %158, %174 : vector<1x32xf32>
    %176 = vector.broadcast %173 : vector<1x32xf32> to vector<8x32xf32>
    %177 = arith.mulf %156, %176 : vector<8x32xf32>
    %178 = vector.broadcast %175 : vector<1x32xf32> to vector<8x32xf32>
    %179 = arith.addf %177, %178 : vector<8x32xf32>
    %cst_54 = arith.constant 0.000000e+00 : f32
    %180 = vector.broadcast %cst_54 : f32 to vector<8x32xf32>
    %181 = arith.maximumf %179, %180 : vector<8x32xf32>
    %cst_55 = arith.constant dense<0xFF800000> : vector<8xf32>
    %182 = vector.multi_reduction <maximumf>, %21, %cst_55 [1] : vector<8x64xf32> to vector<8xf32>
    %183 = vector.shape_cast %182 : vector<8xf32> to vector<8x1xf32>
    %cst_56 = arith.constant dense<0x7F800000> : vector<8xf32>
    %184 = vector.multi_reduction <minimumf>, %21, %cst_56 [1] : vector<8x64xf32> to vector<8xf32>
    %185 = vector.shape_cast %184 : vector<8xf32> to vector<8x1xf32>
    %cst_57 = arith.constant 1.250000e-01 : f32
    %186 = vector.broadcast %cst_57 : f32 to vector<8x64xf32>
    %187 = arith.mulf %20, %186 : vector<8x64xf32>
    %cst_58 = arith.constant 0.000000e+00 : f32
    %188 = vector.broadcast %cst_58 : f32 to vector<8x64xf32>
    %189 = arith.cmpf oge, %20, %188 : vector<8x64xf32>
    %190 = vector.shape_cast %183 : vector<8x1xf32> to vector<8x1xf32>
    %191 = vector.broadcast %190 : vector<8x1xf32> to vector<8x64xf32>
    %192 = vector.shape_cast %185 : vector<8x1xf32> to vector<8x1xf32>
    %193 = vector.broadcast %192 : vector<8x1xf32> to vector<8x64xf32>
    %194 = arith.select %189, %191, %193 : vector<8x64xi1>, vector<8x64xf32>
    %195 = arith.mulf %187, %194 : vector<8x64xf32>
    %196 = vector.shape_cast %20 : vector<8x64xf32> to vector<8x64x1xf32>
    %cst_59 = arith.constant 1.250000e-01 : f32
    %197 = vector.broadcast %cst_59 : f32 to vector<8x64x1xf32>
    %198 = arith.mulf %196, %197 : vector<8x64x1xf32>
    %199 = vector.shape_cast %21 : vector<8x64xf32> to vector<8x1x64xf32>
    %200 = vector.broadcast %198 : vector<8x64x1xf32> to vector<8x64x64xf32>
    %201 = vector.broadcast %199 : vector<8x1x64xf32> to vector<8x64x64xf32>
    %202 = arith.mulf %200, %201 : vector<8x64x64xf32>
    %203 = vector.shape_cast %195 : vector<8x64xf32> to vector<8x64x1xf32>
    %204 = vector.broadcast %203 : vector<8x64x1xf32> to vector<8x64x64xf32>
    %205 = arith.subf %202, %204 : vector<8x64x64xf32>
    %206 = math.exp %205 : vector<8x64x64xf32>
    %cst_60 = arith.constant dense<0.000000e+00> : vector<8x64xf32>
    %207 = vector.multi_reduction <add>, %206, %cst_60 [2] : vector<8x64x64xf32> to vector<8x64xf32>
    %208 = tpu.reciprocal %207 {approx = true} : vector<8x64xf32> -> vector<8x64xf32>
    %209 = vector.extract_strided_slice %6 {offsets = [384, 0], sizes = [64, 64], strides = [1, 1]} : vector<672x64xf32> to vector<64x64xf32>
    %cst_61 = arith.constant dense<0.000000e+00> : vector<8x64xf32>
    %210 = tpu.matmul %208, %209, %cst_61 {dimension_numbers = #tpu.dot_dimension_numbers<[1], [0], [0], [1], [0, 0, 1, 1], [], []>} : vector<8x64xf32>, vector<64x64xf32>, vector<8x64xf32> -> vector<8x64xf32>
    %211 = vector.extract_strided_slice %7 {offsets = [9, 0], sizes = [1, 64], strides = [1, 1]} : vector<24x256xf32> to vector<1x64xf32>
    %212 = vector.broadcast %211 : vector<1x64xf32> to vector<8x64xf32>
    %213 = arith.addf %210, %212 : vector<8x64xf32>
    %214 = vector.extract_strided_slice %7 {offsets = [10, 0], sizes = [1, 64], strides = [1, 1]} : vector<24x256xf32> to vector<1x64xf32>
    %215 = vector.extract_strided_slice %7 {offsets = [11, 0], sizes = [1, 64], strides = [1, 1]} : vector<24x256xf32> to vector<1x64xf32>
    %cst_62 = arith.constant dense<0.000000e+00> : vector<64xf32>
    %216 = vector.multi_reduction <add>, %213, %cst_62 [0] : vector<8x64xf32> to vector<64xf32>
    %217 = vector.shape_cast %216 : vector<64xf32> to vector<1x64xf32>
    %cst_63 = arith.constant 8.000000e+00 : f32
    %218 = vector.broadcast %cst_63 : f32 to vector<1x64xf32>
    %219 = arith.divf %217, %218 : vector<1x64xf32>
    %220 = vector.broadcast %219 : vector<1x64xf32> to vector<8x64xf32>
    %221 = arith.subf %213, %220 : vector<8x64xf32>
    %222 = arith.mulf %221, %221 : vector<8x64xf32>
    %cst_64 = arith.constant dense<0.000000e+00> : vector<64xf32>
    %223 = vector.multi_reduction <add>, %222, %cst_64 [0] : vector<8x64xf32> to vector<64xf32>
    %224 = vector.shape_cast %223 : vector<64xf32> to vector<1x64xf32>
    %cst_65 = arith.constant 8.000000e+00 : f32
    %225 = vector.broadcast %cst_65 : f32 to vector<1x64xf32>
    %226 = arith.divf %224, %225 : vector<1x64xf32>
    %cst_66 = arith.constant 9.99999974E-6 : f32
    %227 = vector.broadcast %cst_66 : f32 to vector<1x64xf32>
    %228 = arith.addf %226, %227 : vector<1x64xf32>
    %229 = math.rsqrt %228 : vector<1x64xf32>
    %230 = arith.mulf %214, %229 : vector<1x64xf32>
    %231 = arith.mulf %219, %230 : vector<1x64xf32>
    %232 = arith.subf %215, %231 : vector<1x64xf32>
    %233 = vector.broadcast %230 : vector<1x64xf32> to vector<8x64xf32>
    %234 = arith.mulf %213, %233 : vector<8x64xf32>
    %235 = vector.broadcast %232 : vector<1x64xf32> to vector<8x64xf32>
    %236 = arith.addf %234, %235 : vector<8x64xf32>
    %cst_67 = arith.constant 0.000000e+00 : f32
    %237 = vector.broadcast %cst_67 : f32 to vector<8x64xf32>
    %238 = arith.maximumf %236, %237 : vector<8x64xf32>
    %cst_68 = arith.constant 1.000000e+00 : f32
    %239 = vector.broadcast %cst_68 : f32 to vector<8x1xf32>
    %240 = arith.subf %239, %122 : vector<8x1xf32>
    %241 = vector.broadcast %240 : vector<8x1xf32> to vector<8x32xf32>
    %242 = arith.mulf %241, %181 : vector<8x32xf32>
    %243 = vector.broadcast %122 : vector<8x1xf32> to vector<8x64xf32>
    %244 = arith.mulf %243, %238 : vector<8x64xf32>
    %245 = tpu.concatenate %242, %244 in 1 : vector<8x32xf32>, vector<8x64xf32> -> vector<8x96xf32>
    %246 = vector.extract_strided_slice %6 {offsets = [448, 0], sizes = [96, 64], strides = [1, 1]} : vector<672x64xf32> to vector<96x64xf32>
    %cst_69 = arith.constant dense<0.000000e+00> : vector<8x64xf32>
    %247 = tpu.matmul %245, %246, %cst_69 {dimension_numbers = #tpu.dot_dimension_numbers<[1], [0], [0], [1], [0, 0, 1, 1], [], []>} : vector<8x96xf32>, vector<96x64xf32>, vector<8x64xf32> -> vector<8x64xf32>
    %248 = vector.extract_strided_slice %7 {offsets = [12, 0], sizes = [1, 64], strides = [1, 1]} : vector<24x256xf32> to vector<1x64xf32>
    %249 = vector.broadcast %248 : vector<1x64xf32> to vector<8x64xf32>
    %250 = arith.addf %247, %249 : vector<8x64xf32>
    %251 = vector.extract_strided_slice %7 {offsets = [13, 0], sizes = [1, 64], strides = [1, 1]} : vector<24x256xf32> to vector<1x64xf32>
    %252 = vector.extract_strided_slice %7 {offsets = [14, 0], sizes = [1, 64], strides = [1, 1]} : vector<24x256xf32> to vector<1x64xf32>
    %cst_70 = arith.constant dense<0.000000e+00> : vector<64xf32>
    %253 = vector.multi_reduction <add>, %250, %cst_70 [0] : vector<8x64xf32> to vector<64xf32>
    %254 = vector.shape_cast %253 : vector<64xf32> to vector<1x64xf32>
    %cst_71 = arith.constant 8.000000e+00 : f32
    %255 = vector.broadcast %cst_71 : f32 to vector<1x64xf32>
    %256 = arith.divf %254, %255 : vector<1x64xf32>
    %257 = vector.broadcast %256 : vector<1x64xf32> to vector<8x64xf32>
    %258 = arith.subf %250, %257 : vector<8x64xf32>
    %259 = arith.mulf %258, %258 : vector<8x64xf32>
    %cst_72 = arith.constant dense<0.000000e+00> : vector<64xf32>
    %260 = vector.multi_reduction <add>, %259, %cst_72 [0] : vector<8x64xf32> to vector<64xf32>
    %261 = vector.shape_cast %260 : vector<64xf32> to vector<1x64xf32>
    %cst_73 = arith.constant 8.000000e+00 : f32
    %262 = vector.broadcast %cst_73 : f32 to vector<1x64xf32>
    %263 = arith.divf %261, %262 : vector<1x64xf32>
    %cst_74 = arith.constant 9.99999974E-6 : f32
    %264 = vector.broadcast %cst_74 : f32 to vector<1x64xf32>
    %265 = arith.addf %263, %264 : vector<1x64xf32>
    %266 = math.rsqrt %265 : vector<1x64xf32>
    %267 = arith.mulf %251, %266 : vector<1x64xf32>
    %268 = arith.mulf %256, %267 : vector<1x64xf32>
    %269 = arith.subf %252, %268 : vector<1x64xf32>
    %270 = vector.broadcast %267 : vector<1x64xf32> to vector<8x64xf32>
    %271 = arith.mulf %250, %270 : vector<8x64xf32>
    %272 = vector.broadcast %269 : vector<1x64xf32> to vector<8x64xf32>
    %273 = arith.addf %271, %272 : vector<8x64xf32>
    %cst_75 = arith.constant 0.000000e+00 : f32
    %274 = vector.broadcast %cst_75 : f32 to vector<8x64xf32>
    %275 = arith.maximumf %273, %274 : vector<8x64xf32>
    %276 = vector.extract_strided_slice %6 {offsets = [544, 0], sizes = [64, 64], strides = [1, 1]} : vector<672x64xf32> to vector<64x64xf32>
    %cst_76 = arith.constant dense<0.000000e+00> : vector<8x64xf32>
    %277 = tpu.matmul %275, %276, %cst_76 {dimension_numbers = #tpu.dot_dimension_numbers<[1], [0], [0], [1], [0, 0, 1, 1], [], []>} : vector<8x64xf32>, vector<64x64xf32>, vector<8x64xf32> -> vector<8x64xf32>
    %278 = vector.extract_strided_slice %7 {offsets = [15, 0], sizes = [1, 64], strides = [1, 1]} : vector<24x256xf32> to vector<1x64xf32>
    %279 = vector.broadcast %278 : vector<1x64xf32> to vector<8x64xf32>
    %280 = arith.addf %277, %279 : vector<8x64xf32>
    %281 = vector.extract_strided_slice %7 {offsets = [16, 0], sizes = [1, 64], strides = [1, 1]} : vector<24x256xf32> to vector<1x64xf32>
    %282 = vector.extract_strided_slice %7 {offsets = [17, 0], sizes = [1, 64], strides = [1, 1]} : vector<24x256xf32> to vector<1x64xf32>
    %cst_77 = arith.constant dense<0.000000e+00> : vector<64xf32>
    %283 = vector.multi_reduction <add>, %280, %cst_77 [0] : vector<8x64xf32> to vector<64xf32>
    %284 = vector.shape_cast %283 : vector<64xf32> to vector<1x64xf32>
    %cst_78 = arith.constant 8.000000e+00 : f32
    %285 = vector.broadcast %cst_78 : f32 to vector<1x64xf32>
    %286 = arith.divf %284, %285 : vector<1x64xf32>
    %287 = vector.broadcast %286 : vector<1x64xf32> to vector<8x64xf32>
    %288 = arith.subf %280, %287 : vector<8x64xf32>
    %289 = arith.mulf %288, %288 : vector<8x64xf32>
    %cst_79 = arith.constant dense<0.000000e+00> : vector<64xf32>
    %290 = vector.multi_reduction <add>, %289, %cst_79 [0] : vector<8x64xf32> to vector<64xf32>
    %291 = vector.shape_cast %290 : vector<64xf32> to vector<1x64xf32>
    %cst_80 = arith.constant 8.000000e+00 : f32
    %292 = vector.broadcast %cst_80 : f32 to vector<1x64xf32>
    %293 = arith.divf %291, %292 : vector<1x64xf32>
    %cst_81 = arith.constant 9.99999974E-6 : f32
    %294 = vector.broadcast %cst_81 : f32 to vector<1x64xf32>
    %295 = arith.addf %293, %294 : vector<1x64xf32>
    %296 = math.rsqrt %295 : vector<1x64xf32>
    %297 = arith.mulf %281, %296 : vector<1x64xf32>
    %298 = arith.mulf %286, %297 : vector<1x64xf32>
    %299 = arith.subf %282, %298 : vector<1x64xf32>
    %300 = vector.broadcast %297 : vector<1x64xf32> to vector<8x64xf32>
    %301 = arith.mulf %280, %300 : vector<8x64xf32>
    %302 = vector.broadcast %299 : vector<1x64xf32> to vector<8x64xf32>
    %303 = arith.addf %301, %302 : vector<8x64xf32>
    %cst_82 = arith.constant 0.000000e+00 : f32
    %304 = vector.broadcast %cst_82 : f32 to vector<8x64xf32>
    %305 = arith.maximumf %303, %304 : vector<8x64xf32>
    %306 = vector.extract_strided_slice %6 {offsets = [608, 0], sizes = [64, 64], strides = [1, 1]} : vector<672x64xf32> to vector<64x64xf32>
    %cst_83 = arith.constant dense<0.000000e+00> : vector<8x64xf32>
    %307 = tpu.matmul %305, %306, %cst_83 {dimension_numbers = #tpu.dot_dimension_numbers<[1], [0], [0], [1], [0, 0, 1, 1], [], []>} : vector<8x64xf32>, vector<64x64xf32>, vector<8x64xf32> -> vector<8x64xf32>
    %308 = vector.extract_strided_slice %307 {offsets = [0, 0], sizes = [8, 2], strides = [1, 1]} : vector<8x64xf32> to vector<8x2xf32>
    %309 = vector.extract_strided_slice %7 {offsets = [18, 0], sizes = [1, 2], strides = [1, 1]} : vector<24x256xf32> to vector<1x2xf32>
    %310 = vector.broadcast %309 : vector<1x2xf32> to vector<8x2xf32>
    %311 = arith.addf %308, %310 : vector<8x2xf32>
    %cst_84 = arith.constant dense<0xFF800000> : vector<8xf32>
    %312 = vector.multi_reduction <maximumf>, %311, %cst_84 [1] : vector<8x2xf32> to vector<8xf32>
    %313 = vector.shape_cast %312 : vector<8xf32> to vector<8x1xf32>
    %314 = vector.broadcast %313 : vector<8x1xf32> to vector<8x2xf32>
    %315 = arith.subf %311, %314 : vector<8x2xf32>
    %316 = math.exp %315 : vector<8x2xf32>
    %cst_85 = arith.constant dense<0.000000e+00> : vector<8xf32>
    %317 = vector.multi_reduction <add>, %316, %cst_85 [1] : vector<8x2xf32> to vector<8xf32>
    %318 = vector.shape_cast %317 : vector<8xf32> to vector<8x1xf32>
    %319 = math.log %318 : vector<8x1xf32>
    %320 = arith.addf %313, %319 : vector<8x1xf32>
    %321 = vector.broadcast %320 : vector<8x1xf32> to vector<8x2xf32>
    %322 = arith.subf %311, %321 : vector<8x2xf32>
    %323 = arith.mulf %5, %322 : vector<8x2xf32>
    %cst_86 = arith.constant dense<0.000000e+00> : vector<8xf32>
    %324 = vector.multi_reduction <add>, %323, %cst_86 [1] : vector<8x2xf32> to vector<8xf32>
    %325 = vector.shape_cast %324 : vector<8xf32> to vector<8x1xf32>
    %cst_87 = arith.constant 0.000000e+00 : f32
    %326 = vector.broadcast %cst_87 : f32 to vector<8x1xf32>
    %327 = arith.subf %326, %325 : vector<8x1xf32>
    %cst_88 = arith.constant dense<0.000000e+00> : vector<1xf32>
    %328 = vector.multi_reduction <add>, %327, %cst_88 [0] : vector<8x1xf32> to vector<1xf32>
    %329 = vector.shape_cast %328 : vector<1xf32> to vector<1x1xf32>
    %cst_89 = arith.constant 8.000000e+00 : f32
    %330 = vector.broadcast %cst_89 : f32 to vector<1x1xf32>
    %331 = arith.divf %329, %330 : vector<1x1xf32>
    %332 = vector.shape_cast %331 : vector<1x1xf32> to vector<1x1xf32>
    %333 = vector.broadcast %332 : vector<1x1xf32> to vector<8x1xf32>
    %cst_90 = arith.constant 0.000000e+00 : f32
    %334 = vector.broadcast %cst_90 : f32 to vector<8x125xf32>
    %335 = tpu.concatenate %311, %333, %334 in 1 : vector<8x2xf32>, vector<8x1xf32>, vector<8x125xf32> -> vector<8x128xf32>
    %c0_91 = arith.constant 0 : index
    %c0_92 = arith.constant 0 : index
    %336 = vector.load %arg8[%c0_91, %c0_92] : memref<8x128xf32, #tpu.memory_space<vmem>>, vector<8x128xf32>
    tpu.vector_store %arg8[%c0_91, %c0_92], %335 {strides = array<i32>} : memref<8x128xf32, #tpu.memory_space<vmem>>, vector<8x128xf32>,
    return
  }
}

</mosaic_0001>

<bundles_post_ra>
// kernel: tpu_custom_call.1
= control target key start
LH: loop header
LB: loop body
LE: loop exit
PB: predicated region body
PF: predicated region fallthrough
CT: control target
= control target key end

     0   :  { %s7045_s0 = inlined_call_operand.vmem [shape: f32[8,512], index: 0, kind: input, shape index: {}]   ;;  %s7046_s1 = inlined_call_operand.vmem [shape: f32[8,768], index: 1, kind: input, shape index: {}]   ;;  %s7047_s2 = inlined_call_operand.vmem [shape: f32[8,128], index: 2, kind: input, shape index: {}]   ;;  %s7048_s3 = inlined_call_operand.vmem [shape: bf16[512,192], index: 3, kind: input, shape index: {}]   ;;  %s7049_s4 = inlined_call_operand.vmem [shape: bf16[768,192], index: 4, kind: input, shape index: {}]   ;;  %s7050_s5 = inlined_call_operand.vmem [shape: f32[128,128], index: 5, kind: input, shape index: {}]   ;;  %s7051_s6 = inlined_call_operand.vmem [shape: f32[672,64], index: 6, kind: input, shape index: {}]   ;;  %s7052_s7 = inlined_call_operand.vmem [shape: f32[24,256], index: 7, kind: input, shape index: {}]   ;;  %s7053_s8 = inlined_call_operand.hbm [shape: f32[8,128], index: 8, kind: output, shape index: {}]  }
   0x1   :  { %v4504_v0 = vld [vmem:[%s7048_s3 + $0x4] ss:$8 sps:$4 sm:$0xff]   ;;  %v4508_v2 = vld [vmem:[%s7048_s3] ss:$8 sps:$4 sm:$0xff]   ;;  %v4510_v4 = vld [vmem:[%s7048_s3 + $0x14] ss:$8 sps:$4 sm:$0xff]  }
   0x2   :  { %v4506_v1 = vld [vmem:[%s7049_s4 + $0x4] ss:$8 sps:$4 sm:$0xff]   ;;  %525 = vmatprep.subr.bf16.mxu0 %v4504_v0  ;;  %v4509_v3 = vld [vmem:[%s7049_s4] ss:$8 sps:$4 sm:$0xff]   ;;  %v4512_v5 = vld [vmem:[%s7049_s4 + $0x14] ss:$8 sps:$4 sm:$0xff]  }
   0x3   :  { %1197 = vmatprep.subr.bf16.mxu1 %v4506_v1  ;;  %526 = vmatpush1.bf16.msra.mxu0 %v4508_v2  ;;  %v4514_v6 = vld [vmem:[%s7048_s3 + $0x10] ss:$8 sps:$4 sm:$0xff]   ;;  %v4516_v8 = vld [vmem:[%s7048_s3 + $0x24] ss:$8 sps:$4 sm:$0xff]   ;;  %v4520_v10 = vld [vmem:[%s7048_s3 + $0x20] ss:$8 sps:$4 sm:$0xff]  }
   0x4   :  { %1198 = vmatpush1.bf16.msra.mxu1 %v4509_v3  ;;  %527 = vmatprep.subr.bf16.mxu0 %v4510_v4  ;;  %v4515_v7 = vld [vmem:[%s7049_s4 + $0x10] ss:$8 sps:$4 sm:$0xff]   ;;  %v4518_v9 = vld [vmem:[%s7049_s4 + $0x24] ss:$8 sps:$4 sm:$0xff]   ;;  %v4521_v11 = vld [vmem:[%s7049_s4 + $0x20] ss:$8 sps:$4 sm:$0xff]  }
   0x5   :  { %1199 = vmatprep.subr.bf16.mxu1 %v4512_v5  ;;  %v4522_v12 = vld [vmem:[%s7048_s3 + $0x34] ss:$8 sps:$4 sm:$0xff]   ;;  %v4526_v14 = vld [vmem:[%s7048_s3 + $0x30] ss:$8 sps:$4 sm:$0xff]   ;;  %v4528_v16 = vld [vmem:[%s7048_s3 + $0x44] ss:$8 sps:$4 sm:$0xff]  }
   0x6   :  { %v4524_v13 = vld [vmem:[%s7049_s4 + $0x34] ss:$8 sps:$4 sm:$0xff]   ;;  %v4527_v15 = vld [vmem:[%s7049_s4 + $0x30] ss:$8 sps:$4 sm:$0xff]   ;;  %v4530_v17 = vld [vmem:[%s7049_s4 + $0x44] ss:$8 sps:$4 sm:$0xff]  }
   0x7   :  { %528 = vmatpush1.bf16.msra.mxu0 %v4514_v6  ;;  %v4532_v18 = vld [vmem:[%s7048_s3 + $0x40] ss:$8 sps:$4 sm:$0xff]   ;;  %v4534_v20 = vld [vmem:[%s7048_s3 + $0x54] ss:$8 sps:$4 sm:$0xff]   ;;  %v4538_v22 = vld [vmem:[%s7048_s3 + $0x50] ss:$8 sps:$4 sm:$0xff]  }
   0x8   :  { %1200 = vmatpush1.bf16.msra.mxu1 %v4515_v7  ;;  %529 = vmatprep.subr.bf16.mxu0 %v4516_v8  ;;  %v4533_v19 = vld [vmem:[%s7049_s4 + $0x40] ss:$8 sps:$4 sm:$0xff]   ;;  %v4536_v21 = vld [vmem:[%s7049_s4 + $0x54] ss:$8 sps:$4 sm:$0xff]   ;;  %v4539_v23 = vld [vmem:[%s7049_s4 + $0x50] ss:$8 sps:$4 sm:$0xff]  }
   0x9   :  { %1201 = vmatprep.subr.bf16.mxu1 %v4518_v9  ;;  %v4540_v24 = vld [vmem:[%s7048_s3 + $0x64] ss:$8 sps:$4 sm:$0xff]   ;;  %v4544_v26 = vld [vmem:[%s7048_s3 + $0x60] ss:$8 sps:$4 sm:$0xff]   ;;  %v4546_v28 = vld [vmem:[%s7048_s3 + $0x74] ss:$8 sps:$4 sm:$0xff]  }
   0xa   :  { %v4542_v25 = vld [vmem:[%s7049_s4 + $0x64] ss:$8 sps:$4 sm:$0xff]   ;;  %v4545_v27 = vld [vmem:[%s7049_s4 + $0x60] ss:$8 sps:$4 sm:$0xff]   ;;  %v4548_v29 = vld [vmem:[%s7049_s4 + $0x74] ss:$8 sps:$4 sm:$0xff]  }
   0xb   :  { %530 = vmatpush1.bf16.msra.mxu0 %v4520_v10  ;;  %v4550_v30 = vld [vmem:[%s7048_s3 + $0x70] ss:$8 sps:$4 sm:$0xff]   ;;  %v4552_v32 = vld [vmem:[%s7048_s3 + $0x84] ss:$8 sps:$4 sm:$0xff]   ;;  %v4556_v34 = vld [vmem:[%s7048_s3 + $0x80] ss:$8 sps:$4 sm:$0xff]  }
   0xc   :  { %1202 = vmatpush1.bf16.msra.mxu1 %v4521_v11  ;;  %531 = vmatprep.subr.bf16.mxu0 %v4522_v12  ;;  %v4551_v31 = vld [vmem:[%s7049_s4 + $0x70] ss:$8 sps:$4 sm:$0xff]   ;;  %v4554_v33 = vld [vmem:[%s7049_s4 + $0x84] ss:$8 sps:$4 sm:$0xff]   ;;  %v4557_v35 = vld [vmem:[%s7049_s4 + $0x80] ss:$8 sps:$4 sm:$0xff]  }
   0xd   :  { %1203 = vmatprep.subr.bf16.mxu1 %v4524_v13  ;;  %v4558_v36 = vld [vmem:[%s7048_s3 + $0x94] ss:$8 sps:$4 sm:$0xff]   ;;  %v4562_v38 = vld [vmem:[%s7048_s3 + $0x90] ss:$8 sps:$4 sm:$0xff]   ;;  %v4564_v40 = vld [vmem:[%s7048_s3 + $0xa4] ss:$8 sps:$4 sm:$0xff]  }
   0xe   :  { %v4560_v37 = vld [vmem:[%s7049_s4 + $0x94] ss:$8 sps:$4 sm:$0xff]   ;;  %v4563_v39 = vld [vmem:[%s7049_s4 + $0x90] ss:$8 sps:$4 sm:$0xff]   ;;  %v4566_v41 = vld [vmem:[%s7049_s4 + $0xa4] ss:$8 sps:$4 sm:$0xff]  }
   0xf   :  { %532 = vmatpush1.bf16.msra.mxu0 %v4526_v14  ;;  %v4568_v42 = vld [vmem:[%s7048_s3 + $0xa0] ss:$8 sps:$4 sm:$0xff]   ;;  %v4570_v44 = vld [vmem:[%s7048_s3 + $0xb4] ss:$8 sps:$4 sm:$0xff]   ;;  %v4574_v47 = vld [vmem:[%s7048_s3 + $0xb0] ss:$8 sps:$4 sm:$0xff]  }
  0x10   :  { %1204 = vmatpush1.bf16.msra.mxu1 %v4527_v15  ;;  %533 = vmatprep.subr.bf16.mxu0 %v4528_v16  ;;  %v4569_v43 = vld [vmem:[%s7049_s4 + $0xa0] ss:$8 sps:$4 sm:$0xff]   ;;  %v4572_v45 = vld [vmem:[%s7049_s4 + $0xb4] ss:$8 sps:$4 sm:$0xff]   ;;  %v4575_v49 = vld [vmem:[%s7049_s4 + $0xb0] ss:$8 sps:$4 sm:$0xff]  }
  0x11   :  { %1205 = vmatprep.subr.bf16.mxu1 %v4530_v17  ;;  %v31_v46 = vld [vmem:[%s7045_s0 + $0x8] sm:$0xff]  ;;  %v4582_v56 = vld [vmem:[%s7048_s3 + $0xd4] ss:$8 sps:$4 sm:$0xff]   ;;  %v4586_v58 = vld [vmem:[%s7048_s3 + $0xd0] ss:$8 sps:$4 sm:$0xff]  }
  0x12   :  { %v130_v48 = vpack.c.bf16 %v31_v46, %v31_v46  ;;  %v35_v50 = vld [vmem:[%s7046_s1 + $0x8] sm:$0xff]  ;;  %v4584_v57 = vld [vmem:[%s7049_s4 + $0xd4] ss:$8 sps:$4 sm:$0xff]   ;;  %v4587_v59 = vld [vmem:[%s7049_s4 + $0xd0] ss:$8 sps:$4 sm:$0xff]  }
  0x13   :  { %534 = vmatpush1.bf16.msra.mxu0 %v4532_v18  ;;  %v4576_v51 = vld [vmem:[%s7048_s3 + $0xc4] ss:$8 sps:$4 sm:$0xff]   ;;  %v608_v53 = vpack.c.bf16 %v35_v50, %v35_v50  ;;  %v4580_v54 = vld [vmem:[%s7048_s3 + $0xc0] ss:$8 sps:$4 sm:$0xff]   ;;  %v4594_v0 = vld [vmem:[%s7048_s3 + $0xf4] ss:$8 sps:$4 sm:$0xff]  }
  0x14   :  { %1206 = vmatpush1.bf16.msra.mxu1 %v4533_v19  ;;  %535 = vmatprep.subr.bf16.mxu0 %v4534_v20  ;;  %v4578_v52 = vld [vmem:[%s7049_s4 + $0xc4] ss:$8 sps:$4 sm:$0xff]   ;;  %v4581_v55 = vld [vmem:[%s7049_s4 + $0xc0] ss:$8 sps:$4 sm:$0xff]   ;;  %v4596_v1 = vld [vmem:[%s7049_s4 + $0xf4] ss:$8 sps:$4 sm:$0xff]  }
  0x15   :  { %1207 = vmatprep.subr.bf16.mxu1 %v4536_v21  ;;  %557 = vmatprep.mubr.bf16.mxu0 %v130_v48  ;;  %v4588_v60 = vld [vmem:[%s7048_s3 + $0xe4] ss:$8 sps:$4 sm:$0xff]   ;;  %v4592_v62 = vld [vmem:[%s7048_s3 + $0xe0] ss:$8 sps:$4 sm:$0xff]   ;;  %v4598_v2 = vld [vmem:[%s7048_s3 + $0xf0] ss:$8 sps:$4 sm:$0xff]  }
  0x16   :  { %1229 = vmatprep.mubr.bf16.mxu1 %v608_v53  ;;  %v4590_v61 = vld [vmem:[%s7049_s4 + $0xe4] ss:$8 sps:$4 sm:$0xff]   ;;  %v4593_v63 = vld [vmem:[%s7049_s4 + $0xe0] ss:$8 sps:$4 sm:$0xff]   ;;  %v4599_v3 = vld [vmem:[%s7049_s4 + $0xf0] ss:$8 sps:$4 sm:$0xff]  }
  0x17   :  { %536 = vmatpush1.bf16.msra.mxu0 %v4538_v22  ;;  %v4602_v4 = vld [vmem:[%s7048_s3 + $0x104] ss:$8 sps:$4 sm:$0xff]   ;;  %v4600_v8 = vld [vmem:[%s7048_s3 + $0x100] ss:$8 sps:$4 sm:$0xff]   ;;  %v4608_v12 = vld [vmem:[%s7048_s3 + $0x114] ss:$8 sps:$4 sm:$0xff]  }
  0x18   :  { %1208 = vmatpush1.bf16.msra.mxu1 %v4539_v23  ;;  %537 = vmatprep.subr.bf16.mxu0 %v4540_v24  ;;  %v30_v5 = vld [vmem:[%s7045_s0] sm:$0xff]  ;;  %v4611_v13 = vld [vmem:[%s7049_s4 + $0x114] ss:$8 sps:$4 sm:$0xff]   ;;  %v4606_v14 = vld [vmem:[%s7048_s3 + $0x110] ss:$8 sps:$4 sm:$0xff]  }
  0x19   :  { %1209 = vmatprep.subr.bf16.mxu1 %v4542_v25  ;;  %v34_v6 = vld [vmem:[%s7046_s1] sm:$0xff]  ;;  %v129_v10 = vpack.c.bf16 %v30_v5, %v30_v5  ;;  %v4609_v15 = vld [vmem:[%s7049_s4 + $0x110] ss:$8 sps:$4 sm:$0xff]   ;;  %v4620_v20 = vld [vmem:[%s7048_s3 + $0x134] ss:$8 sps:$4 sm:$0xff]  }
  0x1a   :  { %v4605_v7 = vld [vmem:[%s7049_s4 + $0x104] ss:$8 sps:$4 sm:$0xff]   ;;  %v4603_v9 = vld [vmem:[%s7049_s4 + $0x100] ss:$8 sps:$4 sm:$0xff]   ;;  %v607_v11 = vpack.c.bf16 %v34_v6, %v34_v6  ;;  %v4623_v21 = vld [vmem:[%s7049_s4 + $0x134] ss:$8 sps:$4 sm:$0xff]  }
  0x1b   :  { %538 = vmatpush1.bf16.msra.mxu0 %v4544_v26  ;;  %v4614_v16 = vld [vmem:[%s7048_s3 + $0x124] ss:$8 sps:$4 sm:$0xff]   ;;  %v4612_v18 = vld [vmem:[%s7048_s3 + $0x120] ss:$8 sps:$4 sm:$0xff]   ;;  %v4618_v22 = vld [vmem:[%s7048_s3 + $0x130] ss:$8 sps:$4 sm:$0xff]  }
  0x1c   :  { %1210 = vmatpush1.bf16.msra.mxu1 %v4545_v27  ;;  %539 = vmatprep.subr.bf16.mxu0 %v4546_v28  ;;  %v4617_v17 = vld [vmem:[%s7049_s4 + $0x124] ss:$8 sps:$4 sm:$0xff]   ;;  %v4615_v19 = vld [vmem:[%s7049_s4 + $0x120] ss:$8 sps:$4 sm:$0xff]   ;;  %v4621_v23 = vld [vmem:[%s7049_s4 + $0x130] ss:$8 sps:$4 sm:$0xff]  }
  0x1d   :  { %1211 = vmatprep.subr.bf16.mxu1 %v4548_v29  ;;  %v4626_v24 = vld [vmem:[%s7048_s3 + $0x144] ss:$8 sps:$4 sm:$0xff]   ;;  %v4624_v26 = vld [vmem:[%s7048_s3 + $0x140] ss:$8 sps:$4 sm:$0xff]   ;;  %v4632_v28 = vld [vmem:[%s7048_s3 + $0x154] ss:$8 sps:$4 sm:$0xff]  }
  0x1e   :  { %v4629_v25 = vld [vmem:[%s7049_s4 + $0x144] ss:$8 sps:$4 sm:$0xff]   ;;  %v4627_v27 = vld [vmem:[%s7049_s4 + $0x140] ss:$8 sps:$4 sm:$0xff]   ;;  %v4635_v29 = vld [vmem:[%s7049_s4 + $0x154] ss:$8 sps:$4 sm:$0xff]  }
  0x1f   :  { %540 = vmatpush1.bf16.msra.mxu0 %v4550_v30  ;;  %v4630_v30 = vld [vmem:[%s7048_s3 + $0x150] ss:$8 sps:$4 sm:$0xff]   ;;  %v4648_v46 = vld [vmem:[%s7048_s3 + $0x180] ss:$8 sps:$4 sm:$0xff]   ;;  %v4656_v48 = vld [vmem:[%s7048_s3 + $0x194] ss:$8 sps:$4 sm:$0xff]  }
  0x20   :  { %1212 = vmatpush1.bf16.msra.mxu1 %v4551_v31  ;;  %541 = vmatprep.subr.bf16.mxu0 %v4552_v32  ;;  %v4633_v31 = vld [vmem:[%s7049_s4 + $0x150] ss:$8 sps:$4 sm:$0xff]   ;;  %v4638_v32 = vld [vmem:[%s7048_s3 + $0x164] ss:$8 sps:$4 sm:$0xff]  }
  0x21   :  { %1213 = vmatprep.subr.bf16.mxu1 %v4554_v33  ;;  %v4641_v33 = vld [vmem:[%s7049_s4 + $0x164] ss:$8 sps:$4 sm:$0xff]   ;;  %v4654_v50 = vld [vmem:[%s7048_s3 + $0x190] ss:$8 sps:$4 sm:$0xff]  }
  0x22   :  { %v4665_v53 = vld [vmem:[%s7049_s4 + $0x1a4] ss:$8 sps:$4 sm:$0xff]  }
  0x23   :  { %542 = vmatpush1.bf16.msra.mxu0 %v4556_v34  ;;  %v33_v34 = vld [vmem:[%s7045_s0 + $0x18] sm:$0xff] }
  0x24   :  { %1214 = vmatpush1.bf16.msra.mxu1 %v4557_v35  ;;  %543 = vmatprep.subr.bf16.mxu0 %v4558_v36  ;;  %v4636_v35 = vld [vmem:[%s7048_s3 + $0x160] ss:$8 sps:$4 sm:$0xff]   ;;  %v132_v36 = vpack.c.bf16 %v33_v34, %v33_v34 }
  0x25   :  { %1215 = vmatprep.subr.bf16.mxu1 %v4560_v37  ;;  %v37_v37 = vld [vmem:[%s7046_s1 + $0x18] sm:$0xff] }
  0x27   :  { %544 = vmatpush1.bf16.msra.mxu0 %v4562_v38  ;;  %v4639_v38 = vld [vmem:[%s7049_s4 + $0x160] ss:$8 sps:$4 sm:$0xff]  }
  0x28   :  { %1216 = vmatpush1.bf16.msra.mxu1 %v4563_v39  ;;  %545 = vmatprep.subr.bf16.mxu0 %v4564_v40  ;;  %v4644_v39 = vld [vmem:[%s7048_s3 + $0x174] ss:$8 sps:$4 sm:$0xff]   ;;  %v610_v40 = vpack.c.bf16 %v37_v37, %v37_v37 }
  0x29   :  { %1217 = vmatprep.subr.bf16.mxu1 %v4566_v41  ;;  %v4647_v41 = vld [vmem:[%s7049_s4 + $0x174] ss:$8 sps:$4 sm:$0xff]  }
  0x2b   :  { %546 = vmatpush1.bf16.msra.mxu0 %v4568_v42  ;;  %v4642_v42 = vld [vmem:[%s7048_s3 + $0x170] ss:$8 sps:$4 sm:$0xff]  }
  0x2c   :  { %1218 = vmatpush1.bf16.msra.mxu1 %v4569_v43  ;;  %547 = vmatprep.subr.bf16.mxu0 %v4570_v44  ;;  %v4645_v43 = vld [vmem:[%s7049_s4 + $0x170] ss:$8 sps:$4 sm:$0xff]   ;;  %v4650_v44 = vld [vmem:[%s7048_s3 + $0x184] ss:$8 sps:$4 sm:$0xff]  }
  0x2d   :  { %1219 = vmatprep.subr.bf16.mxu1 %v4572_v45  ;;  %v4653_v45 = vld [vmem:[%s7049_s4 + $0x184] ss:$8 sps:$4 sm:$0xff]  }
  0x2f   :  { %548 = vmatpush1.bf16.msra.mxu0 %v4574_v47  ;;  %v4651_v47 = vld [vmem:[%s7049_s4 + $0x180] ss:$8 sps:$4 sm:$0xff]  }
  0x30   :  { %1220 = vmatpush1.bf16.msra.mxu1 %v4575_v49  ;;  %549 = vmatprep.subr.bf16.mxu0 %v4576_v51  ;;  %v4659_v49 = vld [vmem:[%s7049_s4 + $0x194] ss:$8 sps:$4 sm:$0xff]   ;;  %v4657_v51 = vld [vmem:[%s7049_s4 + $0x190] ss:$8 sps:$4 sm:$0xff]  }
  0x31   :  { %1221 = vmatprep.subr.bf16.mxu1 %v4578_v52  ;;  %v4662_v52 = vld [vmem:[%s7048_s3 + $0x1a4] ss:$8 sps:$4 sm:$0xff]  }
  0x33   :  { %550 = vmatpush1.bf16.msra.mxu0 %v4580_v54  ;;  %v4660_v54 = vld [vmem:[%s7048_s3 + $0x1a0] ss:$8 sps:$4 sm:$0xff]  }
  0x34   :  { %1222 = vmatpush1.bf16.msra.mxu1 %v4581_v55  ;;  %551 = vmatprep.subr.bf16.mxu0 %v4582_v56  ;;  %v4663_v55 = vld [vmem:[%s7049_s4 + $0x1a0] ss:$8 sps:$4 sm:$0xff]   ;;  %v4668_v56 = vld [vmem:[%s7048_s3 + $0x1b4] ss:$8 sps:$4 sm:$0xff]  }
  0x35   :  { %1223 = vmatprep.subr.bf16.mxu1 %v4584_v57  ;;  %v4671_v57 = vld [vmem:[%s7049_s4 + $0x1b4] ss:$8 sps:$4 sm:$0xff]  }
  0x37   :  { %552 = vmatpush1.bf16.msra.mxu0 %v4586_v58  ;;  %v4666_v58 = vld [vmem:[%s7048_s3 + $0x1b0] ss:$8 sps:$4 sm:$0xff]  }
  0x38   :  { %1224 = vmatpush1.bf16.msra.mxu1 %v4587_v59  ;;  %553 = vmatprep.subr.bf16.mxu0 %v4588_v60  ;;  %v4669_v59 = vld [vmem:[%s7049_s4 + $0x1b0] ss:$8 sps:$4 sm:$0xff]   ;;  %v4674_v60 = vld [vmem:[%s7048_s3 + $0x1c4] ss:$8 sps:$4 sm:$0xff]  }
  0x39   :  { %1225 = vmatprep.subr.bf16.mxu1 %v4590_v61  ;;  %v4677_v61 = vld [vmem:[%s7049_s4 + $0x1c4] ss:$8 sps:$4 sm:$0xff]  }
  0x3b   :  { %554 = vmatpush1.bf16.msra.mxu0 %v4592_v62 }
  0x3c   :  { %1226 = vmatpush1.bf16.msra.mxu1 %v4593_v63  ;;  %555 = vmatprep.subr.bf16.mxu0 %v4594_v0 }
  0x3d   :  { %1227 = vmatprep.subr.bf16.mxu1 %v4596_v1 }
  0x3f   :  { %556 = vmatpush1.bf16.msra.mxu0 %v4598_v2 }
  0x40   :  { %1228 = vmatpush1.bf16.msra.mxu1 %v4599_v3  ;;  %566 = vmatprep.subr.bf16.mxu0 %v4602_v4 }
  0x41   :  { %1238 = vmatprep.subr.bf16.mxu1 %v4605_v7 }
  0x42   :  { %558 = vmatmul.mubr.bf16.vlgmr.msra.gmra.mrb[0].mxu0 %v129_v10 }
  0x43   :  { %1230 = vmatmul.mubr.bf16.vlgmr.msra.gmra.mrb[0].mxu1 %v607_v11  ;;  %567 = vmatpush1.bf16.msra.mxu0 %v4600_v8 }
  0x44   :  { %1239 = vmatpush1.bf16.msra.mxu1 %v4603_v9  ;;  %568 = vmatprep.subr.bf16.mxu0 %v4608_v12 }
  0x45   :  { %1240 = vmatprep.subr.bf16.mxu1 %v4611_v13  ;;  %598 = vmatprep.mubr.bf16.mxu0 %v132_v36 }
  0x46   :  { %1270 = vmatprep.mubr.bf16.mxu1 %v610_v40 }
  0x47   :  { %569 = vmatpush1.bf16.msra.mxu0 %v4606_v14 }
  0x48   :  { %1241 = vmatpush1.bf16.msra.mxu1 %v4609_v15  ;;  %570 = vmatprep.subr.bf16.mxu0 %v4614_v16 }
  0x49   :  { %1242 = vmatprep.subr.bf16.mxu1 %v4617_v17 }
  0x4b   :  { %571 = vmatpush1.bf16.msra.mxu0 %v4612_v18 }
  0x4c   :  { %1243 = vmatpush1.bf16.msra.mxu1 %v4615_v19  ;;  %572 = vmatprep.subr.bf16.mxu0 %v4620_v20 }
  0x4d   :  { %1244 = vmatprep.subr.bf16.mxu1 %v4623_v21 }
  0x4f   :  { %573 = vmatpush1.bf16.msra.mxu0 %v4618_v22 }
  0x50   :  { %1245 = vmatpush1.bf16.msra.mxu1 %v4621_v23  ;;  %574 = vmatprep.subr.bf16.mxu0 %v4626_v24 }
  0x51   :  { %1246 = vmatprep.subr.bf16.mxu1 %v4629_v25 }
  0x53   :  { %575 = vmatpush1.bf16.msra.mxu0 %v4624_v26 }
  0x54   :  { %1247 = vmatpush1.bf16.msra.mxu1 %v4627_v27  ;;  %576 = vmatprep.subr.bf16.mxu0 %v4632_v28 }
  0x55   :  { %1248 = vmatprep.subr.bf16.mxu1 %v4635_v29 }
  0x57   :  { %577 = vmatpush1.bf16.msra.mxu0 %v4630_v30 }
  0x58   :  { %1249 = vmatpush1.bf16.msra.mxu1 %v4633_v31  ;;  %578 = vmatprep.subr.bf16.mxu0 %v4638_v32 }
  0x59   :  { %1250 = vmatprep.subr.bf16.mxu1 %v4641_v33 }
  0x5b   :  { %579 = vmatpush1.bf16.msra.mxu0 %v4636_v35 }
  0x5c   :  { %1251 = vmatpush1.bf16.msra.mxu1 %v4639_v38  ;;  %580 = vmatprep.subr.bf16.mxu0 %v4644_v39 }
  0x5d   :  { %1252 = vmatprep.subr.bf16.mxu1 %v4647_v41 }
  0x5f   :  { %581 = vmatpush1.bf16.msra.mxu0 %v4642_v42 }
  0x60   :  { %1253 = vmatpush1.bf16.msra.mxu1 %v4645_v43  ;;  %582 = vmatprep.subr.bf16.mxu0 %v4650_v44 }
  0x61   :  { %1254 = vmatprep.subr.bf16.mxu1 %v4653_v45 }
  0x63   :  { %583 = vmatpush1.bf16.msra.mxu0 %v4648_v46 }
  0x64   :  { %1255 = vmatpush1.bf16.msra.mxu1 %v4651_v47  ;;  %584 = vmatprep.subr.bf16.mxu0 %v4656_v48 }
  0x65   :  { %1256 = vmatprep.subr.bf16.mxu1 %v4659_v49 }
  0x67   :  { %585 = vmatpush1.bf16.msra.mxu0 %v4654_v50 }
  0x68   :  { %1257 = vmatpush1.bf16.msra.mxu1 %v4657_v51  ;;  %586 = vmatprep.subr.bf16.mxu0 %v4662_v52 }
  0x69   :  { %1258 = vmatprep.subr.bf16.mxu1 %v4665_v53 }
  0x6b   :  { %587 = vmatpush1.bf16.msra.mxu0 %v4660_v54 }
  0x6c   :  { %1259 = vmatpush1.bf16.msra.mxu1 %v4663_v55  ;;  %588 = vmatprep.subr.bf16.mxu0 %v4668_v56 }
  0x6d   :  { %1260 = vmatprep.subr.bf16.mxu1 %v4671_v57 }
  0x6e   :  { %13 = vsyncpa [#allocation3], 0  ;;  %v4672_v62 = vld [vmem:[%s7048_s3 + $0x1c0] ss:$8 sps:$4 sm:$0xff]   ;;  %v4680_v0 = vld [vmem:[%s7048_s3 + $0x1d4] ss:$8 sps:$4 sm:$0xff]   ;;  %v7054_v52 = vlaneseq }
  0x6f   :  { %589 = vmatpush1.bf16.msra.mxu0 %v4666_v58  ;;  %v4675_v63 = vld [vmem:[%s7049_s4 + $0x1c0] ss:$8 sps:$4 sm:$0xff]   ;;  %v4683_v1 = vld [vmem:[%s7049_s4 + $0x1d4] ss:$8 sps:$4 sm:$0xff]   ;;  %v4678_v2 = vld [vmem:[%s7048_s3 + $0x1d0] ss:$8 sps:$4 sm:$0xff]  }
  0x70   :  { %1261 = vmatpush1.bf16.msra.mxu1 %v4669_v59  ;;  %590 = vmatprep.subr.bf16.mxu0 %v4674_v60  ;;  %v4681_v3 = vld [vmem:[%s7049_s4 + $0x1d0] ss:$8 sps:$4 sm:$0xff]   ;;  %v4686_v4 = vld [vmem:[%s7048_s3 + $0x1e4] ss:$8 sps:$4 sm:$0xff]   ;;  %v4684_v6 = vld [vmem:[%s7048_s3 + $0x1e0] ss:$8 sps:$4 sm:$0xff]  }
  0x71   :  { %1262 = vmatprep.subr.bf16.mxu1 %v4677_v61  ;;  %v4689_v5 = vld [vmem:[%s7049_s4 + $0x1e4] ss:$8 sps:$4 sm:$0xff]   ;;  %v4687_v7 = vld [vmem:[%s7049_s4 + $0x1e0] ss:$8 sps:$4 sm:$0xff]   ;;  %v4692_v8 = vld [vmem:[%s7048_s3 + $0x1f4] ss:$8 sps:$4 sm:$0xff]  }
  0x72   :  { %v4695_v9 = vld [vmem:[%s7049_s4 + $0x1f4] ss:$8 sps:$4 sm:$0xff]   ;;  %v4690_v10 = vld [vmem:[%s7048_s3 + $0x1f0] ss:$8 sps:$4 sm:$0xff]   ;;  %v4698_v14 = vld [vmem:[%s7049_s4 + $0x204] ss:$8 sps:$4 sm:$0xff]  }
  0x73   :  { %591 = vmatpush1.bf16.msra.mxu0 %v4672_v62  ;;  %v4693_v11 = vld [vmem:[%s7049_s4 + $0x1f0] ss:$8 sps:$4 sm:$0xff]   ;;  %v39_v15 = vld [vmem:[%s7046_s1 + $0x28] sm:$0xff]  ;;  %v4701_v20 = vld [vmem:[%s7049_s4 + $0x214] ss:$8 sps:$4 sm:$0xff]   ;;  %v5627_v53 = vshrl.u32 %v7054_v52, 7 }
  0x74   :  { %1263 = vmatpush1.bf16.msra.mxu1 %v4675_v63  ;;  %592 = vmatprep.subr.bf16.mxu0 %v4680_v0  ;;  %v32_v12 = vld [vmem:[%s7045_s0 + $0x10] sm:$0xff]  ;;  %v4696_v18 = vld [vmem:[%s7049_s4 + $0x200] ss:$8 sps:$4 sm:$0xff]   ;;  %v612_v19 = vpack.c.bf16 %v39_v15, %v39_v15  ;;  %v4704_v22 = vld [vmem:[%s7049_s4 + $0x224] ss:$8 sps:$4 sm:$0xff]   ;;  %vm5060_vm0 = vmmov 0  }
  0x75   :  { %1264 = vmatprep.subr.bf16.mxu1 %v4683_v1  ;;  %v36_v13 = vld [vmem:[%s7046_s1 + $0x10] sm:$0xff]  ;;  %v131_v16 = vpack.c.bf16 %v32_v12, %v32_v12  ;;  %v4702_v23 = vld [vmem:[%s7049_s4 + $0x220] ss:$8 sps:$4 sm:$0xff]   ;;  %v4710_v26 = vld [vmem:[%s7049_s4 + $0x244] ss:$8 sps:$4 sm:$0xff]   ;;  %7073 = vst [vmem:[#allocation5_spill] sm:$0xff] %v5627_v53 }
  0x76   :  { %v609_v17 = vpack.c.bf16 %v36_v13, %v36_v13  ;;  %v4699_v21 = vld [vmem:[%s7049_s4 + $0x210] ss:$8 sps:$4 sm:$0xff]   ;;  %v4707_v24 = vld [vmem:[%s7049_s4 + $0x234] ss:$8 sps:$4 sm:$0xff]   ;;  %v4708_v27 = vld [vmem:[%s7049_s4 + $0x240] ss:$8 sps:$4 sm:$0xff]  }
  0x77   :  { %593 = vmatpush1.bf16.msra.mxu0 %v4678_v2  ;;  %v4705_v25 = vld [vmem:[%s7049_s4 + $0x230] ss:$8 sps:$4 sm:$0xff]   ;;  %v4713_v28 = vld [vmem:[%s7049_s4 + $0x254] ss:$8 sps:$4 sm:$0xff]   ;;  %v4716_v30 = vld [vmem:[%s7049_s4 + $0x264] ss:$8 sps:$4 sm:$0xff]  }
  0x78   :  { %1265 = vmatpush1.bf16.msra.mxu1 %v4681_v3  ;;  %594 = vmatprep.subr.bf16.mxu0 %v4686_v4  ;;  %v4711_v29 = vld [vmem:[%s7049_s4 + $0x250] ss:$8 sps:$4 sm:$0xff]   ;;  %v4714_v31 = vld [vmem:[%s7049_s4 + $0x260] ss:$8 sps:$4 sm:$0xff]   ;;  %v4719_v32 = vld [vmem:[%s7049_s4 + $0x274] ss:$8 sps:$4 sm:$0xff]  }
  0x79   :  { %1266 = vmatprep.subr.bf16.mxu1 %v4689_v5  ;;  %v4717_v33 = vld [vmem:[%s7049_s4 + $0x270] ss:$8 sps:$4 sm:$0xff]   ;;  %v4722_v34 = vld [vmem:[%s7049_s4 + $0x284] ss:$8 sps:$4 sm:$0xff]   ;;  %v4720_v35 = vld [vmem:[%s7049_s4 + $0x280] ss:$8 sps:$4 sm:$0xff]  }
  0x7a   :  { %v4725_v36 = vld [vmem:[%s7049_s4 + $0x294] ss:$8 sps:$4 sm:$0xff]   ;;  %v4723_v37 = vld [vmem:[%s7049_s4 + $0x290] ss:$8 sps:$4 sm:$0xff]   ;;  %v4728_v38 = vld [vmem:[%s7049_s4 + $0x2a4] ss:$8 sps:$4 sm:$0xff]  }
  0x7b   :  { %595 = vmatpush1.bf16.msra.mxu0 %v4684_v6  ;;  %v4726_v39 = vld [vmem:[%s7049_s4 + $0x2a0] ss:$8 sps:$4 sm:$0xff]   ;;  %v4731_v40 = vld [vmem:[%s7049_s4 + $0x2b4] ss:$8 sps:$4 sm:$0xff]   ;;  %v4729_v41 = vld [vmem:[%s7049_s4 + $0x2b0] ss:$8 sps:$4 sm:$0xff]  }
  0x7c   :  { %1267 = vmatpush1.bf16.msra.mxu1 %v4687_v7  ;;  %596 = vmatprep.subr.bf16.mxu0 %v4692_v8  ;;  %v4734_v42 = vld [vmem:[%s7049_s4 + $0x2c4] ss:$8 sps:$4 sm:$0xff]   ;;  %v4732_v43 = vld [vmem:[%s7049_s4 + $0x2c0] ss:$8 sps:$4 sm:$0xff]   ;;  %v4737_v44 = vld [vmem:[%s7049_s4 + $0x2d4] ss:$8 sps:$4 sm:$0xff]  }
  0x7d   :  { %1268 = vmatprep.subr.bf16.mxu1 %v4695_v9  ;;  %v4735_v45 = vld [vmem:[%s7049_s4 + $0x2d0] ss:$8 sps:$4 sm:$0xff]   ;;  %v4740_v46 = vld [vmem:[%s7049_s4 + $0x2e4] ss:$8 sps:$4 sm:$0xff]   ;;  %v4738_v47 = vld [vmem:[%s7049_s4 + $0x2e0] ss:$8 sps:$4 sm:$0xff]  }
  0x7e   :  { %v4743_v48 = vld [vmem:[%s7049_s4 + $0x2f4] ss:$8 sps:$4 sm:$0xff]   ;;  %v4741_v49 = vld [vmem:[%s7049_s4 + $0x2f0] ss:$8 sps:$4 sm:$0xff]   ;;  %v38_v50 = vld [vmem:[%s7046_s1 + $0x20] sm:$0xff]  ;;  %v5630_v54 = vsub.s32 0, %v5627_v53 }
  0x7f   :  { %597 = vmatpush1.bf16.msra.mxu0 %v4690_v10  ;;  %v611_v51 = vpack.c.bf16 %v38_v50, %v38_v50  ;;  %v5635_v55 = vld [vmem:[%s7052_s7 + $0x8] sm:$0xff]  ;;  %v5642_v58 = vsub.s32 1, %v5627_v53  ;;  %v5655_v1 = vsub.s32 3, %v5627_v53  ;;  %v5666_v3 = vsub.s32 2, %v5627_v53  ;;  %v1326_v8 = vld [vmem:[%s7050_s5] sm:$0xff]  ;;  %v1329_v12 = vld [vmem:[%s7050_s5 + $0x18] sm:$0xff] }
  0x80   :  { %1269 = vmatpush1.bf16.msra.mxu1 %v4693_v11  ;;  %v204_v56 = vrot.slane %v5635_v55, %v5630_v54  ;;  %v5675_v5 = vsub.s32 4, %v5627_v53  ;;  %v7057_v7 = vmov 0.0|0.0   ;;  %v1327_v9 = vld [vmem:[%s7050_s5 + $0x8] sm:$0xff]  ;;  %v1328_v11 = vld [vmem:[%s7050_s5 + $0x10] sm:$0xff]  ;;  %vm1324_vm1 = vcmask 523264   ;;  %s5064_s19 = smov 4  }
  0x81   :  { %1279 = vmatprep.subr.bf16.mxu1 %v4698_v14  ;;  %7074 = vst [vmem:[#allocation6_spill] sm:$0xff] %v5642_v58  ;;  %7075 = vst [vmem:[#allocation7_spill] sm:$0xff] %v5655_v1  ;;  %4342 = vmatprep.subr.bf16.mxu0 %v7057_v7  ;;  %v4343_v10 = vpack.c.bf16 %v1327_v9, %v1326_v8  ;;  %v4346_v13 = vpack.c.bf16 %v1329_v12, %v1328_v11  ;;  %v1330_v14 = vld [vmem:[%s7050_s5 + $0x20] sm:$0xff]  ;;  %v1331_v15 = vld [vmem:[%s7050_s5 + $0x28] sm:$0xff]  ;;  %s5065_s20 = smov 126   ;;  %s5066_s25 = smov 2  }
  0x82   :  { %599 = vmatmul.mubr.bf16.vlgmr.msra.gmra.mrb[0].mxu0 %v131_v16  ;;  %7076 = vst [vmem:[#allocation8_spill] sm:$0xff] %v5666_v3  ;;  %7077 = vst [vmem:[#allocation9_spill] sm:$0xff] %v5675_v5  ;;  %v4349_v16 = vpack.c.bf16 %v1331_v15, %v1330_v14  ;;  %vm3105_vm3 = vcmask 130112   ;;  %vm3112_vm4 = vcmask 195712   ;;  %vm3119_vm5 = vcmask 261312   ;;  %s5067_s26 = smov 122  }
  0x83   :  { %1271 = vmatmul.mubr.bf16.vlgmr.msra.gmra.mrb[0].mxu1 %v609_v17  ;;  %4344 = vmatpush3.bf16.msra.mxu0 %v4343_v10  ;;  %v1332_v17 = vld [vmem:[%s7050_s5 + $0x30] sm:$0xff]  ;;  %vm3126_vm6 = vcmask 326912   ;;  %vm3133_vm7 = vcmask 392512   ;;  %vm3140_vm8 = vcmask 458112   ;;  %vm3147_vm9 = vcmask 523712   ;;  %s5068_s27 = smov 124  }
  0x84   :  { %1280 = vmatpush1.bf16.msra.mxu1 %v4696_v18  ;;  %1311 = vmatprep.mubr.bf16.mxu1 %v612_v19  ;;  %v1333_v18 = vld [vmem:[%s7050_s5 + $0x38] sm:$0xff]  ;;  %vm3422_vm10 = vcmask 1041409   ;;  %vm3424_vm11 = vcmask 1042434   ;;  %vm3426_vm12 = vcmask 1043459   ;;  %vm3428_vm13 = vcmask 1044484   ;;  %s5069_s9 = smov 32  }
  0x85   :  { %1281 = vmatprep.subr.bf16.mxu1 %v4701_v20  ;;  %4345 = vmatprep.subr.bf16.mxu0 %v7057_v7  ;;  %v4352_v19 = vpack.c.bf16 %v1333_v18, %v1332_v17  ;;  %v1334_v20 = vld [vmem:[%s7050_s5 + $0x40] sm:$0xff]  ;;  %vm3430_vm14 = vcmask 1045509   ;;  %vm3432_vm15 = vcmask 1046534  }
  0x87   :  { %4347 = vmatpush3.bf16.msra.mxu0 %v4346_v13 }
  0x88   :  { %1282 = vmatpush1.bf16.msra.mxu1 %v4699_v21  ;;  %4348 = vmatprep.subr.bf16.mxu0 %v7057_v7  ;;  %v1335_v21 = vld [vmem:[%s7050_s5 + $0x48] sm:$0xff] }
  0x89   :  { %1283 = vmatprep.subr.bf16.mxu1 %v4704_v22  ;;  %v4355_v22 = vpack.c.bf16 %v1335_v21, %v1334_v20 }
  0x8b   :  { %4350 = vmatpush3.bf16.msra.mxu0 %v4349_v16 }
  0x8c   :  { %1284 = vmatpush1.bf16.msra.mxu1 %v4702_v23  ;;  %4351 = vmatprep.subr.bf16.mxu0 %v7057_v7  ;;  %v1336_v23 = vld [vmem:[%s7050_s5 + $0x50] sm:$0xff] }
  0x8d   :  { %1285 = vmatprep.subr.bf16.mxu1 %v4707_v24  ;;  %v1337_v24 = vld [vmem:[%s7050_s5 + $0x58] sm:$0xff] }
  0x8f   :  { %4353 = vmatpush3.bf16.msra.mxu0 %v4352_v19 }
  0x90   :  { %1286 = vmatpush1.bf16.msra.mxu1 %v4705_v25  ;;  %4354 = vmatprep.subr.bf16.mxu0 %v7057_v7  ;;  %v4358_v25 = vpack.c.bf16 %v1337_v24, %v1336_v23 }
  0x91   :  { %1287 = vmatprep.subr.bf16.mxu1 %v4710_v26  ;;  %v1338_v26 = vld [vmem:[%s7050_s5 + $0x60] sm:$0xff] }
  0x93   :  { %4356 = vmatpush3.bf16.msra.mxu0 %v4355_v22 }
  0x94   :  { %1288 = vmatpush1.bf16.msra.mxu1 %v4708_v27  ;;  %4357 = vmatprep.subr.bf16.mxu0 %v7057_v7  ;;  %v1339_v27 = vld [vmem:[%s7050_s5 + $0x68] sm:$0xff] }
  0x95   :  { %1289 = vmatprep.subr.bf16.mxu1 %v4713_v28  ;;  %v4361_v28 = vpack.c.bf16 %v1339_v27, %v1338_v26 }
  0x97   :  { %4359 = vmatpush3.bf16.msra.mxu0 %v4358_v25 }
  0x98   :  { %1290 = vmatpush1.bf16.msra.mxu1 %v4711_v29  ;;  %4360 = vmatprep.subr.bf16.mxu0 %v7057_v7  ;;  %v1340_v29 = vld [vmem:[%s7050_s5 + $0x70] sm:$0xff] }
  0x99   :  { %1291 = vmatprep.subr.bf16.mxu1 %v4716_v30  ;;  %v1341_v30 = vld [vmem:[%s7050_s5 + $0x78] sm:$0xff]  ;;  %s5062_s5 = smov 64  }
  0x9b   :  { %4362 = vmatpush3.bf16.msra.mxu0 %v4361_v28 }
  0x9c   :  { %1292 = vmatpush1.bf16.msra.mxu1 %v4714_v31  ;;  %4363 = vmatprep.subr.bf16.mxu0 %v7057_v7  ;;  %v4364_v31 = vpack.c.bf16 %v1341_v30, %v1340_v29  ;;  %v41_v30 = vld [vmem:[%s7051_s6] sm:$0xff] }
  0x9d   :  { %1293 = vmatprep.subr.bf16.mxu1 %v4719_v32  ;;  %v7055_v32 = vmov 0.0  }
  0x9e   :  { %4220 = vmatprep.mubr.msk.f32.mxu0 %vm5060_vm0, %v7055_v32 }
  0x9f   :  { %4365 = vmatpush3.bf16.msra.mxu0 %v4364_v31  ;;  %v42_v31 = vld [vmem:[%s7051_s6 + $0x8] sm:$0xff] }
  0xa0   :  { %1294 = vmatpush1.bf16.msra.mxu1 %v4717_v33  ;;  %4366 = vmatprep.subr.bf16.mxu0 %v7057_v7  ;;  %v716_v33 = vrot.slane %v5635_v55, %v5642_v58 }
  0xa1   :  { %1295 = vmatprep.subr.bf16.mxu1 %v4722_v34 }
  0xa4   :  { %1296 = vmatpush1.bf16.msra.mxu1 %v4720_v35  ;;  %v5764_v35 = vsub.s32 5, %v5627_v53 }
  0xa5   :  { %1297 = vmatprep.subr.bf16.mxu1 %v4725_v36 }
  0xa6   :  { %7078 = vst [vmem:[#allocation10_spill] sm:$0xff] %v5764_v35 }
  0xa8   :  { %1298 = vmatpush1.bf16.msra.mxu1 %v4723_v37 }
  0xa9   :  { %1299 = vmatprep.subr.bf16.mxu1 %v4728_v38 }
  0xac   :  { %1300 = vmatpush1.bf16.msra.mxu1 %v4726_v39 }
  0xad   :  { %1301 = vmatprep.subr.bf16.mxu1 %v4731_v40 }
  0xb0   :  { %1302 = vmatpush1.bf16.msra.mxu1 %v4729_v41  ;;  %v5777_v41 = vsub.s32 6, %v5627_v53 }
  0xb1   :  { %1303 = vmatprep.subr.bf16.mxu1 %v4734_v42 }
  0xb2   :  { %7079 = vst [vmem:[#allocation11_spill] sm:$0xff] %v5777_v41 }
  0xb4   :  { %1304 = vmatpush1.bf16.msra.mxu1 %v4732_v43  ;;  %v5789_v43 = vsub.s32 7, %v5627_v53 }
  0xb5   :  { %1305 = vmatprep.subr.bf16.mxu1 %v4737_v44 }
  0xb6   :  { %7080 = vst [vmem:[#allocation12_spill] sm:$0xff] %v5789_v43 }
  0xb8   :  { %1306 = vmatpush1.bf16.msra.mxu1 %v4735_v45 }
  0xb9   :  { %1307 = vmatprep.subr.bf16.mxu1 %v4740_v46 }
  0xbc   :  { %1308 = vmatpush1.bf16.msra.mxu1 %v4738_v47 }
  0xbd   :  { %1309 = vmatprep.subr.bf16.mxu1 %v4743_v48 }
  0xc0   :  { %1310 = vmatpush1.bf16.msra.mxu1 %v4741_v49 }
  0xc1   :  { %4422 = vmatprep.subr.bf16.mxu1 %v7057_v7 }
  0xc3   :  { %1312 = vmatmul.mubr.bf16.vlgmr.msra.gmra.mrb[0].mxu1 %v611_v51 }
  0xc4   :  { %4274 = vmatprep.mubr.msk.f32.mxu1 %vm5060_vm0, %v7055_v32 }
 0x155   :  { %v5639_v57 = vpop.f32.mrb[0].mxu0 }
 0x156   :  { %v602_v59 = vpop.f32.mrb[1].mxu0 }
 0x157   :  { %v5644_v60 = vadd.f32 %v602_v59, %v204_v56  ;;  %v604_v61 = vpop.f32.mrb[2].mxu0 }
 0x158   :  { %v605_v62 = vpop.f32.mrb[3].mxu0 }
 0x159   :  { %v5648_v63 = vrot.slane %v5644_v60, %v5642_v58  ;;  %v5652_v0 = vrot.slane %v5644_v60, %v5630_v54  ;;  %v5661_v2 = vrot.slane %v5644_v60, %v5655_v1  ;;  %v5672_v4 = vrot.slane %v5644_v60, %v5666_v3 }
 0x15a   :  { %v5681_v6 = vrot.slane %v5644_v60, %v5675_v5  ;;  %v1979_v40 = vrot.slane %v5644_v60, %v5764_v35  ;;  %v2014_v42 = vrot.slane %v5644_v60, %v5777_v41  ;;  %v2049_v44 = vrot.slane %v5644_v60, %v5789_v43 }
 0x15b   :  { %1849 = vbcast.lane.b32.xlu0 %v5648_v63, 272  ;;  %1806 = vbcast.lane.b32.xlu1 %v5652_v0, 256  ;;  %vm1798_vm2 = vcmp.ge.f32.partialorder %v5644_v60, 0.0 }
 0x15f   :  { %1911 = vbcast.lane.b32.xlu0 %v5661_v2, 256  ;;  %1810 = vbcast.lane.b32.xlu1 %v5652_v0, 264 }
 0x163   :  { %1822 = vbcast.lane.b32.xlu0 %v5652_v0, 288  ;;  %1841 = vbcast.lane.b32.xlu1 %v5648_v63, 256 }
 0x167   :  { %1888 = vbcast.lane.b32.xlu0 %v5672_v4, 280  ;;  %1845 = vbcast.lane.b32.xlu1 %v5648_v63, 264 }
 0x16b   :  { %1946 = vbcast.lane.b32.xlu0 %v5681_v6, 256  ;;  %1814 = vbcast.lane.b32.xlu1 %v5652_v0, 272 }
 0x16f   :  { %1826 = vbcast.lane.b32.xlu0 %v5652_v0, 296  ;;  %1876 = vbcast.lane.b32.xlu1 %v5672_v4, 256 }
 0x173   :  { %1892 = vbcast.lane.b32.xlu0 %v5672_v4, 288  ;;  %1880 = vbcast.lane.b32.xlu1 %v5672_v4, 264 }
 0x177   :  { %1818 = vbcast.lane.b32.xlu1 %v5652_v0, 280 }
 0x17b   :  { %1853 = vbcast.lane.b32.xlu1 %v5648_v63, 280 }
 0x17f   :  { %1884 = vbcast.lane.b32.xlu1 %v5672_v4, 272 }
 0x183   :  { %1915 = vbcast.lane.b32.xlu1 %v5661_v2, 264 }
 0x187   :  { %1857 = vbcast.lane.b32.xlu1 %v5648_v63, 288 }
 0x18b   :  { %1919 = vbcast.lane.b32.xlu1 %v5661_v2, 272 }
 0x18f   :  { %1950 = vbcast.lane.b32.xlu1 %v5681_v6, 264 }
 0x193   :  { %1861 = vbcast.lane.b32.xlu1 %v5648_v63, 296 }
 0x196   :  { %v5761_v34 = vpop.f32.mrb[0].mxu1 }
 0x197   :  { %v1315_v36 = vpop.f32.mrb[1].mxu1  ;;  %1923 = vbcast.lane.b32.xlu1 %v5661_v2, 280 }
 0x198   :  { %v5766_v37 = vadd.f32 %v1315_v36, %v716_v33  ;;  %v1317_v38 = vpop.f32.mrb[2].mxu1  ;;  %v4367_v33 = vpack.c.bf16 %v42_v31, %v41_v30  ;;  %v43_v36 = vld [vmem:[%s7051_s6 + $0x10] sm:$0xff]  ;;  %v48_v31 = vld [vmem:[%s7051_s6 + $0x38] sm:$0xff] }
 0x199   :  { %v1318_v39 = vpop.f32.mrb[3].mxu1  ;;  %v44_v38 = vld [vmem:[%s7051_s6 + $0x18] sm:$0xff]  ;;  %v47_v30 = vld [vmem:[%s7051_s6 + $0x30] sm:$0xff] }
 0x19a   :  { %1321 = vrot.lane.b32.xlu0 %v5766_v37, %s5062_s5  ;;  %v1791_v10 = vsel %vm1324_vm1, %v5766_v37, -inf  ;;  %v1794_v17 = vsel %vm1324_vm1, %v5766_v37, inf  ;;  %v4370_v39 = vpack.c.bf16 %v44_v38, %v43_v36  ;;  %v49_v36 = vld [vmem:[%s7051_s6 + $0x40] sm:$0xff]  ;;  %v50_v38 = vld [vmem:[%s7051_s6 + $0x48] sm:$0xff] }
 0x19b   :  { %1981 = vbcast.lane.b32.xlu1 %v1979_v40, 256 }
 0x19e   :  { %1954 = vbcast.lane.b32.xlu0 %v5681_v6, 272 }
 0x19f   :  { %1830 = vbcast.lane.b32.xlu1 %v5652_v0, 304 }
 0x1a2   :  { %1985 = vbcast.lane.b32.xlu0 %v1979_v40, 264 }
 0x1a3   :  { %1896 = vbcast.lane.b32.xlu1 %v5672_v4, 296 }
 0x1a6   :  { %1865 = vbcast.lane.b32.xlu0 %v5648_v63, 304 }
 0x1a7   :  { %1958 = vbcast.lane.b32.xlu1 %v5681_v6, 280 }
 0x1aa   :  { %1927 = vbcast.lane.b32.xlu0 %v5661_v2, 288 }
 0x1ab   :  { %2016 = vbcast.lane.b32.xlu1 %v2014_v42, 256 }
 0x1ae   :  { %1989 = vbcast.lane.b32.xlu0 %v1979_v40, 272 }
 0x1af   :  { %1834 = vbcast.lane.b32.xlu1 %v5652_v0, 312 }
 0x1b2   :  { %2020 = vbcast.lane.b32.xlu0 %v2014_v42, 264 }
 0x1b3   :  { %1900 = vbcast.lane.b32.xlu1 %v5672_v4, 304 }
 0x1b6   :  { %1869 = vbcast.lane.b32.xlu0 %v5648_v63, 312 }
 0x1b7   :  { %1962 = vbcast.lane.b32.xlu1 %v5681_v6, 288 }
 0x1ba   :  { %1931 = vbcast.lane.b32.xlu0 %v5661_v2, 296 }
 0x1bb   :  { %2024 = vbcast.lane.b32.xlu1 %v2014_v42, 272 }
 0x1be   :  { %1993 = vbcast.lane.b32.xlu0 %v1979_v40, 280 }
 0x1bf   :  { %2055 = vbcast.lane.b32.xlu1 %v2049_v44, 264 }
 0x1c2   :  { %2051 = vbcast.lane.b32.xlu0 %v2049_v44, 256 }
 0x1c3   :  { %1904 = vbcast.lane.b32.xlu1 %v5672_v4, 312 }
 0x1c6   :  { %1935 = vbcast.lane.b32.xlu0 %v5661_v2, 304 }
 0x1c7   :  { %1966 = vbcast.lane.b32.xlu1 %v5681_v6, 296 }
 0x1ca   :  { %1997 = vbcast.lane.b32.xlu0 %v1979_v40, 288 }
 0x1cb   :  { %2028 = vbcast.lane.b32.xlu1 %v2014_v42, 280 }
 0x1cd   :  { %v5796_v45 = vpop.permute.xlu1 %1806  ;;  %v5811_v51 = vpop.permute.xlu0 %1849 }
 0x1ce   :  { %2059 = vbcast.lane.b32.xlu0 %v2049_v44, 272 }
 0x1cf   :  { %1939 = vbcast.lane.b32.xlu1 %v5661_v2, 312 }
 0x1d1   :  { %v5800_v46 = vpop.permute.xlu1 %1810  ;;  %v5815_v59 = vpop.permute.xlu0 %1911 }
 0x1d2   :  { %1970 = vbcast.lane.b32.xlu0 %v5681_v6, 304 }
 0x1d3   :  { %2001 = vbcast.lane.b32.xlu1 %v1979_v40, 296 }
 0x1d5   :  { %v5802_v47 = vpop.permute.xlu1 %1841  ;;  %v5821_v63 = vpop.permute.xlu0 %1822 }
 0x1d6   :  { %2032 = vbcast.lane.b32.xlu0 %v2014_v42, 288 }
 0x1d7   :  { %2063 = vbcast.lane.b32.xlu1 %v2049_v44, 280 }
 0x1d9   :  { %v5804_v48 = vpop.permute.xlu1 %1845  ;;  %v5825_v2 = vpop.permute.xlu0 %1888 }
 0x1da   :  { %2005 = vbcast.lane.b32.xlu0 %v1979_v40, 304 }
 0x1db   :  { %1974 = vbcast.lane.b32.xlu1 %v5681_v6, 312 }
 0x1dd   :  { %v5807_v49 = vpop.permute.xlu1 %1814  ;;  %v5829_v6 = vpop.permute.xlu0 %1946 }
 0x1de   :  { %2067 = vbcast.lane.b32.xlu0 %v2049_v44, 288 }
 0x1df   :  { %2036 = vbcast.lane.b32.xlu1 %v2014_v42, 296 }
 0x1e1   :  { %v5809_v50 = vpop.permute.xlu1 %1876  ;;  %v5833_v9 = vpop.permute.xlu0 %1826 }
 0x1e2   :  { %2040 = vbcast.lane.b32.xlu0 %v2014_v42, 304 }
 0x1e3   :  { %2009 = vbcast.lane.b32.xlu1 %v1979_v40, 312 }
 0x1e5   :  { %v5813_v56 = vpop.permute.xlu1 %1880  ;;  %v5839_v12 = vpop.permute.xlu0 %1892 }
 0x1e6   :  { %2075 = vbcast.lane.b32.xlu0 %v2049_v44, 304 }
 0x1e7   :  { %2071 = vbcast.lane.b32.xlu1 %v2049_v44, 296 }
 0x1e9   :  { %v5817_v61 = vpop.permute.xlu1 %1818 }
 0x1eb   :  { %2044 = vbcast.lane.b32.xlu1 %v2014_v42, 312 }
 0x1ed   :  { %v5819_v62 = vpop.permute.xlu1 %1853 }
 0x1ef   :  { %2079 = vbcast.lane.b32.xlu1 %v2049_v44, 312  ;;  %v45_v44 = vld [vmem:[%s7051_s6 + $0x20] sm:$0xff] }
 0x1f1   :  { %v5823_v0 = vpop.permute.xlu1 %1884 }
 0x1f5   :  { %v5827_v4 = vpop.permute.xlu1 %1915 }
 0x1f9   :  { %v5831_v8 = vpop.permute.xlu1 %1857 }
 0x1fd   :  { %v5837_v11 = vpop.permute.xlu1 %1919 }
 0x201   :  { %v5841_v14 = vpop.permute.xlu1 %1950 }
 0x205   :  { %1792 = vmax.xlane.f32.xlu0 %v1791_v10  ;;  %v5847_v16 = vpop.permute.xlu1 %1861  ;;  %v46_v10 = vld [vmem:[%s7051_s6 + $0x28] sm:$0xff] }
 0x209   :  { %v5851_v18 = vpop.permute.xlu1 %1923 }
 0x20c   :  { %v1322_v13 = vpop.permute.xlu0 %1321 }
 0x20d   :  { %v1325_v15 = vsel %vm1324_vm1, %v5644_v60, %v1322_v13  ;;  %v5853_v19 = vpop.permute.xlu1 %1981  ;;  %v4373_v13 = vpack.c.bf16 %v46_v10, %v45_v44 }
 0x20e   :  { %4221 = vmatmul.mubr.f32.vlgmr.msra.gmra.mrb[4].mxu0 %v1325_v15 }
 0x20f   :  { %4255 = vmatprep.mubr.msk.f32.mxu0 %vm5060_vm0, %v7055_v32  ;;  %4368 = vmatpush3.bf16.msra.mxu0 %v4367_v33  ;;  %v4376_v33 = vpack.c.bf16 %v48_v31, %v47_v30  ;;  %v52_v30 = vld [vmem:[%s7051_s6 + $0x58] sm:$0xff] }
 0x210   :  { %v5859_v22 = vpop.permute.xlu0 %1954  ;;  %4369 = vmatprep.subr.bf16.mxu0 %v7057_v7  ;;  %v56_v32 = vld [vmem:[%s7051_s6 + $0x78] sm:$0xff] }
 0x211   :  { %v5855_v20 = vpop.permute.xlu1 %1830 }
 0x213   :  { %1795 = vmin.xlane.f32.xlu1 %v1794_v17  ;;  %4371 = vmatpush3.bf16.msra.mxu0 %v4370_v39  ;;  %v4379_v39 = vpack.c.bf16 %v50_v38, %v49_v36  ;;  %v53_v38 = vld [vmem:[%s7051_s6 + $0x60] sm:$0xff] }
 0x214   :  { %v5863_v24 = vpop.permute.xlu0 %1985  ;;  %4372 = vmatprep.subr.bf16.mxu0 %v7057_v7 }
 0x215   :  { %v5857_v21 = vpop.permute.xlu1 %1896 }
 0x217   :  { %4374 = vmatpush3.bf16.msra.mxu0 %v4373_v13  ;;  %v51_v13 = vld [vmem:[%s7051_s6 + $0x50] sm:$0xff] }
 0x218   :  { %v5867_v26 = vpop.permute.xlu0 %1865  ;;  %4375 = vmatprep.subr.bf16.mxu0 %v7057_v7  ;;  %v4382_v31 = vpack.c.bf16 %v52_v30, %v51_v13 }
 0x219   :  { %v5861_v23 = vpop.permute.xlu1 %1958 }
 0x21a   :  { %7081 = vst [vmem:[#allocation13_spill] sm:$0xff] %v5861_v23 }
 0x21b   :  { %4377 = vmatpush3.bf16.msra.mxu0 %v4376_v33 }
 0x21c   :  { %v5871_v28 = vpop.permute.xlu0 %1927  ;;  %4378 = vmatprep.subr.bf16.mxu0 %v7057_v7 }
 0x21d   :  { %v5865_v25 = vpop.permute.xlu1 %2016 }
 0x21e   :  { %7082 = vst [vmem:[#allocation14_spill] sm:$0xff] %v5865_v25 }
 0x21f   :  { %4380 = vmatpush3.bf16.msra.mxu0 %v4379_v39  ;;  %v54_v39 = vld [vmem:[%s7051_s6 + $0x68] sm:$0xff] }
 0x220   :  { %v5888_v40 = vpop.permute.xlu0 %1989  ;;  %4381 = vmatprep.subr.bf16.mxu0 %v7057_v7  ;;  %v4385_v52 = vpack.c.bf16 %v54_v39, %v53_v38  ;;  %v74_v38 = vld [vmem:[%s7051_s6 + $0x108] sm:$0xff] }
 0x221   :  { %v5869_v27 = vpop.permute.xlu1 %1834 }
 0x222   :  { %7083 = vst [vmem:[#allocation15_spill] sm:$0xff] %v5869_v27 }
 0x223   :  { %4383 = vmatpush3.bf16.msra.mxu0 %v4382_v31  ;;  %v55_v31 = vld [vmem:[%s7051_s6 + $0x70] sm:$0xff] }
 0x224   :  { %v5899_v15 = vpop.permute.xlu0 %2020  ;;  %4384 = vmatprep.subr.bf16.mxu0 %v7057_v7 }
 0x225   :  { %v5873_v29 = vpop.permute.xlu1 %1900 }
 0x226   :  { %7084 = vst [vmem:[#allocation16_spill] sm:$0xff] %v5873_v29 }
 0x227   :  { %4386 = vmatpush3.bf16.msra.mxu0 %v4385_v52  ;;  %v73_v52 = vld [vmem:[%s7051_s6 + $0x100] sm:$0xff] }
 0x228   :  { %v5917_v44 = vpop.permute.xlu0 %1869  ;;  %4387 = vmatprep.subr.bf16.mxu0 %v7057_v7  ;;  %v4390_v39 = vpack.c.bf16 %v74_v38, %v73_v52 }
 0x229   :  { %v5890_v42 = vpop.permute.xlu1 %1962 }
 0x22a   :  { %7085 = vst [vmem:[#allocation17_spill] sm:$0xff] %v5890_v42 }
 0x22c   :  { %v5928_v33 = vpop.permute.xlu0 %1931 }
 0x22d   :  { %v5901_v17 = vpop.permute.xlu1 %2024  ;;  %7088 = vst [vmem:[#allocation20_spill] sm:$0xff] %v5928_v33 }
 0x22e   :  { %7086 = vst [vmem:[#allocation18_spill] sm:$0xff] %v5901_v17 }
 0x230   :  { %v5940_v13 = vpop.permute.xlu0 %1993 }
 0x231   :  { %v5919_v10 = vpop.permute.xlu1 %2055  ;;  %7090 = vst [vmem:[#allocation22_spill] sm:$0xff] %v5940_v13 }
 0x232   :  { %7087 = vst [vmem:[#allocation19_spill] sm:$0xff] %v5919_v10  ;;  %v4388_v10 = vpack.c.bf16 %v56_v32, %v55_v31  ;;  %v5967_v32 = vld [vmem:[%s7052_s7] sm:$0xff] }
 0x233   :  { %v712_v52 = vrot.slane %v5967_v32, %v5642_v58 }
 0x234   :  { %4389 = vmatpush3.bf16.msra.mxu0 %v4388_v10  ;;  %v5956_v7 = vpop.permute.xlu0 %2051 }
 0x235   :  { %v5930_v36 = vpop.permute.xlu1 %1904  ;;  %7092 = vst [vmem:[#allocation24_spill] sm:$0xff] %v5956_v7  ;;  %4391 = vmatprep.subr.bf16.mxu0 %v4390_v39  ;;  %v5976_v38 = vadd.f32 %v5761_v34, %v712_v52 }
 0x236   :  { %7089 = vst [vmem:[#allocation21_spill] sm:$0xff] %v5930_v36 }
 0x239   :  { %v5942_v30 = vpop.permute.xlu1 %1966 }
 0x23a   :  { %7091 = vst [vmem:[#allocation23_spill] sm:$0xff] %v5942_v30  ;;  %v5960_v30 = vpop.permute.xlu0 %1935 }
 0x23b   :  { %7094 = vst [vmem:[#allocation26_spill] sm:$0xff] %v5960_v30 }
 0x23d   :  { %v5958_v17 = vpop.permute.xlu1 %2028 }
 0x23e   :  { %7093 = vst [vmem:[#allocation25_spill] sm:$0xff] %v5958_v17  ;;  %v5969_v10 = vpop.permute.xlu0 %1997 }
 0x23f   :  { %7096 = vst [vmem:[#allocation28_spill] sm:$0xff] %v5969_v10 }
 0x241   :  { %v5962_v42 = vpop.permute.xlu1 %1939 }
 0x242   :  { %7095 = vst [vmem:[#allocation27_spill] sm:$0xff] %v5962_v42  ;;  %v5978_v39 = vpop.permute.xlu0 %2059  ;;  %v1613_v42 = vrot.slane %v5976_v38, 4 }
 0x243   :  { %7098 = vst [vmem:[#allocation30_spill] sm:$0xff] %v5978_v39 }
 0x244   :  { %v1614_v10 = vadd.f32 %v5976_v38, %v1613_v42 }
 0x245   :  { %v5971_v31 = vpop.permute.xlu1 %2001 }
 0x246   :  { %7097 = vst [vmem:[#allocation29_spill] sm:$0xff] %v5971_v31  ;;  %v5983_v17 = vpop.permute.xlu0 %1970  ;;  %v1615_v29 = vrot.slane %v1614_v10, 2 }
 0x247   :  { %7100 = vst [vmem:[#allocation32_spill] sm:$0xff] %v5983_v17 }
 0x248   :  { %v1616_v27 = vadd.f32 %v1615_v29, %v1614_v10 }
 0x249   :  { %v5980_v30 = vpop.permute.xlu1 %2063 }
 0x24a   :  { %7099 = vst [vmem:[#allocation31_spill] sm:$0xff] %v5980_v30  ;;  %v5988_v31 = vpop.permute.xlu0 %2032  ;;  %v1617_v39 = vrot.slane %v1616_v27, 1 }
 0x24b   :  { %7102 = vst [vmem:[#allocation34_spill] sm:$0xff] %v5988_v31 }
 0x24c   :  { %v1618_v30 = vadd.f32 %v1617_v39, %v1616_v27 }
 0x24d   :  { %v5985_v36 = vpop.permute.xlu1 %1974 }
 0x24e   :  { %7101 = vst [vmem:[#allocation33_spill] sm:$0xff] %v5985_v36  ;;  %v5992_v34 = vpop.permute.xlu0 %2005  ;;  %v200_v36 = vrot.slane %v5967_v32, %v5630_v54  ;;  %v6002_v42 = vmul.f32 0.125, %v1618_v30 }
 0x24f   :  { %7104 = vst [vmem:[#allocation36_spill] sm:$0xff] %v5992_v34 }
 0x250   :  { %v6005_v31 = vadd.f32 %v5639_v57, %v200_v36  ;;  %v1623_v10 = vsub.f32 %v5976_v38, %v6002_v42  ;;  %v1797_v36 = vmul.f32 0.125, %v5644_v60 }
 0x251   :  { %v5990_v7 = vpop.permute.xlu1 %2036 }
 0x252   :  { %7103 = vst [vmem:[#allocation35_spill] sm:$0xff] %v5990_v7  ;;  %v5996_v13 = vpop.permute.xlu0 %2067  ;;  %v1607_v27 = vrot.slane %v6005_v31, 4  ;;  %v1625_v39 = vmul.f32 %v1623_v10, %v1623_v10 }
 0x253   :  { %7106 = vst [vmem:[#allocation38_spill] sm:$0xff] %v5996_v13 }
 0x254   :  { %v1608_v30 = vadd.f32 %v6005_v31, %v1607_v27  ;;  %v1632_v13 = vrot.slane %v1625_v39, 4 }
 0x255   :  { %v5994_v52 = vpop.permute.xlu1 %2009 }
 0x256   :  { %7105 = vst [vmem:[#allocation37_spill] sm:$0xff] %v5994_v52  ;;  %v6007_v7 = vpop.permute.xlu0 %2040  ;;  %v1633_v33 = vadd.f32 %v1632_v13, %v1625_v39 }
 0x257   :  { %7108 = vst [vmem:[#allocation40_spill] sm:$0xff] %v6007_v7  ;;  %v1609_v7 = vrot.slane %v1608_v30, 2 }
 0x258   :  { %v1634_v27 = vrot.slane %v1633_v33, 2 }
 0x259   :  { %v5998_v25 = vpop.permute.xlu1 %2071 }
 0x25a   :  { %7107 = vst [vmem:[#allocation39_spill] sm:$0xff] %v5998_v25  ;;  %v6014_v52 = vpop.permute.xlu0 %2075 }
 0x25b   :  { %7110 = vst [vmem:[#allocation42_spill] sm:$0xff] %v6014_v52  ;;  %v1610_v52 = vadd.f32 %v1609_v7, %v1608_v30 }
 0x25d   :  { %v6009_v29 = vpop.permute.xlu1 %2044  ;;  %v1611_v60 = vrot.slane %v1610_v52, 1 }
 0x25e   :  { %7109 = vst [vmem:[#allocation41_spill] sm:$0xff] %v6009_v29 }
 0x25f   :  { %v1612_v13 = vadd.f32 %v1611_v60, %v1610_v52 }
 0x261   :  { %v6016_v25 = vpop.permute.xlu1 %2079  ;;  %v6041_v39 = vmul.f32 0.125, %v1612_v13 }
 0x262   :  { %7111 = vst [vmem:[#allocation43_spill] sm:$0xff] %v6016_v25 }
 0x292   :  { %v1793_v17 = vpop.xlane.xlu0 %1792 }
 0x2a0   :  { %v1796_v57 = vpop.xlane.xlu1 %1795 }
 0x2a1   :  { %v1799_v29 = vsel %vm1798_vm2, %v1793_v17, %v1796_v57  ;;  %v1635_v17 = vadd.f32 %v1634_v27, %v1633_v33  ;;  %v1622_v33 = vsub.f32 %v6005_v31, %v6041_v39  ;;  %vm3434_vm2 = vcmask 1047559  }
 0x2a2   :  { %v6021_v34 = vmul.f32 %v1799_v29, %v1797_v36 }
 0x2a3   :  { %v1636_v7 = vrot.slane %v1635_v17, 1  ;;  %v1624_v36 = vmul.f32 %v1622_v33, %v1622_v33 }
 0x2a4   :  { %v6025_v10 = vrot.slane %v6021_v34, %v5630_v54  ;;  %v6031_v25 = vrot.slane %v6021_v34, %v5642_v58  ;;  %v6039_v29 = vrot.slane %v6021_v34, %v5666_v3  ;;  %v6051_v57 = vrot.slane %v6021_v34, %v5655_v1 }
 0x2a5   :  { %v1637_v30 = vadd.f32 %v1636_v7, %v1635_v17  ;;  %v1626_v60 = vrot.slane %v1624_v36, 4  ;;  %v6061_v13 = vrot.slane %v6021_v34, %v5675_v5 }
 0x2a6   :  { %2307 = vbcast.lane.b32.xlu0 %v6025_v10, 264  ;;  %2303 = vbcast.lane.b32.xlu1 %v6025_v10, 256 }
 0x2a7   :  { %v1639_v52 = vmul.f32 0.125, %v1637_v30  ;;  %v1627_v17 = vadd.f32 %v1626_v60, %v1624_v36 }
 0x2a9   :  { %v1641_v27 = vadd.f32 1e-05, %v1639_v52  ;;  %v1628_v7 = vrot.slane %v1627_v17, 2 }
 0x2aa   :  { %2342 = vbcast.lane.b32.xlu0 %v6031_v25, 264  ;;  %2338 = vbcast.lane.b32.xlu1 %v6031_v25, 256 }
 0x2ab   :  { %4744 = vrsqrt.f32 %v1641_v27  ;;  %v1629_v33 = vadd.f32 %v1628_v7, %v1627_v17  ;;  %v6072_v27 = vrot.slane %v6021_v34, %v5764_v35 }
 0x2ad   :  { %v1630_v36 = vrot.slane %v1629_v33, 1 }
 0x2ae   :  { %2346 = vbcast.lane.b32.xlu0 %v6031_v25, 272  ;;  %2311 = vbcast.lane.b32.xlu1 %v6025_v10, 272 }
 0x2af   :  { %v1631_v58 = vadd.f32 %v1630_v36, %v1629_v33  ;;  %v1345_v36 = vrot.slane %v5967_v32, %v5675_v5 }
 0x2b1   :  { %v1638_v7 = vmul.f32 0.125, %v1631_v58 }
 0x2b2   :  { %2377 = vbcast.lane.b32.xlu0 %v6039_v29, 264  ;;  %2373 = vbcast.lane.b32.xlu1 %v6039_v29, 256 }
 0x2b3   :  { %v1640_v23 = vadd.f32 1e-05, %v1638_v7 }
 0x2b5   :  { %v4745_v30 = vpop.eup %4744  ;;  %4746 = vrsqrt.f32 %v1640_v23 }
 0x2b6   :  { %2315 = vbcast.lane.b32.xlu0 %v6025_v10, 280  ;;  %2350 = vbcast.lane.b32.xlu1 %v6031_v25, 280  ;;  %v1645_v52 = vmul.f32 %v4745_v30, %v5635_v55 }
 0x2b8   :  { %v1647_v60 = vmul.f32 %v1645_v52, %v6002_v42  ;;  %v1663_v42 = vrot.slane %v1645_v52, %v5666_v3  ;;  %v58_v52 = vld [vmem:[%s7051_s6 + $0x88] sm:$0xff] }
 0x2ba   :  { %2381 = vbcast.lane.b32.xlu0 %v6039_v29, 272  ;;  %2408 = vbcast.lane.b32.xlu1 %v6051_v57, 256  ;;  %v1651_v17 = vrot.slane %v1647_v60, 7  ;;  %v1665_v58 = vmul.f32 %v5976_v38, %v1663_v42  ;;  %v75_v38 = vld [vmem:[%s7051_s6 + $0x110] sm:$0xff]  ;;  %v76_v42 = vld [vmem:[%s7051_s6 + $0x118] sm:$0xff] }
 0x2bc   :  { %v1655_v30 = vsub.f32 %v5635_v55, %v1651_v17  ;;  %v57_v55 = vld [vmem:[%s7051_s6 + $0x80] sm:$0xff]  ;;  %v6097_v17 = vrot.slane %v6021_v34, %v5777_v41  ;;  %v2098_v41 = vmul.f32 0.125, %v5813_v56 }
 0x2bd   :  { %v4392_v5 = vpack.c.bf16 %v58_v52, %v57_v55  ;;  %v78_v55 = vld [vmem:[%s7051_s6 + $0x128] sm:$0xff] }
 0x2be   :  { %2412 = vbcast.lane.b32.xlu0 %v6051_v57, 264  ;;  %2319 = vbcast.lane.b32.xlu1 %v6025_v10, 288  ;;  %v1673_v33 = vrot.slane %v1655_v30, %v5655_v1 }
 0x2c0   :  { %v1675_v23 = vadd.f32 %v1673_v33, %v1665_v58  ;;  %v59_v33 = vld [vmem:[%s7051_s6 + $0x90] sm:$0xff] }
 0x2c2   :  { %2354 = vbcast.lane.b32.xlu0 %v6031_v25, 288  ;;  %2385 = vbcast.lane.b32.xlu1 %v6039_v29, 280  ;;  %v1677_v58 = vmax.f32 %v1675_v23, 0.0  ;;  %v61_v23 = vld [vmem:[%s7051_s6 + $0xa0] sm:$0xff] }
 0x2c6   :  { %2416 = vbcast.lane.b32.xlu0 %v6051_v57, 272  ;;  %2443 = vbcast.lane.b32.xlu1 %v6061_v13, 256 }
 0x2ca   :  { %2447 = vbcast.lane.b32.xlu0 %v6061_v13, 264  ;;  %2358 = vbcast.lane.b32.xlu1 %v6031_v25, 296 }
 0x2ce   :  { %2323 = vbcast.lane.b32.xlu0 %v6025_v10, 296  ;;  %2420 = vbcast.lane.b32.xlu1 %v6051_v57, 280 }
 0x2d2   :  { %2389 = vbcast.lane.b32.xlu0 %v6039_v29, 288  ;;  %2478 = vbcast.lane.b32.xlu1 %v6072_v27, 256 }
 0x2d6   :  { %2451 = vbcast.lane.b32.xlu0 %v6061_v13, 272  ;;  %2327 = vbcast.lane.b32.xlu1 %v6025_v10, 304 }
 0x2da   :  { %2482 = vbcast.lane.b32.xlu0 %v6072_v27, 264  ;;  %2393 = vbcast.lane.b32.xlu1 %v6039_v29, 296 }
 0x2de   :  { %2362 = vbcast.lane.b32.xlu0 %v6031_v25, 304  ;;  %2455 = vbcast.lane.b32.xlu1 %v6061_v13, 280 }
 0x2e1   :  { %v1412_v60 = vpop.f32.mrb[4].mxu0 }
 0x2e2   :  { %v1413_v7 = vadd.f32 %v1412_v60, %v1345_v36  ;;  %v4222_v30 = vpop.f32.mrb[5].mxu0  ;;  %2424 = vbcast.lane.b32.xlu0 %v6051_v57, 288  ;;  %2513 = vbcast.lane.b32.xlu1 %v6097_v17, 256  ;;  %v60_v36 = vld [vmem:[%s7051_s6 + $0x98] sm:$0xff]  ;;  %v4394_v60 = vpack.c.bf16 %v76_v42, %v75_v38 }
 0x2e3   :  { %v77_v30 = vld [vmem:[%s7051_s6 + $0x120] sm:$0xff]  ;;  %v4396_v52 = vpack.c.bf16 %v60_v36, %v59_v33  ;;  %v80_v42 = vld [vmem:[%s7051_s6 + $0x138] sm:$0xff]  ;;  %v63_v36 = vld [vmem:[%s7051_s6 + $0xb0] sm:$0xff] }
 0x2e4   :  { %v1416_v35 = vmax.f32 %v1413_v7, 0.0  ;;  %v4747_v7 = vpop.eup %4746  ;;  %v4398_v38 = vpack.c.bf16 %v78_v55, %v77_v30  ;;  %v81_v30 = vld [vmem:[%s7051_s6 + $0x140] sm:$0xff]  ;;  %v82_v55 = vld [vmem:[%s7051_s6 + $0x148] sm:$0xff] }
 0x2e5   :  { %v1644_v33 = vmul.f32 %v4747_v7, %v5967_v32  ;;  %v66_v7 = vld [vmem:[%s7051_s6 + $0xc8] sm:$0xff] }
 0x2e6   :  { %4256 = vmatmul.mubr.f32.vlgmr.msra.gmra.mrb[6].mxu0 %v1416_v35  ;;  %2486 = vbcast.lane.b32.xlu0 %v6072_v27, 272  ;;  %v62_v35 = vld [vmem:[%s7051_s6 + $0xa8] sm:$0xff] }
 0x2e7   :  { %4393 = vmatpush3.bf16.msra.mxu0 %v4392_v5  ;;  %1742 = vmatprep.mubr.f32.mxu0 %v1677_v58  ;;  %v79_v5 = vld [vmem:[%s7051_s6 + $0x130] sm:$0xff]  ;;  %v64_v58 = vld [vmem:[%s7051_s6 + $0xb8] sm:$0xff] }
 0x2e8   :  { %2366 = vbcast.lane.b32.xlu1 %v6031_v25, 312  ;;  %4395 = vmatprep.subr.bf16.mxu0 %v4394_v60  ;;  %v4400_v25 = vpack.c.bf16 %v62_v35, %v61_v23  ;;  %v4402_v60 = vpack.c.bf16 %v80_v42, %v79_v5  ;;  %v1646_v23 = vmul.f32 %v1644_v33, %v6041_v39  ;;  %v65_v35 = vld [vmem:[%s7051_s6 + $0xc0] sm:$0xff]  ;;  %v84_v39 = vld [vmem:[%s7051_s6 + $0x158] sm:$0xff] }
 0x2e9   :  { %v6159_v5 = vrot.slane %v6021_v34, %v5789_v43  ;;  %v4408_v42 = vpack.c.bf16 %v66_v7, %v65_v35  ;;  %v67_v34 = vld [vmem:[%s7051_s6 + $0xd0] sm:$0xff] }
 0x2ea   :  { %2517 = vbcast.lane.b32.xlu0 %v6097_v17, 264 }
 0x2eb   :  { %4397 = vmatpush3.bf16.msra.mxu0 %v4396_v52  ;;  %v4404_v52 = vpack.c.bf16 %v64_v58, %v63_v36  ;;  %v68_v36 = vld [vmem:[%s7051_s6 + $0xd8] sm:$0xff] }
 0x2ec   :  { %2428 = vbcast.lane.b32.xlu1 %v6051_v57, 296  ;;  %4399 = vmatprep.subr.bf16.mxu0 %v4398_v38  ;;  %v4406_v38 = vpack.c.bf16 %v82_v55, %v81_v30  ;;  %v86_v30 = vld [vmem:[%s7051_s6 + $0x168] sm:$0xff]  ;;  %v4412_v55 = vpack.c.bf16 %v68_v36, %v67_v34 }
 0x2ee   :  { %2331 = vbcast.lane.b32.xlu0 %v6025_v10, 312  ;;  %v83_v10 = vld [vmem:[%s7051_s6 + $0x150] sm:$0xff] }
 0x2ef   :  { %4401 = vmatpush3.bf16.msra.mxu0 %v4400_v25  ;;  %v1650_v25 = vrot.slane %v1646_v23, 7  ;;  %v4410_v58 = vpack.c.bf16 %v84_v39, %v83_v10  ;;  %v70_v23 = vld [vmem:[%s7051_s6 + $0xe8] sm:$0xff]  ;;  %v87_v10 = vld [vmem:[%s7051_s6 + $0x170] sm:$0xff] }
 0x2f0   :  { %2490 = vbcast.lane.b32.xlu1 %v6072_v27, 280  ;;  %4403 = vmatprep.subr.bf16.mxu0 %v4402_v60  ;;  %v85_v60 = vld [vmem:[%s7051_s6 + $0x160] sm:$0xff] }
 0x2f1   :  { %v1654_v35 = vsub.f32 %v5967_v32, %v1650_v25  ;;  %v4414_v7 = vpack.c.bf16 %v86_v30, %v85_v60  ;;  %v71_v32 = vld [vmem:[%s7051_s6 + $0xf0] sm:$0xff]  ;;  %v7112_v30 = vmov 0.0|0.0  }
 0x2f2   :  { %2397 = vbcast.lane.b32.xlu0 %v6039_v29, 304 }
 0x2f3   :  { %4405 = vmatpush3.bf16.msra.mxu0 %v4404_v52  ;;  %v69_v52 = vld [vmem:[%s7051_s6 + $0xe0] sm:$0xff] }
 0x2f4   :  { %2548 = vbcast.lane.b32.xlu1 %v6159_v5, 256  ;;  %4407 = vmatprep.subr.bf16.mxu0 %v4406_v38  ;;  %v1659_v38 = vrot.slane %v1644_v33, %v5666_v3  ;;  %v4416_v39 = vpack.c.bf16 %v70_v23, %v69_v52  ;;  %v72_v33 = vld [vmem:[%s7051_s6 + $0xf8] sm:$0xff]  ;;  %v2082_v3 = vmul.f32 0.125, %v5800_v46  ;;  %v2092_v46 = vmul.f32 0.125, %v5819_v62 }
 0x2f5   :  { %v4420_v36 = vpack.c.bf16 %v72_v33, %v71_v32 }
 0x2f6   :  { %2459 = vbcast.lane.b32.xlu0 %v6061_v13, 288  ;;  %v1664_v34 = vmul.f32 %v6005_v31, %v1659_v38  ;;  %v5063_v31 = vmov 1966171168  }
 0x2f7   :  { %4409 = vmatpush3.bf16.msra.mxu0 %v4408_v42  ;;  %v1669_v42 = vrot.slane %v1654_v35, %v5655_v1  ;;  %v2147_v52 = vunpack.c.l.s4 %v5063_v31 }
 0x2f8   :  { %2401 = vbcast.lane.b32.xlu1 %v6039_v29, 312  ;;  %4411 = vmatprep.subr.bf16.mxu0 %v4410_v58  ;;  %v88_v29 = vld [vmem:[%s7051_s6 + $0x178] sm:$0xff] }
 0x2f9   :  { %v4418_v25 = vpack.c.bf16 %v88_v29, %v87_v10  ;;  %v1674_v58 = vadd.f32 %v1669_v42, %v1664_v34  ;;  %v2148_v23 = vunpack.c.0.s8 %v2147_v52  ;;  %v2081_v42 = vmul.f32 0.125, %v5796_v45 }
 0x2fa   :  { %2521 = vbcast.lane.b32.xlu0 %v6097_v17, 272 }
 0x2fb   :  { %4413 = vmatpush3.bf16.msra.mxu0 %v4412_v55  ;;  %v1676_v60 = vmax.f32 %v1674_v58, 0.0  ;;  %v7113_v55 = vmov 0.0   ;;  %v6225_v38 = vsub.s32 %v2148_v23, %v5627_v53  ;;  %v2090_v58 = vmul.f32 0.125, %v5804_v48 }
 0x2fc   :  { %2463 = vbcast.lane.b32.xlu1 %v6061_v13, 296  ;;  %4415 = vmatprep.subr.bf16.mxu0 %v4414_v7 }
 0x2fd   :  { %v2152_v10 = vrot.slane %v5766_v37, %v6225_v38 }
 0x2fe   :  { %2552 = vbcast.lane.b32.xlu0 %v6159_v5, 264 }
 0x2ff   :  { %4417 = vmatpush3.bf16.msra.mxu0 %v4416_v39  ;;  %v2160_v32 = vcombine.high %v2152_v10, %v2152_v10  ;;  %v2168_v33 = vrot.slane %v2152_v10, %v6225_v38  ;;  %v2091_v10 = vmul.f32 0.125, %v5811_v51 }
 0x300   :  { %2525 = vbcast.lane.b32.xlu1 %v6097_v17, 280  ;;  %4419 = vmatprep.subr.bf16.mxu0 %v4418_v25 }
 0x301   :  { %v2182_v34 = vrot.slane %v2160_v32, %v6225_v38 }
 0x302   :  { %2432 = vbcast.lane.b32.xlu0 %v6051_v57, 304 }
 0x303   :  { %4421 = vmatpush3.bf16.msra.mxu0 %v4420_v36  ;;  %v6243_v36 = vrot.slane %v2168_v33, %v5630_v54  ;;  %v6251_v45 = vrot.slane %v2182_v34, %v5630_v54  ;;  %v2192_v53 = vcombine.high %v2182_v34, %v2182_v34 }
 0x304   :  { %2467 = vbcast.lane.b32.xlu1 %v6061_v13, 304  ;;  %4452 = vmatprep.subr.bf16.mxu0 %v7112_v30 }
 0x305   :  { %v2243_v32 = vmul.f32 %v6251_v45, %v2090_v58 }
 0x306   :  { %1743 = vmatmul.mubr.f32.vlgmr.msra.gmra.mrb[8].mxu0 %v1676_v60  ;;  %2494 = vbcast.lane.b32.xlu0 %v6072_v27, 288  ;;  %v2234_v60 = vmul.f32 %v6243_v36, %v2081_v42  ;;  %v2190_v42 = vcombine.high %v2168_v33, %v2168_v33  ;;  %v2089_v33 = vmul.f32 0.125, %v5802_v47  ;;  %v2105_v47 = vmul.f32 0.125, %v5815_v59 }
 0x307   :  { %4320 = vmatprep.mubr.msk.f32.mxu0 %vm5060_vm0, %v7113_v55  ;;  %v2244_v55 = vmul.f32 %v6251_v45, %v2091_v10  ;;  %v2097_v59 = vmul.f32 0.125, %v5809_v50 }
 0x308   :  { %2529 = vbcast.lane.b32.xlu1 %v6097_v17, 288  ;;  %v6268_v58 = vrot.slane %v2190_v42, %v5630_v54 }
 0x30a   :  { %2556 = vbcast.lane.b32.xlu0 %v6159_v5, 272  ;;  %v2251_v56 = vmul.f32 %v6268_v58, %v2098_v41  ;;  %v2145_v41 = vcombine.high %v5766_v37, %v5766_v37  ;;  %v2085_v37 = vmul.f32 0.125, %v5821_v63  ;;  %v2250_v63 = vmul.f32 %v6268_v58, %v2097_v59 }
 0x30c   :  { %2471 = vbcast.lane.b32.xlu1 %v6061_v13, 312 }
 0x30e   :  { %2436 = vbcast.lane.b32.xlu0 %v6051_v57, 312 }
 0x310   :  { %2533 = vbcast.lane.b32.xlu1 %v6097_v17, 296 }
 0x312   :  { %2498 = vbcast.lane.b32.xlu0 %v6072_v27, 296 }
 0x314   :  { %2506 = vbcast.lane.b32.xlu1 %v6072_v27, 312 }
 0x316   :  { %2560 = vbcast.lane.b32.xlu0 %v6159_v5, 280 }
 0x318   :  { %2568 = vbcast.lane.b32.xlu1 %v6159_v5, 296  ;;  %v2308_v35 = vpop.permute.xlu0 %2307  ;;  %v2304_v7 = vpop.permute.xlu1 %2303 }
 0x319   :  { %v2578_v23 = vsub.f32 %v2234_v60, %v2304_v7 }
 0x31a   :  { %2502 = vbcast.lane.b32.xlu0 %v6072_v27, 304 }
 0x31b   :  { %v2642_v1 = vmul.f32 1.442695, %v2578_v23 }
 0x31c   :  { %2572 = vbcast.lane.b32.xlu1 %v6159_v5, 304  ;;  %v2343_v57 = vpop.permute.xlu0 %2342  ;;  %v6229_v13 = vpop.permute.xlu1 %2338 }
 0x31d   :  { %4748 = vpow2.f32 %v2642_v1  ;;  %v2083_v1 = vmul.f32 0.125, %v5807_v49 }
 0x31e   :  { %2564 = vbcast.lane.b32.xlu0 %v6159_v5, 288 }
 0x320   :  { %v2347_v29 = vpop.permute.xlu0 %2346  ;;  %v6234_v39 = vpop.permute.xlu1 %2311 }
 0x321   :  { %v2588_v60 = vsub.f32 %v2244_v55, %v2347_v29  ;;  %v2242_v55 = vmul.f32 %v6251_v45, %v2089_v33 }
 0x322   :  { %2537 = vbcast.lane.b32.xlu0 %v6097_v17, 304 }
 0x323   :  { %v2662_v42 = vmul.f32 1.442695, %v2588_v60 }
 0x324   :  { %v2378_v27 = vpop.permute.xlu0 %2377  ;;  %v6239_v25 = vpop.permute.xlu1 %2373 }
 0x325   :  { %v2595_v30 = vsub.f32 %v2251_v56, %v2378_v27  ;;  %v6290_v27 = vrot.slane %v2192_v53, %v5630_v54  ;;  %v2084_v56 = vmul.f32 0.125, %v5817_v61 }
 0x326   :  { %2541 = vbcast.lane.b32.xlu0 %v6097_v17, 312  ;;  %v2587_v17 = vsub.f32 %v2243_v32, %v2343_v57  ;;  %v2235_v57 = vmul.f32 %v6243_v36, %v2082_v3  ;;  %v2245_v3 = vmul.f32 %v6251_v45, %v2092_v46 }
 0x327   :  { %v2676_v49 = vmul.f32 1.442695, %v2595_v30  ;;  %v4749_v60 = vpop.eup %4748  ;;  %v2258_v33 = vmul.f32 %v6290_v27, %v2105_v47  ;;  %v6302_v30 = vrot.slane %v2145_v41, %v6225_v38  ;;  %v2594_v47 = vsub.f32 %v2250_v63, %v6239_v25 }
 0x328   :  { %v6248_v31 = vpop.permute.xlu0 %2315  ;;  %v2351_v52 = vpop.permute.xlu1 %2350  ;;  %v2579_v23 = vsub.f32 %v2235_v57, %v2308_v35  ;;  %v2586_v35 = vsub.f32 %v2242_v55, %v6229_v13  ;;  %v2113_v25 = vmul.f32 0.125, %v5829_v6 }
 0x329   :  { %v6317_v61 = vrot.slane %v6302_v30, %v6225_v38 }
 0x32a   :  { %2576 = vbcast.lane.b32.xlu0 %v6159_v5, 312  ;;  %v2660_v5 = vmul.f32 1.442695, %v2587_v17  ;;  %v2644_v62 = vmul.f32 1.442695, %v2579_v23  ;;  %v2589_v17 = vsub.f32 %v2245_v3, %v2351_v52  ;;  %v2770_v23 = vsel %vm1324_vm1, %v4749_v60, 0.0 }
 0x32b   :  { %v2658_v13 = vmul.f32 1.442695, %v2586_v35  ;;  %v2237_v35 = vmul.f32 %v6243_v36, %v2084_v56  ;;  %v2086_v56 = vmul.f32 0.125, %v5833_v9  ;;  %v2093_v9 = vmul.f32 0.125, %v5831_v8 }
 0x32c   :  { %v6256_v43 = vpop.permute.xlu0 %2381  ;;  %v6258_v48 = vpop.permute.xlu1 %2408  ;;  %4750 = vpow2.f32 %v2660_v5  ;;  %v2236_v5 = vmul.f32 %v6243_v36, %v2083_v1  ;;  %v2664_v50 = vmul.f32 1.442695, %v2589_v17  ;;  %v2238_v1 = vmul.f32 %v6243_v36, %v2085_v37 }
 0x32d   :  { %4752 = vpow2.f32 %v2662_v42  ;;  %v2602_v52 = vsub.f32 %v2258_v33, %v6258_v48  ;;  %v2581_v60 = vsub.f32 %v2237_v35, %v6248_v31  ;;  %v2239_v35 = vmul.f32 %v6243_v36, %v2086_v56 }
 0x32e   :  { %4754 = vpow2.f32 %v2644_v62  ;;  %v2580_v57 = vsub.f32 %v2236_v5, %v6234_v39  ;;  %v2100_v39 = vmul.f32 0.125, %v5825_v2  ;;  %v2099_v2 = vmul.f32 0.125, %v5823_v0 }
 0x32f   :  { %4756 = vpow2.f32 %v2676_v49  ;;  %v2690_v48 = vmul.f32 1.442695, %v2602_v52  ;;  %v2674_v5 = vmul.f32 1.442695, %v2594_v47  ;;  %v6332_v0 = vrot.slane %v6317_v61, %v5630_v54 }
 0x330   :  { %v6263_v7 = vpop.permute.xlu0 %2412  ;;  %v6265_v51 = vpop.permute.xlu1 %2319  ;;  %4758 = vpow2.f32 %v2658_v13  ;;  %v2646_v55 = vmul.f32 1.442695, %v2580_v57  ;;  %v2253_v59 = vmul.f32 %v6268_v58, %v2100_v39  ;;  %v2106_v57 = vmul.f32 0.125, %v5827_v4 }
 0x331   :  { %4760 = vpow2.f32 %v2664_v50  ;;  %v2582_v62 = vsub.f32 %v2238_v1, %v6265_v51  ;;  %v2252_v50 = vmul.f32 %v6268_v58, %v2099_v2  ;;  %v2266_v63 = vmul.f32 %v6332_v0, %v2113_v25 }
 0x332   :  { %4762 = vpow2.f32 %v2646_v55 }
 0x333   :  { %4764 = vpow2.f32 %v2690_v48  ;;  %v2650_v51 = vmul.f32 1.442695, %v2582_v62  ;;  %v2259_v48 = vmul.f32 %v6290_v27, %v2106_v57 }
 0x334   :  { %v6274_v10 = vpop.permute.xlu0 %2354  ;;  %v6276_v32 = vpop.permute.xlu1 %2385  ;;  %4766 = vpow2.f32 %v2674_v5 }
 0x335   :  { %v2597_v13 = vsub.f32 %v2253_v59, %v6276_v32  ;;  %4768 = vpow2.f32 %v2650_v51  ;;  %v2107_v51 = vmul.f32 0.125, %v5837_v11 }
 0x336   :  { %v4751_v42 = vpop.eup %4750 }
 0x337   :  { %v2797_v49 = vsel %vm1324_vm1, %v4751_v42, 0.0  ;;  %v4753_v17 = vpop.eup %4752  ;;  %v2596_v42 = vsub.f32 %v2252_v50, %v6256_v43  ;;  %v2680_v4 = vmul.f32 1.442695, %v2597_v13  ;;  %v2101_v43 = vmul.f32 0.125, %v5839_v12 }
 0x338   :  { %v6285_v29 = vpop.permute.xlu0 %2416  ;;  %v6287_v34 = vpop.permute.xlu1 %2443  ;;  %v2800_v52 = vsel %vm1324_vm1, %v4753_v17, 0.0  ;;  %v2603_v17 = vsub.f32 %v2259_v48, %v6263_v7  ;;  %v2246_v13 = vmul.f32 %v6251_v45, %v2093_v9  ;;  %v2115_v7 = vmul.f32 0.125, %v5859_v22 }
 0x339   :  { %v4755_v6 = vpop.eup %4754  ;;  %v2610_v1 = vsub.f32 %v2266_v63, %v6287_v34  ;;  %v2678_v34 = vmul.f32 1.442695, %v2596_v42  ;;  %v2254_v57 = vmul.f32 %v6268_v58, %v2101_v43  ;;  %v2114_v22 = vmul.f32 0.125, %v5841_v14 }
 0x33a   :  { %v4757_v31 = vpop.eup %4756  ;;  %v2773_v55 = vsel %vm1324_vm1, %v4755_v6, 0.0  ;;  %v2260_v42 = vmul.f32 %v6290_v27, %v2107_v51  ;;  %v2094_v43 = vmul.f32 0.125, %v5847_v16 }
 0x33b   :  { %v4759_v47 = vpop.eup %4758  ;;  %v2821_v62 = vsel %vm1324_vm1, %v4757_v31, 0.0  ;;  %v2706_v59 = vmul.f32 1.442695, %v2610_v1 }
 0x33c   :  { %v6297_v46 = vpop.permute.xlu0 %2447  ;;  %v6299_v53 = vpop.permute.xlu1 %2358  ;;  %v2794_v12 = vsel %vm1324_vm1, %v4759_v47, 0.0  ;;  %v2604_v14 = vsub.f32 %v2260_v42, %v6285_v29 }
 0x33d   :  { %v4761_v2 = vpop.eup %4760 }
 0x340   :  { %2771 = vadd.xlane.f32.xlu1 %v2770_v23  ;;  %v6311_v3 = vpop.permute.xlu0 %2323  ;;  %v6313_v41 = vpop.permute.xlu1 %2420  ;;  %v2648_v23 = vmul.f32 1.442695, %v2581_v60 }
 0x341   :  { %v2583_v5 = vsub.f32 %v2239_v35, %v6311_v3  ;;  %v4763_v60 = vpop.eup %4762  ;;  %v2692_v3 = vmul.f32 1.442695, %v2603_v17  ;;  %v2267_v35 = vmul.f32 %v6332_v0, %v2114_v22  ;;  %v2095_v17 = vmul.f32 0.125, %v5867_v26 }
 0x342   :  { %4770 = vpow2.f32 %v2648_v23  ;;  %v4765_v6 = vpop.eup %4764  ;;  %v2776_v63 = vsel %vm1324_vm1, %v4763_v60, 0.0  ;;  %v2108_v26 = vmul.f32 0.125, %v5851_v18 }
 0x343   :  { %4772 = vpow2.f32 %v2680_v4  ;;  %v2652_v11 = vmul.f32 1.442695, %v2583_v5  ;;  %v4767_v23 = vpop.eup %4766 }
 0x344   :  { %2798 = vadd.xlane.f32.xlu1 %v2797_v49  ;;  %v6326_v37 = vpop.permute.xlu0 %2389  ;;  %v6328_v33 = vpop.permute.xlu1 %2478  ;;  %v2161_v49 = vcombine.high %v6302_v30, %v6302_v30  ;;  %v2803_v30 = vsel %vm1324_vm1, %v4761_v2, 0.0  ;;  %4774 = vpow2.f32 %v2678_v34  ;;  %v2818_v2 = vsel %vm1324_vm1, %v4767_v23, 0.0 }
 0x345   :  { %4776 = vpow2.f32 %v2706_v59  ;;  %v2598_v56 = vsub.f32 %v2254_v57, %v6326_v37  ;;  %v4769_v1 = vpop.eup %4768  ;;  %v2694_v59 = vmul.f32 1.442695, %v2604_v14  ;;  %v2248_v57 = vmul.f32 %v6251_v45, %v2095_v17 }
 0x346   :  { %v6367_v50 = vrot.slane %v2161_v49, %v6225_v38  ;;  %v2842_v38 = vsel %vm1324_vm1, %v4765_v6, 0.0  ;;  %4778 = vpow2.f32 %v2692_v3  ;;  %v2782_v49 = vsel %vm1324_vm1, %v4769_v1, 0.0 }
 0x347   :  { %4780 = vpow2.f32 %v2652_v11  ;;  %v2682_v48 = vmul.f32 1.442695, %v2598_v56  ;;  %v2121_v23 = vmul.f32 0.125, %v5853_v19 }
 0x348   :  { %2801 = vadd.xlane.f32.xlu1 %v2800_v52  ;;  %v6341_v39 = vpop.permute.xlu0 %2451  ;;  %v6343_v32 = vpop.permute.xlu1 %2327  ;;  %v2590_v52 = vsub.f32 %v2246_v13, %v6274_v10  ;;  %v2122_v10 = vmul.f32 0.125, %v5863_v24  ;;  %v6383_v37 = vrot.slane %v6367_v50, %v5630_v54 }
 0x349   :  { %2774 = vadd.xlane.f32.xlu0 %v2773_v55  ;;  %v2268_v55 = vmul.f32 %v6332_v0, %v2115_v7 }
 0x34a   :  { %v2666_v47 = vmul.f32 1.442695, %v2590_v52  ;;  %v2275_v29 = vmul.f32 %v6383_v37, %v2122_v10 }
 0x34c   :  { %2822 = vadd.xlane.f32.xlu1 %v2821_v62  ;;  %v6355_v25 = vpop.permute.xlu0 %2482  ;;  %v6357_v8 = vpop.permute.xlu1 %2393  ;;  %v2612_v62 = vsub.f32 %v2268_v55, %v6341_v39  ;;  %4782 = vpow2.f32 %v2666_v47  ;;  %v2611_v39 = vsub.f32 %v2267_v35, %v6297_v46  ;;  %v2109_v46 = vmul.f32 0.125, %v5871_v28 }
 0x34d   :  { %2795 = vadd.xlane.f32.xlu0 %v2794_v12  ;;  %v4771_v24 = vpop.eup %4770  ;;  %4784 = vpow2.f32 %v2682_v48  ;;  %v2619_v16 = vsub.f32 %v2275_v29, %v6355_v25  ;;  %v2261_v28 = vmul.f32 %v6290_v27, %v2108_v26 }
 0x34e   :  { %v4773_v34 = vpop.eup %4772  ;;  %v2710_v12 = vmul.f32 1.442695, %v2612_v62  ;;  %v2779_v51 = vsel %vm1324_vm1, %v4771_v24, 0.0  ;;  %4786 = vpow2.f32 %v2694_v59  ;;  %v2708_v25 = vmul.f32 1.442695, %v2611_v39 }
 0x34f   :  { %v4775_v13 = vpop.eup %4774  ;;  %v2827_v6 = vsel %vm1324_vm1, %v4773_v34, 0.0  ;;  %v2724_v52 = vmul.f32 1.442695, %v2619_v16  ;;  %v2262_v1 = vmul.f32 %v6290_v27, %v2109_v46  ;;  %v2605_v19 = vsub.f32 %v2261_v28, %v6313_v41 }
 0x350   :  { %2804 = vadd.xlane.f32.xlu1 %v2803_v30  ;;  %v6370_v31 = vpop.permute.xlu0 %2362  ;;  %v6376_v4 = vpop.permute.xlu1 %2455  ;;  %v2247_v30 = vmul.f32 %v6251_v45, %v2094_v43  ;;  %4788 = vpow2.f32 %v2710_v12  ;;  %v2824_v56 = vsel %vm1324_vm1, %v4775_v13, 0.0  ;;  %v2130_v43 = vmul.f32 0.125, %v5899_v15 }
 0x351   :  { %2777 = vadd.xlane.f32.xlu0 %v2776_v63  ;;  %v4777_v7 = vpop.eup %4776  ;;  %v2592_v11 = vsub.f32 %v2248_v57, %v6370_v31  ;;  %v2191_v31 = vcombine.high %v6317_v61, %v6317_v61  ;;  %4790 = vpow2.f32 %v2708_v25  ;;  %v2696_v35 = vmul.f32 1.442695, %v2605_v19  ;;  %v7114_v57 = vld [vmem:[#allocation13_spill] sm:$0xff] }
 0x352   :  { %v2591_v3 = vsub.f32 %v2247_v30, %v6299_v53  ;;  %v4779_v63 = vpop.eup %4778  ;;  %v2866_v42 = vsel %vm1324_vm1, %v4777_v7, 0.0  ;;  %v2123_v53 = vmul.f32 0.125, %v5888_v40  ;;  %4792 = vpow2.f32 %v2724_v52 }
 0x353   :  { %v2670_v55 = vmul.f32 1.442695, %v2592_v11  ;;  %v2845_v48 = vsel %vm1324_vm1, %v4779_v63, 0.0  ;;  %v2087_v40 = vmul.f32 0.125, %v5855_v20  ;;  %v2102_v39 = vmul.f32 0.125, %v5857_v21 }
 0x354   :  { %2843 = vadd.xlane.f32.xlu1 %v2842_v38  ;;  %v6386_v9 = vpop.permute.xlu0 %2424  ;;  %v6396_v5 = vpop.permute.xlu1 %2513  ;;  %v2668_v10 = vmul.f32 1.442695, %v2591_v3  ;;  %v2276_v41 = vmul.f32 %v6383_v37, %v2123_v53  ;;  %v2116_v25 = vmul.f32 0.125, %v7114_v57 }
 0x355   :  { %2819 = vadd.xlane.f32.xlu0 %v2818_v2  ;;  %v4781_v38 = vpop.eup %4780  ;;  %v2606_v47 = vsub.f32 %v2262_v1, %v6386_v9  ;;  %v2274_v2 = vmul.f32 %v6383_v37, %v2121_v23  ;;  %v6432_v9 = vrot.slane %v2191_v31, %v5630_v54  ;;  %v2240_v12 = vmul.f32 %v6243_v36, %v2087_v40  ;;  %v7116_v31 = vld [vmem:[#allocation14_spill] sm:$0xff] }
 0x356   :  { %v4783_v62 = vpop.eup %4782  ;;  %v2785_v61 = vsel %vm1324_vm1, %v4781_v38, 0.0  ;;  %4794 = vpow2.f32 %v2668_v10  ;;  %v2129_v10 = vmul.f32 0.125, %v7116_v31  ;;  %v2269_v19 = vmul.f32 %v6332_v0, %v2116_v25  ;;  %v7123_v31 = vld [vmem:[#allocation23_spill] sm:$0xff] }
 0x357   :  { %v4785_v24 = vpop.eup %4784  ;;  %4796 = vpow2.f32 %v2670_v55  ;;  %v2698_v20 = vmul.f32 1.442695, %v2606_v47  ;;  %v2806_v15 = vsel %vm1324_vm1, %v4783_v62, 0.0  ;;  %v2283_v13 = vmul.f32 %v6432_v9, %v2130_v43  ;;  %v7117_v47 = vld [vmem:[#allocation22_spill] sm:$0xff] }
 0x358   :  { %2783 = vadd.xlane.f32.xlu1 %v2782_v49  ;;  %v6399_v60 = vpop.permute.xlu0 %2486  ;;  %v2618_v49 = vsub.f32 %v2274_v2, %v6328_v33  ;;  %v4787_v59 = vpop.eup %4786  ;;  %v2830_v16 = vsel %vm1324_vm1, %v4785_v24, 0.0  ;;  %v2096_v33 = vmul.f32 0.125, %v5917_v44  ;;  %4798 = vpow2.f32 %v2696_v35 }
 0x359   :  { %2780 = vadd.xlane.f32.xlu0 %v2779_v51  ;;  %v2620_v17 = vsub.f32 %v2276_v41, %v6399_v60  ;;  %v2584_v26 = vsub.f32 %v2240_v12, %v6343_v32  ;;  %4800 = vpow2.f32 %v2698_v20  ;;  %v2848_v7 = vsel %vm1324_vm1, %v4787_v59, 0.0  ;;  %v7115_v32 = vld [vmem:[#allocation20_spill] sm:$0xff] }
 0x35a   :  { %v6414_v22 = vpop.permute.xlu1 %2366  ;;  %v4789_v51 = vpop.eup %4788  ;;  %v2722_v60 = vmul.f32 1.442695, %v2618_v49  ;;  %v2255_v44 = vmul.f32 %v6268_v58, %v2102_v39  ;;  %v2249_v63 = vmul.f32 %v6251_v45, %v2096_v33  ;;  %v2613_v40 = vsub.f32 %v2269_v19, %v6376_v4  ;;  %v7118_v49 = vld [vmem:[#allocation15_spill] sm:$0xff]  ;;  %v7119_v59 = vld [vmem:[#allocation24_spill] sm:$0xff] }
 0x35b   :  { %v2726_v30 = vmul.f32 1.442695, %v2620_v17  ;;  %v4791_v46 = vpop.eup %4790  ;;  %v2872_v52 = vsel %vm1324_vm1, %v4789_v51, 0.0  ;;  %v2088_v20 = vmul.f32 0.125, %v7118_v49  ;;  %v2282_v17 = vmul.f32 %v6432_v9, %v2129_v10 }
 0x35c   :  { %2828 = vadd.xlane.f32.xlu1 %v2827_v6  ;;  %v6409_v18 = vpop.permute.xlu0 %2517  ;;  %v4793_v11 = vpop.eup %4792  ;;  %4802 = vpow2.f32 %v2722_v60  ;;  %v2599_v23 = vsub.f32 %v2255_v44, %v6357_v8  ;;  %v2593_v28 = vsub.f32 %v2249_v63, %v6414_v22  ;;  %v2869_v53 = vsel %vm1324_vm1, %v4791_v46, 0.0  ;;  %v7121_v44 = vld [vmem:[#allocation21_spill] sm:$0xff] }
 0x35d   :  { %2825 = vadd.xlane.f32.xlu0 %v2824_v56  ;;  %v2627_v6 = vsub.f32 %v2283_v13, %v6409_v18  ;;  %v2110_v56 = vmul.f32 0.125, %v7115_v32  ;;  %v2654_v18 = vmul.f32 1.442695, %v2584_v26  ;;  %4804 = vpow2.f32 %v2726_v30  ;;  %v7120_v30 = vld [vmem:[#allocation16_spill] sm:$0xff] }
 0x35e   :  { %v6435_v34 = vpop.permute.xlu1 %2428  ;;  %v2893_v45 = vsel %vm1324_vm1, %v4793_v11, 0.0  ;;  %v2193_v22 = vcombine.high %v6367_v50, %v6367_v50  ;;  %v2684_v62 = vmul.f32 1.442695, %v2599_v23  ;;  %v2137_v4 = vmul.f32 0.125, %v7119_v59  ;;  %v7122_v23 = vld [vmem:[#allocation17_spill] sm:$0xff] }
 0x35f   :  { %v2263_v8 = vmul.f32 %v6290_v27, %v2110_v56  ;;  %4806 = vpow2.f32 %v2654_v18  ;;  %v2712_v12 = vmul.f32 1.442695, %v2613_v40  ;;  %v2118_v10 = vmul.f32 0.125, %v7123_v31  ;;  %v7124_v40 = vld [vmem:[#allocation18_spill] sm:$0xff] }
 0x360   :  { %2867 = vadd.xlane.f32.xlu1 %v2866_v42  ;;  %v6423_v14 = vpop.permute.xlu0 %2331  ;;  %v2740_v42 = vmul.f32 1.442695, %v2627_v6  ;;  %v4795_v1 = vpop.eup %4794  ;;  %v2103_v6 = vmul.f32 0.125, %v7120_v30 }
 0x361   :  { %2846 = vadd.xlane.f32.xlu0 %v2845_v48  ;;  %v4797_v55 = vpop.eup %4796  ;;  %v2124_v48 = vmul.f32 0.125, %v7117_v47  ;;  %v2607_v24 = vsub.f32 %v2263_v8, %v6435_v34  ;;  %v2809_v41 = vsel %vm1324_vm1, %v4795_v1, 0.0  ;;  %v6481_v34 = vrot.slane %v2193_v22, %v5630_v54 }
 0x362   :  { %v6453_v3 = vpop.permute.xlu1 %2490  ;;  %4808 = vpow2.f32 %v2740_v42  ;;  %v4799_v35 = vpop.eup %4798  ;;  %v2812_v50 = vsel %vm1324_vm1, %v4797_v55, 0.0  ;;  %v2256_v42 = vmul.f32 %v6268_v58, %v2103_v6 }
 0x363   :  { %v2277_v39 = vmul.f32 %v6383_v37, %v2124_v48  ;;  %4810 = vpow2.f32 %v2684_v62  ;;  %v2700_v51 = vmul.f32 1.442695, %v2607_v24  ;;  %v2851_v60 = vsel %vm1324_vm1, %v4799_v35, 0.0 }
 0x364   :  { %2786 = vadd.xlane.f32.xlu1 %v2785_v61  ;;  %v6438_v29 = vpop.permute.xlu0 %2397  ;;  %v2672_v61 = vmul.f32 1.442695, %v2593_v28  ;;  %v2117_v28 = vmul.f32 0.125, %v7122_v23 }
 0x365   :  { %2807 = vadd.xlane.f32.xlu0 %v2806_v15  ;;  %v4801_v15 = vpop.eup %4800  ;;  %v2621_v33 = vsub.f32 %v2277_v39, %v6453_v3  ;;  %v7126_v39 = vld [vmem:[#allocation19_spill] sm:$0xff] }
 0x366   :  { %v2549_v2 = vpop.permute.xlu1 %2548  ;;  %4812 = vpow2.f32 %v2672_v61  ;;  %v4803_v26 = vpop.eup %4802  ;;  %v2854_v57 = vsel %vm1324_vm1, %v4801_v15, 0.0  ;;  %v2270_v61 = vmul.f32 %v6332_v0, %v2117_v28 }
 0x367   :  { %v4805_v25 = vpop.eup %4804  ;;  %4814 = vpow2.f32 %v2712_v12  ;;  %v2728_v32 = vmul.f32 1.442695, %v2621_v33  ;;  %v2138_v12 = vmul.f32 0.125, %v7126_v39 }
 0x368   :  { %2831 = vadd.xlane.f32.xlu1 %v2830_v16  ;;  %v6448_v21 = vpop.permute.xlu0 %2459  ;;  %v2626_v16 = vsub.f32 %v2282_v17, %v6396_v5  ;;  %v2104_v5 = vmul.f32 0.125, %v7121_v44  ;;  %4816 = vpow2.f32 %v2700_v51 }
 0x369   :  { %2849 = vadd.xlane.f32.xlu0 %v2848_v7  ;;  %v2241_v7 = vmul.f32 %v6243_v36, %v2088_v20  ;;  %v2890_v36 = vsel %vm1324_vm1, %v4803_v26, 0.0  ;;  %v4807_v18 = vpop.eup %4806  ;;  %v2614_v20 = vsub.f32 %v2270_v61, %v6448_v21  ;;  %v7127_v26 = vld [vmem:[#allocation27_spill] sm:$0xff] }
 0x36a   :  { %v2402_v46 = vpop.permute.xlu1 %2401  ;;  %v2738_v3 = vmul.f32 1.442695, %v2626_v16  ;;  %v2788_v22 = vsel %vm1324_vm1, %v4807_v18, 0.0  ;;  %v2112_v30 = vmul.f32 0.125, %v7127_v26  ;;  %v7134_v26 = vld [vmem:[#allocation32_spill] sm:$0xff] }
 0x36b   :  { %v2585_v11 = vsub.f32 %v2241_v7, %v6423_v14  ;;  %v2257_v14 = vmul.f32 %v6268_v58, %v2104_v5  ;;  %v2714_v6 = vmul.f32 1.442695, %v2614_v20 }
 0x36c   :  { %2873 = vadd.xlane.f32.xlu1 %v2872_v52  ;;  %v6460_v38 = vpop.permute.xlu0 %2521  ;;  %v2290_v52 = vmul.f32 %v6481_v34, %v2137_v4  ;;  %v4809_v1 = vpop.eup %4808  ;;  %4818 = vpow2.f32 %v2738_v3  ;;  %v2265_v23 = vmul.f32 %v6290_v27, %v2112_v30  ;;  %v2119_v30 = vmul.f32 0.125, %v7134_v26 }
 0x36d   :  { %2870 = vadd.xlane.f32.xlu0 %v2869_v53  ;;  %v2896_v53 = vsel %vm1324_vm1, %v4805_v25, 0.0  ;;  %v2656_v19 = vmul.f32 1.442695, %v2585_v11  ;;  %4820 = vpow2.f32 %v2728_v32  ;;  %v2601_v48 = vsub.f32 %v2257_v14, %v2402_v46  ;;  %v4811_v62 = vpop.eup %4810 }
 0x36e   :  { %v2634_v56 = vsub.f32 %v2290_v52, %v2549_v2  ;;  %v2464_v55 = vpop.permute.xlu1 %2463  ;;  %v2131_v2 = vmul.f32 0.125, %v7124_v40  ;;  %v2917_v58 = vsel %vm1324_vm1, %v4809_v1, 0.0  ;;  %v2833_v59 = vsel %vm1324_vm1, %v4811_v62, 0.0  ;;  %v7128_v52 = vld [vmem:[#allocation26_spill] sm:$0xff] }
 0x36f   :  { %4822 = vpow2.f32 %v2656_v19  ;;  %v2688_v17 = vmul.f32 1.442695, %v2601_v48  ;;  %v2111_v3 = vmul.f32 0.125, %v7128_v52  ;;  %v2291_v11 = vmul.f32 %v6481_v34, %v2138_v12  ;;  %v7130_v19 = vld [vmem:[#allocation28_spill] sm:$0xff] }
 0x370   :  { %2894 = vadd.xlane.f32.xlu1 %v2893_v45  ;;  %v6472_v43 = vpop.permute.xlu0 %2552  ;;  %v2600_v45 = vsub.f32 %v2256_v42, %v6438_v29  ;;  %v2754_v47 = vmul.f32 1.442695, %v2634_v56  ;;  %v4813_v24 = vpop.eup %4812  ;;  %v2271_v29 = vmul.f32 %v6332_v0, %v2118_v10  ;;  %v2284_v16 = vmul.f32 %v6432_v9, %v2131_v2 }
 0x371   :  { %2810 = vadd.xlane.f32.xlu0 %v2809_v41  ;;  %v7125_v41 = vld [vmem:[#allocation25_spill] sm:$0xff]  ;;  %v4815_v4 = vpop.eup %4814  ;;  %v2815_v33 = vsel %vm1324_vm1, %v4813_v24, 0.0  ;;  %v2635_v28 = vsub.f32 %v2291_v11, %v6472_v43 }
 0x372   :  { %v2132_v35 = vmul.f32 0.125, %v7125_v41  ;;  %v2686_v49 = vmul.f32 1.442695, %v2600_v45  ;;  %4824 = vpow2.f32 %v2754_v47  ;;  %v2526_v51 = vpop.permute.xlu1 %2525  ;;  %v2628_v7 = vsub.f32 %v2284_v16, %v6460_v38 }
 0x373   :  { %v2875_v44 = vsel %vm1324_vm1, %v4815_v4, 0.0  ;;  %v2125_v45 = vmul.f32 0.125, %v7130_v19  ;;  %v2756_v40 = vmul.f32 1.442695, %v2635_v28 }
 0x374   :  { %2813 = vadd.xlane.f32.xlu1 %v2812_v50  ;;  %v6485_v13 = vpop.permute.xlu0 %2432  ;;  %v2615_v50 = vsub.f32 %v2271_v29, %v2464_v55  ;;  %v2285_v21 = vmul.f32 %v6432_v9, %v2132_v35  ;;  %4826 = vpow2.f32 %v2686_v49  ;;  %v2742_v38 = vmul.f32 1.442695, %v2628_v7  ;;  %v7132_v35 = vld [vmem:[#allocation30_spill] sm:$0xff] }
 0x375   :  { %2852 = vadd.xlane.f32.xlu0 %v2851_v60  ;;  %v4817_v60 = vpop.eup %4816  ;;  %4828 = vpow2.f32 %v2688_v17  ;;  %v2264_v55 = vmul.f32 %v6290_v27, %v2111_v3  ;;  %v2139_v29 = vmul.f32 0.125, %v7132_v35  ;;  %v2278_v49 = vmul.f32 %v6383_v37, %v2125_v45 }
 0x376   :  { %v2716_v46 = vmul.f32 1.442695, %v2615_v50  ;;  %v4819_v5 = vpop.eup %4818  ;;  %v2857_v32 = vsel %vm1324_vm1, %v4817_v60, 0.0  ;;  %4830 = vpow2.f32 %v2714_v6  ;;  %v7133_v50 = vld [vmem:[#allocation36_spill] sm:$0xff] }
 0x377   :  { %v4821_v56 = vpop.eup %4820  ;;  %v2914_v10 = vsel %vm1324_vm1, %v4819_v5, 0.0  ;;  %v2608_v2 = vsub.f32 %v2264_v55, %v6485_v13 }
 0x378   :  { %2855 = vadd.xlane.f32.xlu1 %v2854_v57  ;;  %v6494_v63 = vpop.permute.xlu0 %2494  ;;  %v2629_v57 = vsub.f32 %v2285_v21, %v2526_v51  ;;  %4832 = vpow2.f32 %v2716_v46  ;;  %v2899_v47 = vsel %vm1324_vm1, %v4821_v56, 0.0  ;;  %v2292_v21 = vmul.f32 %v6481_v34, %v2139_v29  ;;  %v7135_v46 = vld [vmem:[#allocation38_spill] sm:$0xff] }
 0x379   :  { %2891 = vadd.xlane.f32.xlu0 %v2890_v36  ;;  %v7129_v36 = vld [vmem:[#allocation29_spill] sm:$0xff]  ;;  %v4823_v14 = vpop.eup %4822  ;;  %4834 = vpow2.f32 %v2742_v38  ;;  %v2702_v4 = vmul.f32 1.442695, %v2608_v2  ;;  %v2622_v39 = vsub.f32 %v2278_v49, %v6494_v63  ;;  %v7136_v56 = vld [vmem:[#allocation34_spill] sm:$0xff] }
 0x37a   :  { %v2126_v18 = vmul.f32 0.125, %v7129_v36  ;;  %v2744_v42 = vmul.f32 1.442695, %v2629_v57  ;;  %v2791_v41 = vsel %vm1324_vm1, %v4823_v14, 0.0  ;;  %v2141_v57 = vmul.f32 0.125, %v7135_v46 }
 0x37b   :  { %v2730_v63 = vmul.f32 1.442695, %v2622_v39  ;;  %v2133_v36 = vmul.f32 0.125, %v7136_v56 }
 0x37c   :  { %2897 = vadd.xlane.f32.xlu1 %v2896_v53  ;;  %v6503_v8 = vpop.permute.xlu0 %2556  ;;  %v6526_v53 = vpop.permute.xlu1 %2467  ;;  %v2279_v43 = vmul.f32 %v6383_v37, %v2126_v18  ;;  %4836 = vpow2.f32 %v2744_v42  ;;  %v2272_v18 = vmul.f32 %v6332_v0, %v2119_v30  ;;  %v7137_v42 = vld [vmem:[#allocation40_spill] sm:$0xff]  ;;  %v7142_v30 = vld [vmem:[#allocation37_spill] sm:$0xff] }
 0x37d   :  { %2789 = vadd.xlane.f32.xlu0 %v2788_v22  ;;  %v4825_v48 = vpop.eup %4824  ;;  %v7131_v22 = vld [vmem:[#allocation31_spill] sm:$0xff]  ;;  %4838 = vpow2.f32 %v2756_v40  ;;  %v7139_v40 = vld [vmem:[#allocation41_spill] sm:$0xff] }
 0x37e   :  { %v2140_v62 = vmul.f32 0.125, %v7131_v22  ;;  %v4827_v27 = vpop.eup %4826  ;;  %v2938_v20 = vsel %vm1324_vm1, %v4825_v48, 0.0  ;;  %v2286_v22 = vmul.f32 %v6432_v9, %v2133_v36  ;;  %v2136_v2 = vmul.f32 0.125, %v7139_v40 }
 0x37f   :  { %v4829_v17 = vpop.eup %4828 }
 0x380   :  { %2918 = vadd.xlane.f32.xlu1 %v2917_v58  ;;  %v2437_v15 = vpop.permute.xlu0 %2436  ;;  %v2293_v13 = vmul.f32 %v6481_v34, %v2140_v62  ;;  %v4831_v60 = vpop.eup %4830  ;;  %v2839_v6 = vsel %vm1324_vm1, %v4829_v17, 0.0 }
 0x381   :  { %2834 = vadd.xlane.f32.xlu0 %v2833_v59  ;;  %v2609_v1 = vsub.f32 %v2265_v23, %v2437_v15  ;;  %v2127_v15 = vmul.f32 0.125, %v7133_v50  ;;  %v6540_v59 = vpop.permute.xlu1 %2529  ;;  %v2878_v11 = vsel %vm1324_vm1, %v4831_v60, 0.0 }
 0x382   :  { %v4833_v7 = vpop.eup %4832 }
 0x383   :  { %v2704_v61 = vmul.f32 1.442695, %v2609_v1  ;;  %v2881_v38 = vsel %vm1324_vm1, %v4833_v7, 0.0  ;;  %v2135_v1 = vmul.f32 0.125, %v7137_v42 }
 0x384   :  { %2816 = vadd.xlane.f32.xlu1 %v2815_v33  ;;  %v2499_v25 = vpop.permute.xlu0 %2498  ;;  %v2836_v33 = vsel %vm1324_vm1, %v4827_v27, 0.0 }
 0x385   :  { %2876 = vadd.xlane.f32.xlu0 %v2875_v44  ;;  %v2623_v58 = vsub.f32 %v2279_v43, %v2499_v25  ;;  %4840 = vpow2.f32 %v2704_v61  ;;  %v2280_v25 = vmul.f32 %v6383_v37, %v2127_v15  ;;  %v2636_v44 = vsub.f32 %v2292_v21, %v6503_v8  ;;  %v6551_v5 = vpop.permute.xlu1 %2471 }
 0x386   :  { %4842 = vpow2.f32 %v2702_v4  ;;  %v2294_v8 = vmul.f32 %v6481_v34, %v2141_v57  ;;  %v7141_v4 = vld [vmem:[#allocation43_spill] sm:$0xff]  ;;  %v2128_v21 = vmul.f32 0.125, %v7142_v30 }
 0x387   :  { %v2732_v12 = vmul.f32 1.442695, %v2623_v58  ;;  %v2144_v39 = vmul.f32 0.125, %v7141_v4 }
 0x388   :  { %2858 = vadd.xlane.f32.xlu1 %v2857_v32  ;;  %v2561_v31 = vpop.permute.xlu0 %2560  ;;  %v4835_v32 = vpop.eup %4834 }
 0x389   :  { %2915 = vadd.xlane.f32.xlu0 %v2914_v10  ;;  %v2637_v16 = vsub.f32 %v2293_v13, %v2561_v31  ;;  %4844 = vpow2.f32 %v2732_v12  ;;  %v4837_v28 = vpop.eup %4836  ;;  %v2616_v31 = vsub.f32 %v2272_v18, %v6526_v53  ;;  %v2758_v10 = vmul.f32 1.442695, %v2636_v44  ;;  %v2534_v61 = vpop.permute.xlu1 %2533 }
 0x38a   :  { %4846 = vpow2.f32 %v2730_v63  ;;  %v2920_v45 = vsel %vm1324_vm1, %v4835_v32, 0.0  ;;  %v4839_v55 = vpop.eup %4838  ;;  %v2923_v62 = vsel %vm1324_vm1, %v4837_v28, 0.0  ;;  %v2288_v53 = vmul.f32 %v6432_v9, %v2135_v1  ;;  %v7143_v32 = vld [vmem:[#allocation39_spill] sm:$0xff] }
 0x38b   :  { %v2760_v52 = vmul.f32 1.442695, %v2637_v16  ;;  %v2718_v58 = vmul.f32 1.442695, %v2616_v31  ;;  %v2941_v29 = vsel %vm1324_vm1, %v4839_v55, 0.0  ;;  %v2142_v56 = vmul.f32 0.125, %v7143_v32 }
 0x38c   :  { %2900 = vadd.xlane.f32.xlu1 %v2899_v47  ;;  %v2503_v24 = vpop.permute.xlu0 %2502  ;;  %v7138_v47 = vld [vmem:[#allocation33_spill] sm:$0xff]  ;;  %v7144_v31 = vld [vmem:[#allocation42_spill] sm:$0xff]  ;;  %v92_v32 = vld [vmem:[%s7051_s6 + $0x198] sm:$0xff] }
 0x38d   :  { %2792 = vadd.xlane.f32.xlu0 %v2791_v41  ;;  %v2624_v3 = vsub.f32 %v2280_v25, %v2503_v24  ;;  %4848 = vpow2.f32 %v2760_v52  ;;  %v2120_v48 = vmul.f32 0.125, %v7138_v47  ;;  %v2630_v24 = vsub.f32 %v2286_v22, %v6540_v59 }
 0x38e   :  { %4850 = vpow2.f32 %v2758_v10  ;;  %v2289_v59 = vmul.f32 %v6432_v9, %v2136_v2  ;;  %v2297_v25 = vmul.f32 %v6481_v34, %v2144_v39  ;;  %v2143_v10 = vmul.f32 0.125, %v7144_v31 }
 0x38f   :  { %v2734_v14 = vmul.f32 1.442695, %v2624_v3  ;;  %v4841_v43 = vpop.eup %4840  ;;  %v2273_v50 = vmul.f32 %v6332_v0, %v2120_v48  ;;  %v2746_v12 = vmul.f32 1.442695, %v2630_v24 }
 0x390   :  { %2939 = vadd.xlane.f32.xlu1 %v2938_v20  ;;  %v2565_v51 = vpop.permute.xlu0 %2564  ;;  %v4843_v49 = vpop.eup %4842  ;;  %v7140_v20 = vld [vmem:[#allocation35_spill] sm:$0xff]  ;;  %v2863_v15 = vsel %vm1324_vm1, %v4841_v43, 0.0 }
 0x391   :  { %2837 = vadd.xlane.f32.xlu0 %v2836_v33  ;;  %v2638_v19 = vsub.f32 %v2294_v8, %v2565_v51  ;;  %4852 = vpow2.f32 %v2734_v14  ;;  %v2134_v17 = vmul.f32 0.125, %v7140_v20  ;;  %v2617_v16 = vsub.f32 %v2273_v50, %v6551_v5  ;;  %v2507_v51 = vpop.permute.xlu1 %2506 }
 0x392   :  { %4854 = vpow2.f32 %v2718_v58  ;;  %v2860_v26 = vsel %vm1324_vm1, %v4843_v49, 0.0  ;;  %v2295_v14 = vmul.f32 %v6481_v34, %v2142_v56 }
 0x393   :  { %v2762_v27 = vmul.f32 1.442695, %v2638_v19  ;;  %v4845_v13 = vpop.eup %4844  ;;  %v2720_v63 = vmul.f32 1.442695, %v2617_v16 }
 0x394   :  { %2840 = vadd.xlane.f32.xlu1 %v2839_v6  ;;  %v2538_v23 = vpop.permute.xlu0 %2537  ;;  %v4847_v0 = vpop.eup %4846  ;;  %v2287_v6 = vmul.f32 %v6432_v9, %v2134_v17  ;;  %v2905_v46 = vsel %vm1324_vm1, %v4845_v13, 0.0  ;;  %v2281_v9 = vmul.f32 %v6383_v37, %v2128_v21 }
 0x395   :  { %2879 = vadd.xlane.f32.xlu0 %v2878_v11  ;;  %v2632_v35 = vsub.f32 %v2288_v53, %v2538_v23  ;;  %4856 = vpow2.f32 %v2762_v27  ;;  %v2902_v3 = vsel %vm1324_vm1, %v4847_v0, 0.0  ;;  %v2569_v23 = vpop.permute.xlu1 %2568 }
 0x396   :  { %4858 = vpow2.f32 %v2746_v12  ;;  %v2631_v44 = vsub.f32 %v2287_v6, %v2534_v61  ;;  %v2625_v28 = vsub.f32 %v2281_v9, %v2507_v51  ;;  %v2639_v55 = vsub.f32 %v2295_v14, %v2569_v23 }
 0x397   :  { %v2750_v33 = vmul.f32 1.442695, %v2632_v35  ;;  %v4849_v57 = vpop.eup %4848  ;;  %v6596_v35 = vld [vmem:[%s7052_s7] sm:$0xff] }
 0x398   :  { %2882 = vadd.xlane.f32.xlu1 %v2881_v38  ;;  %v2542_v41 = vpop.permute.xlu0 %2541  ;;  %v4851_v11 = vpop.eup %4850  ;;  %v2947_v36 = vsel %vm1324_vm1, %v4849_v57, 0.0  ;;  %v2748_v38 = vmul.f32 1.442695, %v2631_v44  ;;  %v2764_v2 = vmul.f32 1.442695, %v2639_v55 }
 0x399   :  { %2921 = vadd.xlane.f32.xlu0 %v2920_v45  ;;  %v2633_v60 = vsub.f32 %v2289_v59, %v2542_v41  ;;  %4860 = vpow2.f32 %v2750_v33  ;;  %v2944_v1 = vsel %vm1324_vm1, %v4851_v11, 0.0  ;;  %v2736_v45 = vmul.f32 1.442695, %v2625_v28  ;;  %v2573_v47 = vpop.permute.xlu1 %2572  ;;  %v91_v11 = vld [vmem:[%s7051_s6 + $0x190] sm:$0xff] }
 0x39a   :  { %4862 = vpow2.f32 %v2720_v63  ;;  %v90_v63 = vld [vmem:[%s7051_s6 + $0x188] sm:$0xff] }
 0x39b   :  { %v2752_v5 = vmul.f32 1.442695, %v2633_v60  ;;  %v4853_v18 = vpop.eup %4852 }
 0x39c   :  { %2924 = vadd.xlane.f32.xlu1 %v2923_v62  ;;  %v2577_v7 = vpop.permute.xlu0 %2576  ;;  %v4855_v8 = vpop.eup %4854  ;;  %v2908_v37 = vsel %vm1324_vm1, %v4853_v18, 0.0  ;;  %v2296_v62 = vmul.f32 %v6481_v34, %v2143_v10  ;;  %v4426_v18 = vpack.c.bf16 %v92_v32, %v91_v11 }
 0x39d   :  { %2942 = vadd.xlane.f32.xlu0 %v2941_v29  ;;  %v2641_v52 = vsub.f32 %v2297_v25, %v2577_v7  ;;  %4864 = vpow2.f32 %v2752_v5  ;;  %v2884_v48 = vsel %vm1324_vm1, %v4855_v8, 0.0  ;;  %v7145_v29 = vld [vmem:[#allocation10_spill] sm:$0xff]  ;;  %v89_v25 = vld [vmem:[%s7051_s6 + $0x180] sm:$0xff]  ;;  %v7147_v8 = vlaneseq }
 0x39e   :  { %4866 = vpow2.f32 %v2748_v38  ;;  %v2640_v61 = vsub.f32 %v2296_v62, %v2573_v47  ;;  %v1490_v49 = vrot.slane %v6596_v35, %v7145_v29  ;;  %v4423_v5 = vpack.c.bf16 %v90_v63, %v89_v25  ;;  %v40_v38 = vld [vmem:[%s7047_s2] sm:$0xff] }
 0x39f   :  { %v2768_v42 = vmul.f32 1.442695, %v2641_v52  ;;  %v4857_v19 = vpop.eup %4856  ;;  %v6629_v31 = vand.u32 127, %v7147_v8 }
 0x3a0   :  { %2864 = vadd.xlane.f32.xlu1 %v2863_v15  ;;  %v4859_v22 = vpop.eup %4858  ;;  %v2950_v43 = vsel %vm1324_vm1, %v4857_v19, 0.0  ;;  %v2766_v27 = vmul.f32 1.442695, %v2640_v61  ;;  %4424 = vmatpush3.bf16.msra.mxu1 %v4423_v5  ;;  %v94_v19 = vld [vmem:[%s7051_s6 + $0x1a8] sm:$0xff] }
 0x3a1   :  { %2861 = vadd.xlane.f32.xlu0 %v2860_v26  ;;  %4868 = vpow2.f32 %v2768_v42  ;;  %v2926_v53 = vsel %vm1324_vm1, %v4859_v22, 0.0  ;;  %v3100_v47 = vadd.s32 4294967288, %v6629_v31  ;;  %v7148_v22 = vld [vmem:[#allocation5_spill] sm:$0xff]  ;;  %v3121_v11 = vadd.s32 4294967264, %v6629_v31 }
 0x3a2   :  { %4870 = vpow2.f32 %v2736_v45  ;;  %v6644_v62 = vsub.s32 %v6629_v31, %v7148_v22 }
 0x3a3   :  { %v4861_v40 = vpop.eup %4860  ;;  %4872 = vpow2.f32 %v2764_v2  ;;  %v96_v2 = vld [vmem:[%s7051_s6 + $0x1b8] sm:$0xff] }
 0x3a4   :  { %2906 = vadd.xlane.f32.xlu1 %v2905_v46  ;;  %v4863_v58 = vpop.eup %4862  ;;  %v2932_v24 = vsel %vm1324_vm1, %v4861_v40, 0.0  ;;  %4874 = vpow2.f32 %v2766_v27  ;;  %v95_v40 = vld [vmem:[%s7051_s6 + $0x1b0] sm:$0xff]  ;;  %v6660_v27 = vsub.s32 %v3100_v47, %v7148_v22 }
 0x3a5   :  { %2903 = vadd.xlane.f32.xlu0 %v2902_v3  ;;  %v2887_v34 = vsel %vm1324_vm1, %v4863_v58, 0.0  ;;  %v7146_v3 = vmov 0.0|0.0   ;;  %v3114_v58 = vadd.s32 4294967272, %v6629_v31 }
 0x3a6   :  { %4425 = vmatprep.subr.bf16.mxu1 %v7146_v3 }
 0x3a7   :  { %v4865_v41 = vpop.eup %4864  ;;  %4427 = vmatpush3.bf16.msra.mxu1 %v4426_v18 }
 0x3a8   :  { %2948 = vadd.xlane.f32.xlu1 %v2947_v36  ;;  %v4867_v20 = vpop.eup %4866  ;;  %v2935_v17 = vsel %vm1324_vm1, %v4865_v41, 0.0  ;;  %4428 = vmatprep.subr.bf16.mxu1 %v7146_v3  ;;  %v4432_v41 = vpack.c.bf16 %v96_v2, %v95_v40 }
 0x3a9   :  { %2945 = vadd.xlane.f32.xlu0 %v2944_v1  ;;  %v2929_v39 = vsel %vm1324_vm1, %v4867_v20, 0.0 }
 0x3ab   :  { %v4869_v50 = vpop.eup %4868 }
 0x3ac   :  { %2909 = vadd.xlane.f32.xlu1 %v2908_v37  ;;  %v4871_v59 = vpop.eup %4870  ;;  %v2959_v12 = vsel %vm1324_vm1, %v4869_v50, 0.0  ;;  %v93_v37 = vld [vmem:[%s7051_s6 + $0x1a0] sm:$0xff] }
 0x3ad   :  { %2885 = vadd.xlane.f32.xlu0 %v2884_v48  ;;  %v2911_v51 = vsel %vm1324_vm1, %v4871_v59, 0.0  ;;  %v4873_v60 = vpop.eup %4872  ;;  %v4429_v55 = vpack.c.bf16 %v94_v19, %v93_v37 }
 0x3ae   :  { %v2953_v0 = vsel %vm1324_vm1, %v4873_v60, 0.0  ;;  %v4875_v30 = vpop.eup %4874 }
 0x3af   :  { %v2956_v21 = vsel %vm1324_vm1, %v4875_v30, 0.0  ;;  %4430 = vmatpush3.bf16.msra.mxu1 %v4429_v55 }
 0x3b0   :  { %2951 = vadd.xlane.f32.xlu1 %v2950_v43  ;;  %4431 = vmatprep.subr.bf16.mxu1 %v7146_v3 }
 0x3b1   :  { %2927 = vadd.xlane.f32.xlu0 %v2926_v53  ;;  %v3107_v53 = vadd.s32 4294967280, %v6629_v31 }
 0x3b3   :  { %4433 = vmatpush3.bf16.msra.mxu1 %v4432_v41 }
 0x3b4   :  { %2933 = vadd.xlane.f32.xlu1 %v2932_v24  ;;  %4434 = vmatprep.subr.bf16.mxu1 %v7146_v3 }
 0x3b5   :  { %2888 = vadd.xlane.f32.xlu0 %v2887_v34 }
 0x3b8   :  { %2936 = vadd.xlane.f32.xlu1 %v2935_v17 }
 0x3b9   :  { %v1483_v15 = vpop.f32.mrb[6].mxu0  ;;  %2930 = vadd.xlane.f32.xlu0 %v2929_v39 }
 0x3ba   :  { %v6601_v13 = vadd.f32 %v1490_v49, %v1483_v15  ;;  %v4257_v4 = vpop.f32.mrb[7].mxu0  ;;  %v6668_v15 = vsub.s32 %v3107_v53, %v7148_v22 }
 0x3bb   :  { %v6671_v4 = vsub.s32 %v3114_v58, %v7148_v22 }
 0x3bc   :  { %2960 = vadd.xlane.f32.xlu1 %v2959_v12  ;;  %v1493_v16 = vand.u32 2147483647, %v6601_v13  ;;  %v1492_v28 = vmax.f32 %v6601_v13, 0.0 }
 0x3bd   :  { %2912 = vadd.xlane.f32.xlu0 %v2911_v51 }
 0x3be   :  { %v1494_v33 = vsub.f32 0.0, %v1493_v16 }
 0x3c0   :  { %v1495_v26 = vmul.f32 1.442695, %v1494_v33 }
 0x3c1   :  { %2954 = vadd.xlane.f32.xlu0 %v2953_v0 }
 0x3c2   :  { %4876 = vpow2.f32 %v1495_v26 }
 0x3c5   :  { %2957 = vadd.xlane.f32.xlu0 %v2956_v21 }
 0x3cc   :  { %v4877_v6 = vpop.eup %4876 }
 0x3cd   :  { %v2772_v7 = vpop.xlane.xlu1 %2771  ;;  %v1497_v46 = vadd.f32 1.0, %v4877_v6 }
 0x3cf   :  { %4878 = vlog2.f32 %v1497_v46 }
 0x3d0   :  { %4880 = vrcp.f32 %v2772_v7 }
 0x3d1   :  { %v2799_v57 = vpop.xlane.xlu1 %2798 }
 0x3d5   :  { %v2802_v44 = vpop.xlane.xlu1 %2801 }
 0x3d6   :  { %v2775_v52 = vpop.xlane.xlu0 %2774 }
 0x3d7   :  { %4882 = vrcp.f32 %v2775_v52 }
 0x3d8   :  { %4884 = vrcp.f32 %v2799_v57 }
 0x3d9   :  { %v4879_v56 = vpop.eup %4878  ;;  %v2823_v9 = vpop.xlane.xlu1 %2822  ;;  %4886 = vrcp.f32 %v2802_v44 }
 0x3da   :  { %v4145_v36 = vpop.f32.mrb[8].mxu0  ;;  %v1499_v42 = vmul.f32 0.6931472, %v4879_v56  ;;  %v2796_v10 = vpop.xlane.xlu0 %2795 }
 0x3db   :  { %v4146_v23 = vpop.f32.mrb[9].mxu0  ;;  %4888 = vrcp.f32 %v2796_v10  ;;  %1512 = vrot.lane.b32.xlu0 %v40_v38, %s5064_s19  ;;  %v4881_v61 = vpop.eup %4880 }
 0x3dc   :  { %v6626_v1 = vadd.f32 %v4146_v23, %v4145_v36  ;;  %v1500_v14 = vadd.f32 %v1499_v42, %v1492_v28  ;;  %v3099_v49 = vrot.slane %v4881_v61, %v6644_v62 }
 0x3dd   :  { %v2805_v45 = vpop.xlane.xlu1 %2804 }
 0x3de   :  { %4890 = vrcp.f32 %v2805_v45  ;;  %v6640_v48 = vadd.f32 1e-07, %v1500_v14  ;;  %v2778_v43 = vpop.xlane.xlu0 %2777  ;;  %v3128_v45 = vadd.s32 4294967256, %v6629_v31 }
 0x3df   :  { %1503 = vrot.lane.b32.xlu0 %v40_v38, %s5066_s25  ;;  %v6695_v38 = vsub.s32 %v3121_v11, %v7148_v22 }
 0x3e0   :  { %1523 = vrot.lane.b32.xlu1 %v6640_v48, %s5065_s20  ;;  %4892 = vlog2.f32 %v6640_v48  ;;  %v6706_v41 = vsub.s32 %v3128_v45, %v7148_v22 }
 0x3e1   :  { %4894 = vrcp.f32 %v2778_v43  ;;  %v2844_v24 = vpop.xlane.xlu1 %2843  ;;  %v4883_v34 = vpop.eup %4882 }
 0x3e2   :  { %4896 = vrcp.f32 %v2823_v9  ;;  %v3104_v20 = vrot.slane %v4883_v34, %v6660_v27  ;;  %v2820_v17 = vpop.xlane.xlu0 %2819  ;;  %v4885_v50 = vpop.eup %4884 }
 0x3e3   :  { %4898 = vrcp.f32 %v2820_v17  ;;  %1576 = vrot.lane.b32.xlu0 %v6601_v13, %s5064_s19  ;;  %v4887_v59 = vpop.eup %4886  ;;  %v3156_v33 = vrot.slane %v4885_v50, %v6660_v27 }
 0x3e4   :  { %1580 = vrot.lane.b32.xlu1 %v6640_v48, %s5066_s25  ;;  %v3106_v12 = vsel %vm3105_vm3, %v3104_v20, %v3099_v49  ;;  %v3161_v0 = vrot.slane %v4887_v59, %v6668_v15 }
 0x3e5   :  { %v2784_v39 = vpop.xlane.xlu1 %2783  ;;  %v4889_v16 = vpop.eup %4888 }
 0x3e6   :  { %v3152_v60 = vrot.slane %v4889_v16, %v6644_v62  ;;  %4900 = vrcp.f32 %v2784_v39  ;;  %v2781_v26 = vpop.xlane.xlu0 %2780 }
 0x3e7   :  { %4902 = vrcp.f32 %v2781_v26 }
 0x3e8   :  { %v4891_v51 = vpop.eup %4890  ;;  %v3157_v7 = vsel %vm3105_vm3, %v3156_v33, %v3152_v60 }
 0x3e9   :  { %v3166_v30 = vrot.slane %v4891_v51, %v6671_v4  ;;  %v2829_v21 = vpop.xlane.xlu1 %2828  ;;  %v3162_v57 = vsel %vm3112_vm4, %v3161_v0, %v3157_v7 }
 0x3ea   :  { %v4893_v6 = vpop.eup %4892  ;;  %4904 = vrcp.f32 %v2829_v21  ;;  %v2826_v5 = vpop.xlane.xlu0 %2825 }
 0x3eb   :  { %v4895_v46 = vpop.eup %4894  ;;  %v6682_v25 = vmul.f32 0.6931472, %v4893_v6  ;;  %v6685_v63 = vsel %vm3119_vm5, %v3166_v30, %v3162_v57  ;;  %4906 = vrcp.f32 %v2826_v5 }
 0x3ec   :  { %v3111_v44 = vrot.slane %v4895_v46, %v6668_v15  ;;  %v4897_v52 = vpop.eup %4896  ;;  %4908 = vrcp.f32 %v2844_v24 }
 0x3ed   :  { %v2868_v32 = vpop.xlane.xlu1 %2867  ;;  %1587 = vrot.lane.b32.xlu0 %v6682_v25, %s5066_s25  ;;  %v4899_v9 = vpop.eup %4898  ;;  %v3195_v36 = vrot.slane %v4897_v52, %v6660_v27 }
 0x3ee   :  { %v3113_v56 = vsel %vm3112_vm4, %v3111_v44, %v3106_v12  ;;  %v3191_v18 = vrot.slane %v4899_v9, %v6644_v62  ;;  %v2847_v23 = vpop.xlane.xlu0 %2846 }
 0x3ef   :  { %4910 = vrcp.f32 %v2847_v23 }
 0x3f0   :  { %v4901_v42 = vpop.eup %4900  ;;  %v3196_v8 = vsel %vm3105_vm3, %v3195_v36, %v3191_v18 }
 0x3f1   :  { %v2787_v28 = vpop.xlane.xlu1 %2786  ;;  %v4903_v10 = vpop.eup %4902  ;;  %v3125_v19 = vrot.slane %v4901_v42, %v6695_v38 }
 0x3f2   :  { %4912 = vrcp.f32 %v2787_v28  ;;  %v3118_v14 = vrot.slane %v4903_v10, %v6671_v4  ;;  %v2808_v37 = vpop.xlane.xlu0 %2807 }
 0x3f3   :  { %4914 = vrcp.f32 %v2808_v37 }
 0x3f4   :  { %v4905_v47 = vpop.eup %4904  ;;  %v3120_v43 = vsel %vm3119_vm5, %v3118_v14, %v3113_v56 }
 0x3f5   :  { %v2832_v55 = vpop.xlane.xlu1 %2831  ;;  %v4907_v40 = vpop.eup %4906  ;;  %v3127_v2 = vsel %vm3126_vm6, %v3125_v19, %v3120_v43  ;;  %v3205_v24 = vrot.slane %v4905_v47, %v6671_v4 }
 0x3f6   :  { %4916 = vrcp.f32 %v2832_v55  ;;  %v3200_v61 = vrot.slane %v4907_v40, %v6668_v15  ;;  %v2850_v53 = vpop.xlane.xlu0 %2849  ;;  %v4909_v58 = vpop.eup %4908 }
 0x3f7   :  { %4918 = vrcp.f32 %v2850_v53  ;;  %v3230_v39 = vrot.slane %v4909_v58, %v6644_v62 }
 0x3f8   :  { %v3201_v49 = vsel %vm3112_vm4, %v3200_v61, %v3196_v8  ;;  %4920 = vrcp.f32 %v2868_v32  ;;  %v3135_v32 = vadd.s32 4294967248, %v6629_v31 }
 0x3f9   :  { %v2874_v34 = vpop.xlane.xlu1 %2873  ;;  %v4911_v20 = vpop.eup %4910  ;;  %v3206_v17 = vsel %vm3119_vm5, %v3205_v24, %v3201_v49 }
 0x3fa   :  { %v3234_v59 = vrot.slane %v4911_v20, %v6660_v27  ;;  %4922 = vrcp.f32 %v2874_v34  ;;  %v2871_v12 = vpop.xlane.xlu0 %2870  ;;  %v6731_v8 = vsub.s32 %v3135_v32, %v7148_v22 }
 0x3fb   :  { %4924 = vrcp.f32 %v2871_v12 }
 0x3fc   :  { %v4913_v50 = vpop.eup %4912  ;;  %v3235_v33 = vsel %vm3105_vm3, %v3234_v59, %v3230_v39 }
 0x3fd   :  { %v3132_v16 = vrot.slane %v4913_v50, %v6706_v41  ;;  %v2895_v51 = vpop.xlane.xlu1 %2894  ;;  %v4915_v60 = vpop.eup %4914 }
 0x3fe   :  { %v3171_v30 = vrot.slane %v4915_v60, %v6695_v38  ;;  %v2811_v21 = vpop.xlane.xlu0 %2810 }
 0x3ff   :  { %v3134_v26 = vsel %vm3133_vm7, %v3132_v16, %v3127_v2  ;;  %4926 = vrcp.f32 %v2811_v21 }
 0x400   :  { %v4917_v0 = vpop.eup %4916  ;;  %v3172_v46 = vsel %vm3126_vm6, %v3171_v30, %v6685_v63 }
 0x401   :  { %v3210_v6 = vrot.slane %v4917_v0, %v6695_v38  ;;  %v2814_v7 = vpop.xlane.xlu1 %2813  ;;  %v4919_v57 = vpop.eup %4918 }
 0x402   :  { %4928 = vrcp.f32 %v2814_v7  ;;  %v3239_v5 = vrot.slane %v4919_v57, %v6668_v15  ;;  %v2853_v52 = vpop.xlane.xlu0 %2852  ;;  %v4921_v11 = vpop.eup %4920  ;;  %v3142_v7 = vadd.s32 4294967240, %v6629_v31 }
 0x403   :  { %v6720_v44 = vsel %vm3126_vm6, %v3210_v6, %v3206_v17  ;;  %4930 = vrcp.f32 %v2853_v52  ;;  %v3269_v63 = vrot.slane %v4921_v11, %v6644_v62 }
 0x404   :  { %v4923_v9 = vpop.eup %4922  ;;  %v3240_v36 = vsel %vm3112_vm4, %v3239_v5, %v3235_v33  ;;  %4932 = vrcp.f32 %v2895_v51  ;;  %v6764_v5 = vsub.s32 %v3142_v7, %v7148_v22 }
 0x405   :  { %v6724_v56 = vpop.xlane.xlu1 %2855  ;;  %v4925_v18 = vpop.eup %4924  ;;  %v3278_v42 = vrot.slane %v4923_v9, %v6668_v15 }
 0x406   :  { %v3273_v23 = vrot.slane %v4925_v18, %v6660_v27  ;;  %v2892_v28 = vpop.xlane.xlu0 %2891 }
 0x407   :  { %4934 = vrcp.f32 %v2892_v28 }
 0x408   :  { %v3274_v14 = vsel %vm3105_vm3, %v3273_v23, %v3269_v63 }
 0x409   :  { %v6733_v10 = vpop.xlane.xlu1 %2897  ;;  %v4927_v37 = vpop.eup %4926  ;;  %v6737_v19 = vsel %vm3112_vm4, %v3278_v42, %v3274_v14 }
 0x40a   :  { %v3176_v55 = vrot.slane %v4927_v37, %v6706_v41  ;;  %v2790_v47 = vpop.xlane.xlu0 %2789 }
 0x40b   :  { %4936 = vrcp.f32 %v2790_v47 }
 0x40c   :  { %v4929_v45 = vpop.eup %4928  ;;  %v3177_v2 = vsel %vm3133_vm7, %v3176_v55, %v3172_v46 }
 0x40d   :  { %v3181_v43 = vrot.slane %v4929_v45, %v6731_v8  ;;  %v6741_v40 = vpop.xlane.xlu1 %2918  ;;  %v4931_v61 = vpop.eup %4930 }
 0x40e   :  { %v3244_v58 = vrot.slane %v4931_v61, %v6671_v4  ;;  %v2835_v24 = vpop.xlane.xlu0 %2834  ;;  %v4933_v34 = vpop.eup %4932 }
 0x40f   :  { %v3182_v53 = vsel %vm3140_vm8, %v3181_v43, %v3177_v2  ;;  %v3312_v50 = vrot.slane %v4933_v34, %v6660_v27 }
 0x410   :  { %v6747_v20 = vsel %vm3119_vm5, %v3244_v58, %v3240_v36 }
 0x411   :  { %v2817_v49 = vpop.xlane.xlu1 %2816  ;;  %v4935_v17 = vpop.eup %4934 }
 0x412   :  { %v3308_v39 = vrot.slane %v4935_v17, %v6644_v62  ;;  %v2877_v59 = vpop.xlane.xlu0 %2876  ;;  %4938 = vrcp.f32 %v2817_v49 }
 0x413   :  { %4940 = vrcp.f32 %v2835_v24 }
 0x414   :  { %v6752_v16 = vsel %vm3105_vm3, %v3312_v50, %v3308_v39 }
 0x415   :  { %v2859_v12 = vpop.xlane.xlu1 %2858  ;;  %v4937_v51 = vpop.eup %4936 }
 0x416   :  { %v3139_v33 = vrot.slane %v4937_v51, %v6731_v8  ;;  %v6755_v60 = vpop.xlane.xlu0 %2915 }
 0x418   :  { %v3141_v30 = vsel %vm3140_vm8, %v3139_v33, %v3134_v26 }
 0x419   :  { %v6757_v0 = vpop.xlane.xlu1 %2900 }
 0x41a   :  { %v2793_v21 = vpop.xlane.xlu0 %2792 }
 0x41b   :  { %4942 = vrcp.f32 %v2793_v21 }
 0x41c   :  { %v4939_v52 = vpop.eup %4938 }
 0x41d   :  { %v6760_v6 = vpop.xlane.xlu1 %2939  ;;  %v4941_v9 = vpop.eup %4940  ;;  %v3186_v26 = vrot.slane %v4939_v52, %v6764_v5 }
 0x41e   :  { %v2838_v46 = vpop.xlane.xlu0 %2837  ;;  %v3215_v31 = vrot.slane %v4941_v9, %v6706_v41 }
 0x41f   :  { %4944 = vrcp.f32 %v2838_v46  ;;  %v3187_v28 = vsel %vm3147_vm9, %v3186_v26, %v3182_v53 }
 0x420   :  { %v3216_v47 = vsel %vm3133_vm7, %v3215_v31, %v6720_v44 }
 0x421   :  { %v2841_v57 = vpop.xlane.xlu1 %2840 }
 0x422   :  { %4946 = vrcp.f32 %v2841_v57  ;;  %v2880_v11 = vpop.xlane.xlu0 %2879 }
 0x423   :  { %4948 = vrcp.f32 %v6724_v56 }
 0x424   :  { %4950 = vrcp.f32 %v2859_v12 }
 0x425   :  { %v2883_v32 = vpop.xlane.xlu1 %2882  ;;  %v4943_v36 = vpop.eup %4942 }
 0x426   :  { %v3146_v18 = vrot.slane %v4943_v36, %v6764_v5  ;;  %v2922_v63 = vpop.xlane.xlu0 %2921 }
 0x428   :  { %v3148_v22 = vsel %vm3147_vm9, %v3146_v18, %v3141_v30 }
 0x429   :  { %v2925_v23 = vpop.xlane.xlu1 %2924  ;;  %v4945_v42 = vpop.eup %4944  ;;  %v3423_v14 = vsel %vm3422_vm10, %v3187_v28, %v3148_v22 }
 0x42a   :  { %v3220_v45 = vrot.slane %v4945_v42, %v6731_v8  ;;  %v2943_v55 = vpop.xlane.xlu0 %2942 }
 0x42c   :  { %v4947_v37 = vpop.eup %4946  ;;  %v3221_v61 = vsel %vm3140_vm8, %v3220_v45, %v3216_v47 }
 0x42d   :  { %v3225_v43 = vrot.slane %v4947_v37, %v6764_v5  ;;  %v2865_v2 = vpop.xlane.xlu1 %2864  ;;  %v4949_v49 = vpop.eup %4948 }
 0x42e   :  { %4952 = vrcp.f32 %v2865_v2  ;;  %v2862_v58 = vpop.xlane.xlu0 %2861  ;;  %v4951_v50 = vpop.eup %4950  ;;  %v3249_v39 = vrot.slane %v4949_v49, %v6695_v38 }
 0x42f   :  { %v3226_v53 = vsel %vm3147_vm9, %v3225_v43, %v3221_v61  ;;  %4954 = vrcp.f32 %v2862_v58  ;;  %v3254_v12 = vrot.slane %v4951_v50, %v6706_v41 }
 0x430   :  { %v3425_v56 = vsel %vm3424_vm11, %v3226_v53, %v3423_v14  ;;  %4956 = vrcp.f32 %v6733_v10  ;;  %v3250_v21 = vsel %vm3126_vm6, %v3249_v39, %v6747_v20 }
 0x431   :  { %v2907_v24 = vpop.xlane.xlu1 %2906  ;;  %4958 = vrcp.f32 %v2877_v59  ;;  %v3255_v57 = vsel %vm3133_vm7, %v3254_v12, %v3250_v21 }
 0x432   :  { %v2904_v34 = vpop.xlane.xlu0 %2903  ;;  %4960 = vrcp.f32 %v2880_v11 }
 0x433   :  { %4962 = vrcp.f32 %v6741_v40 }
 0x434   :  { %4964 = vrcp.f32 %v6755_v60 }
 0x435   :  { %v2949_v17 = vpop.xlane.xlu1 %2948  ;;  %4966 = vrcp.f32 %v2883_v32 }
 0x436   :  { %v2946_v44 = vpop.xlane.xlu0 %2945 }
 0x438   :  { %v4953_v33 = vpop.eup %4952 }
 0x439   :  { %v2910_v51 = vpop.xlane.xlu1 %2909  ;;  %v4955_v30 = vpop.eup %4954  ;;  %v3264_v52 = vrot.slane %v4953_v33, %v6764_v5 }
 0x43a   :  { %v3259_v7 = vrot.slane %v4955_v30, %v6731_v8  ;;  %v2886_v46 = vpop.xlane.xlu0 %2885  ;;  %v4957_v40 = vpop.eup %4956 }
 0x43b   :  { %4968 = vrcp.f32 %v2886_v46  ;;  %v4959_v36 = vpop.eup %4958 }
 0x43c   :  { %v3260_v10 = vsel %vm3140_vm8, %v3259_v7, %v3255_v57  ;;  %4970 = vrcp.f32 %v6757_v0  ;;  %v4961_v60 = vpop.eup %4960  ;;  %v3283_v28 = vrot.slane %v4959_v36, %v6671_v4 }
 0x43d   :  { %v2952_v59 = vpop.xlane.xlu1 %2951  ;;  %v3265_v9 = vsel %vm3147_vm9, %v3264_v52, %v3260_v10  ;;  %4972 = vrcp.f32 %v2922_v63  ;;  %v4963_v31 = vpop.eup %4962  ;;  %v3288_v0 = vrot.slane %v4961_v60, %v6695_v38 }
 0x43e   :  { %v2928_v20 = vpop.xlane.xlu0 %2927  ;;  %v3427_v11 = vsel %vm3426_vm12, %v3265_v9, %v3425_v56  ;;  %4974 = vrcp.f32 %v2925_v23  ;;  %v4965_v32 = vpop.eup %4964  ;;  %v3284_v45 = vsel %vm3119_vm5, %v3283_v28, %v6737_v19  ;;  %v3317_v56 = vrot.slane %v4957_v40, %v6668_v15 }
 0x43f   :  { %4976 = vrcp.f32 %v2904_v34  ;;  %v4967_v42 = vpop.eup %4966  ;;  %v3289_v2 = vsel %vm3126_vm6, %v3288_v0, %v3284_v45  ;;  %v3351_v52 = vrot.slane %v4963_v31, %v6660_v27 }
 0x440   :  { %v3318_v21 = vsel %vm3112_vm4, %v3317_v56, %v6752_v16 }
 0x441   :  { %v2934_v18 = vpop.xlane.xlu1 %2933 }
 0x442   :  { %v2889_v26 = vpop.xlane.xlu0 %2888 }
 0x443   :  { %4978 = vrcp.f32 %v2889_v26 }
 0x444   :  { %4980 = vrcp.f32 %v2943_v55  ;;  %v3293_v55 = vrot.slane %v4967_v42, %v6706_v41 }
 0x445   :  { %4982 = vrcp.f32 %v2907_v24  ;;  %v4969_v63 = vpop.eup %4968  ;;  %v2937_v14 = vpop.xlane.xlu1 %2936 }
 0x446   :  { %4984 = vrcp.f32 %v2910_v51  ;;  %v2931_v22 = vpop.xlane.xlu0 %2930  ;;  %v4971_v23 = vpop.eup %4970  ;;  %v3298_v61 = vrot.slane %v4969_v63, %v6731_v8  ;;  %v3347_v51 = vrot.slane %v4965_v32, %v6644_v62 }
 0x447   :  { %4986 = vrcp.f32 %v2946_v44  ;;  %v4973_v37 = vpop.eup %4972  ;;  %v3322_v19 = vrot.slane %v4971_v23, %v6671_v4 }
 0x448   :  { %4988 = vrcp.f32 %v2928_v20  ;;  %v4975_v43 = vpop.eup %4974  ;;  %v3356_v7 = vrot.slane %v4973_v37, %v6668_v15  ;;  %v3352_v16 = vsel %vm3105_vm3, %v3351_v52, %v3347_v51 }
 0x449   :  { %4990 = vrcp.f32 %v2931_v22  ;;  %v4977_v53 = vpop.eup %4976  ;;  %v3323_v10 = vsel %vm3119_vm5, %v3322_v19, %v3318_v21  ;;  %v3361_v36 = vrot.slane %v4975_v43, %v6671_v4 }
 0x44a   :  { %4992 = vrcp.f32 %v6760_v6  ;;  %v2913_v47 = vpop.xlane.xlu0 %2912  ;;  %v3294_v6 = vsel %vm3133_vm7, %v3293_v55, %v3289_v2  ;;  %v3327_v39 = vrot.slane %v4977_v53, %v6695_v38  ;;  %v3357_v60 = vsel %vm3112_vm4, %v3356_v7, %v3352_v16 }
 0x44b   :  { %4994 = vrcp.f32 %v2913_v47  ;;  %v3299_v44 = vsel %vm3140_vm8, %v3298_v61, %v3294_v6  ;;  %v3362_v47 = vsel %vm3119_vm5, %v3361_v36, %v3357_v60 }
 0x44c   :  { %4996 = vrcp.f32 %v2949_v17  ;;  %v2961_v17 = vpop.xlane.xlu1 %2960  ;;  %v3328_v20 = vsel %vm3126_vm6, %v3327_v39, %v3323_v10 }
 0x44d   :  { %v4979_v58 = vpop.eup %4978  ;;  %4998 = vrcp.f32 %v2952_v59 }
 0x44e   :  { %v4981_v24 = vpop.eup %4980  ;;  %5000 = vrcp.f32 %v2934_v18  ;;  %v3303_v34 = vrot.slane %v4979_v58, %v6764_v5  ;;  %v2955_v49 = vpop.xlane.xlu0 %2954 }
 0x44f   :  { %v4983_v50 = vpop.eup %4982  ;;  %5002 = vrcp.f32 %v2955_v49  ;;  %v3390_v31 = vrot.slane %v4981_v24, %v6660_v27 }
 0x450   :  { %v4985_v12 = vpop.eup %4984  ;;  %v3304_v33 = vsel %vm3147_vm9, %v3303_v34, %v3299_v44  ;;  %5004 = vrcp.f32 %v2937_v14 }
 0x451   :  { %v4987_v30 = vpop.eup %4986  ;;  %v3429_v46 = vsel %vm3428_vm13, %v3304_v33, %v3427_v11  ;;  %5006 = vrcp.f32 %v2961_v17  ;;  %v3337_v40 = vrot.slane %v4985_v12, %v6731_v8  ;;  %v3332_v11 = vrot.slane %v4983_v50, %v6706_v41 }
 0x452   :  { %v4989_v57 = vpop.eup %4988  ;;  %v2958_v59 = vpop.xlane.xlu0 %2957  ;;  %v3395_v22 = vrot.slane %v4987_v30, %v6668_v15 }
 0x453   :  { %v4991_v9 = vpop.eup %4990  ;;  %5008 = vrcp.f32 %v2958_v59  ;;  %v3366_v32 = vrot.slane %v4989_v57, %v6695_v38  ;;  %v3333_v23 = vsel %vm3133_vm7, %v3332_v11, %v3328_v20  ;;  %v7149_v57 = vmov 0.0  }
 0x454   :  { %v4993_v26 = vpop.eup %4992  ;;  %v3371_v42 = vrot.slane %v4991_v9, %v6706_v41  ;;  %v3338_v27 = vsel %vm3140_vm8, %v3337_v40, %v3333_v23 }
 0x455   :  { %v4995_v18 = vpop.eup %4994  ;;  %v3386_v37 = vrot.slane %v4993_v26, %v6644_v62  ;;  %v3367_v61 = vsel %vm3126_vm6, %v3366_v32, %v3362_v47 }
 0x456   :  { %v4997_v28 = vpop.eup %4996  ;;  %v3342_v0 = vrot.slane %v4995_v18, %v6764_v5  ;;  %v1513_v63 = vpop.permute.xlu0 %1512  ;;  %v3372_v24 = vsel %vm3133_vm7, %v3371_v42, %v3367_v61 }
 0x457   :  { %v4999_v14 = vpop.eup %4998  ;;  %v1515_v45 = vmul.f32 %v1513_v63, %v6640_v48  ;;  %v3391_v2 = vsel %vm3105_vm3, %v3390_v31, %v3386_v37  ;;  %v3400_v6 = vrot.slane %v4997_v28, %v6671_v4  ;;  %vm1538_vm3 = vcmask 15360  }
 0x458   :  { %v5001_v55 = vpop.eup %5000  ;;  %v3343_v43 = vsel %vm3147_vm9, %v3342_v0, %v3338_v27  ;;  %v3396_v62 = vsel %vm3112_vm4, %v3395_v22, %v3391_v2  ;;  %v3405_v58 = vrot.slane %v4999_v14, %v6695_v38  ;;  %vm1753_vm4 = vcmask 261120  }
 0x459   :  { %v5003_v15 = vpop.eup %5002  ;;  %1517 = vrot.lane.b32.xlu1 %v1515_v45, %s5065_s20  ;;  %v3431_v53 = vsel %vm3430_vm14, %v3343_v43, %v3429_v46  ;;  %v3376_v34 = vrot.slane %v5001_v55, %v6731_v8  ;;  %v3401_v17 = vsel %vm3119_vm5, %v3400_v6, %v3396_v62  ;;  %vm3557_vm5 = vcmask 785408  }
 0x45a   :  { %v1504_v56 = vpop.permute.xlu0 %1503  ;;  %v5005_v19 = vpop.eup %5004  ;;  %v3410_v49 = vrot.slane %v5003_v15, %v6706_v41  ;;  %v3406_v51 = vsel %vm3126_vm6, %v3405_v58, %v3401_v17  ;;  %v97_v17 = vld [vmem:[%s7051_s6 + $0x1c0] sm:$0xff] }
 0x45b   :  { %v1506_v50 = vmul.f32 %v1504_v56, %v6640_v48  ;;  %v5007_v39 = vpop.eup %5006  ;;  %v3377_v38 = vsel %vm3140_vm8, %v3376_v34, %v3372_v24  ;;  %v3381_v12 = vrot.slane %v5005_v19, %v6764_v5 }
 0x45c   :  { %v3420_v41 = vrot.slane %v5007_v39, %v6764_v5  ;;  %v3411_v33 = vsel %vm3133_vm7, %v3410_v49, %v3406_v51  ;;  %v1524_v5 = vpop.permute.xlu1 %1523 }
 0x45d   :  { %v5009_v44 = vpop.eup %5008  ;;  %1533 = vrot.lane.b32.xlu1 %v6682_v25, %s5065_s20  ;;  %1508 = vrot.lane.b32.xlu0 %v1506_v50, %s5065_s20  ;;  %v3382_v30 = vsel %vm3147_vm9, %v3381_v12, %v3377_v38  ;;  %5010 = vrcp.f32 %v1524_v5  ;;  %v98_v12 = vld [vmem:[%s7051_s6 + $0x1c8] sm:$0xff]  ;;  %v7151_v5 = vld [vmem:[#allocation11_spill] sm:$0xff] }
 0x45e   :  { %v3415_v4 = vrot.slane %v5009_v44, %v6731_v8  ;;  %v3433_v8 = vsel %vm3432_vm15, %v3382_v30, %v3431_v53  ;;  %v1577_v10 = vpop.permute.xlu0 %1576  ;;  %v4435_v51 = vpack.c.bf16 %v98_v12, %v97_v17  ;;  %v6886_v30 = vld [vmem:[%s7052_s7 + $0x10] sm:$0xff] }
 0x460   :  { %v3416_v21 = vsel %vm3140_vm8, %v3415_v4, %v3411_v33  ;;  %v1581_v52 = vpop.permute.xlu1 %1580  ;;  %v99_v4 = vld [vmem:[%s7051_s6 + $0x1d0] sm:$0xff] }
 0x461   :  { %1547 = vrot.lane.b32.xlu1 %v6640_v48, %s5067_s26  ;;  %1554 = vrot.lane.b32.xlu0 %v6682_v25, %s5067_s26  ;;  %v3421_v7 = vsel %vm3147_vm9, %v3420_v41, %v3416_v21  ;;  %5012 = vrcp.f32 %v1581_v52  ;;  %v100_v41 = vld [vmem:[%s7051_s6 + $0x1d8] sm:$0xff]  ;;  %v101_v21 = vld [vmem:[%s7051_s6 + $0x1e0] sm:$0xff]  ;;  %v1751_v52 = vrot.slane %v6596_v35, %v7151_v5 }
 0x462   :  { %v3435_v46 = vsel %vm3434_vm2, %v3421_v7, %v3433_v8  ;;  %v1588_v28 = vpop.permute.xlu0 %1587  ;;  %v4438_v33 = vpack.c.bf16 %v100_v41, %v99_v4  ;;  %v102_v7 = vld [vmem:[%s7051_s6 + $0x1e8] sm:$0xff]  ;;  %v7150_v8 = vld [vmem:[#allocation6_spill] sm:$0xff]  ;;  %v105_v35 = vld [vmem:[%s7051_s6 + $0x200] sm:$0xff] }
 0x463   :  { %4275 = vmatmul.mubr.msk.f32.vlgmr.msra.gmra.mrb[4].mxu1 %vm1324_vm1, %v3435_v46  ;;  %v3029_v46 = vrot.slane %v6886_v30, %v7150_v8 }
 0x464   :  { %4301 = vmatprep.mubr.msk.f32.mxu1 %vm5060_vm0, %v7149_v57  ;;  %4436 = vmatpush3.bf16.msra.mxu1 %v4435_v51 }
 0x465   :  { %1543 = vrot.lane.b32.xlu1 %v6601_v13, %s5068_s27  ;;  %4437 = vmatprep.subr.bf16.mxu1 %v7146_v3 }
 0x467   :  { %v5011_v59 = vpop.eup %5010 }
 0x468   :  { %4439 = vmatpush3.bf16.msra.mxu1 %v4438_v33 }
 0x469   :  { %4440 = vmatprep.subr.bf16.mxu1 %v7146_v3 }
 0x46b   :  { %v5013_v40 = vpop.eup %5012 }
 0x4cb   :  { %v1518_v48 = vpop.permute.xlu1 %1517 }
 0x4cc   :  { %v1520_v25 = vadd.f32 %v1518_v48, %v6601_v13  ;;  %v4441_v48 = vpack.c.bf16 %v102_v7, %v101_v21 }
 0x4ce   :  { %v1563_v9 = vsub.f32 %v1520_v25, %v6601_v13  ;;  %v1579_v20 = vsub.f32 %v1520_v25, %v1577_v10  ;;  %v103_v25 = vld [vmem:[%s7051_s6 + $0x1f0] sm:$0xff]  ;;  %v104_v10 = vld [vmem:[%s7051_s6 + $0x1f8] sm:$0xff]  ;;  %4442 = vmatpush3.bf16.msra.mxu1 %v4441_v48 }
 0x4cf   :  { %v1534_v26 = vpop.permute.xlu1 %1533  ;;  %v1509_v23 = vpop.permute.xlu0 %1508  ;;  %4443 = vmatprep.subr.bf16.mxu1 %v7146_v3 }
 0x4d0   :  { %v1564_v16 = vmul.f32 %v5011_v59, %v1563_v9  ;;  %v1584_v36 = vmul.f32 %v5013_v40, %v1579_v20  ;;  %v1511_v37 = vadd.f32 %v1509_v23, %v6601_v13  ;;  %v6909_v9 = vadd.f32 %v6626_v1, %v1751_v52  ;;  %v106_v40 = vld [vmem:[%s7051_s6 + $0x208] sm:$0xff] }
 0x4d1   :  { %v4444_v20 = vpack.c.bf16 %v104_v10, %v103_v25 }
 0x4d2   :  { %v1585_v11 = vmul.f32 -0.5, %v1584_v36  ;;  %v1565_v18 = vmul.f32 -0.5, %v1564_v16  ;;  %v1521_v47 = vsub.f32 %v1511_v37, %v6601_v13  ;;  %v1754_v1 = vsel %vm1753_vm4, %v6909_v9, 0.0 }
 0x4d3   :  { %v1548_v32 = vpop.permute.xlu1 %1547  ;;  %v1555_v53 = vpop.permute.xlu0 %1554  ;;  %4445 = vmatpush3.bf16.msra.mxu1 %v4444_v20 }
 0x4d4   :  { %v1586_v60 = vmul.f32 %v1585_v11, %v1584_v36  ;;  %v1566_v31 = vmul.f32 %v1565_v18, %v1564_v16  ;;  %5014 = vrcp.f32 %v1548_v32  ;;  %v1527_v15 = vmul.f32 %v5011_v59, %v1521_v47  ;;  %4446 = vmatprep.subr.bf16.mxu1 %v7146_v3  ;;  %v107_v11 = vld [vmem:[%s7051_s6 + $0x210] sm:$0xff]  ;;  %v108_v18 = vld [vmem:[%s7051_s6 + $0x218] sm:$0xff] }
 0x4d5   :  { %v4447_v16 = vpack.c.bf16 %v106_v40, %v105_v35 }
 0x4d6   :  { %v1567_v22 = vsub.f32 %v1566_v31, %v1534_v26  ;;  %v1590_v42 = vsub.f32 %v1586_v60, %v1588_v28  ;;  %v1528_v61 = vmul.f32 -0.5, %v1527_v15  ;;  %v1755_v60 = vrot.slane %v1754_v1, 4 }
 0x4d7   :  { %v1544_v14 = vpop.permute.xlu1 %1543  ;;  %4448 = vmatpush3.bf16.msra.mxu1 %v4447_v16  ;;  %v4450_v31 = vpack.c.bf16 %v108_v18, %v107_v11 }
 0x4d8   :  { %v4073_v0 = vadd.f32 -0.9189385, %v1567_v22  ;;  %v4074_v63 = vadd.f32 -0.9189385, %v1590_v42  ;;  %v1546_v27 = vsub.f32 %v1511_v37, %v1544_v14  ;;  %v1529_v58 = vmul.f32 %v1528_v61, %v1527_v15  ;;  %4449 = vmatprep.subr.bf16.mxu1 %v7146_v3 }
 0x4d9   :  { %v1756_v28 = vadd.f32 %v1755_v60, %v1754_v1 }
 0x4da   :  { %1593 = vrot.lane.b32.xlu0 %v4074_v63, %s5068_s27  ;;  %1570 = vrot.lane.b32.xlu1 %v4073_v0, %s5068_s27  ;;  %v1536_v24 = vsub.f32 %v1529_v58, %v1534_v26 }
 0x4db   :  { %4451 = vmatpush3.bf16.msra.mxu1 %v4450_v31  ;;  %v1757_v42 = vrot.slane %v1756_v28, 2 }
 0x4dc   :  { %v4071_v6 = vadd.f32 -0.9189385, %v1536_v24  ;;  %4464 = vmatprep.subr.bf16.mxu1 %v7146_v3 }
 0x4dd   :  { %v1758_v63 = vadd.f32 %v1757_v42, %v1756_v28  ;;  %v7152_v28 = vld [vmem:[#allocation8_spill] sm:$0xff] }
 0x4de   :  { %v5015_v45 = vpop.eup %5014  ;;  %v1539_v34 = vsel %vm1538_vm3, %v4071_v6, 0.0 }
 0x4df   :  { %v1551_v55 = vmul.f32 %v5015_v45, %v1546_v27  ;;  %v1759_v14 = vrot.slane %v1758_v63, 1 }
 0x4e1   :  { %v1552_v43 = vmul.f32 -0.5, %v1551_v55  ;;  %v1760_v45 = vadd.f32 %v1759_v14, %v1758_v63 }
 0x4e3   :  { %v1553_v2 = vmul.f32 %v1552_v43, %v1551_v55  ;;  %v1761_v55 = vmul.f32 0.125, %v1760_v45 }
 0x4e5   :  { %v1557_v62 = vsub.f32 %v1553_v2, %v1555_v53  ;;  %v1762_v43 = vsub.f32 %v6909_v9, %v1761_v55 }
 0x4e7   :  { %v4072_v56 = vadd.f32 -0.9189385, %v1557_v62  ;;  %v1763_v2 = vmul.f32 %v1762_v43, %v1762_v43 }
 0x4e9   :  { %v1559_v19 = vsel %vm1538_vm3, %v4072_v56, 0.0  ;;  %v1764_v53 = vsel %vm1753_vm4, %v1763_v2, 0.0 }
 0x4ea   :  { %v1765_v58 = vrot.slane %v1764_v53, 4 }
 0x4ec   :  { %v1766_v24 = vadd.f32 %v1765_v58, %v1764_v53 }
 0x4ee   :  { %v1767_v6 = vrot.slane %v1766_v24, 2 }
 0x4f9   :  { %1560 = vadd.xlane.f32.xlu0 %v1559_v19 }
 0x4fe   :  { %1540 = vadd.xlane.f32.xlu1 %v1539_v34 }
 0x536   :  { %v3504_v49 = vpop.f32.mrb[4].mxu1 }
 0x537   :  { %v4276_v50 = vpop.f32.mrb[5].mxu1  ;;  %v6906_v59 = vadd.f32 %v3504_v49, %v3029_v46  ;;  %v1768_v49 = vadd.f32 %v1767_v6, %v1766_v24 }
 0x539   :  { %v3508_v26 = vsel %vm1324_vm1, %v6906_v59, 0.0 }
 0x53a   :  { %v3509_v36 = vrot.slane %v3508_v26, 4 }
 0x53c   :  { %v3510_v32 = vadd.f32 %v3509_v36, %v3508_v26  ;;  %v5033_v26 = vld [vmem:[%s7052_s7] sm:$0xff] }
 0x53e   :  { %v3511_v22 = vrot.slane %v3510_v32, 2 }
 0x540   :  { %v3512_v0 = vadd.f32 %v3511_v22, %v3510_v32 }
 0x542   :  { %v3513_v23 = vrot.slane %v3512_v0, 1 }
 0x544   :  { %v3514_v37 = vadd.f32 %v3513_v23, %v3512_v0  ;;  %v7153_v0 = vld [vmem:[#allocation7_spill] sm:$0xff]  ;;  %v7154_v23 = vld [vmem:[#allocation12_spill] sm:$0xff] }
 0x546   :  { %v3515_v27 = vmul.f32 0.125, %v3514_v37 }
 0x548   :  { %v3516_v47 = vsub.f32 %v6906_v59, %v3515_v27 }
 0x54a   :  { %v3517_v15 = vmul.f32 %v3516_v47, %v3516_v47 }
 0x54c   :  { %v1594_v13 = vpop.permute.xlu0 %1593  ;;  %v1571_v39 = vpop.permute.xlu1 %1570  ;;  %v3518_v61 = vsel %vm1324_vm1, %v3517_v15, 0.0 }
 0x54d   :  { %v1596_v44 = vsel %vm1538_vm3, %v1594_v13, 0.0  ;;  %v1573_v38 = vsel %vm1538_vm3, %v1571_v39, 0.0  ;;  %v3519_v62 = vrot.slane %v3518_v61, 4  ;;  %v1769_v13 = vrot.slane %v1768_v49, 1 }
 0x54e   :  { %1597 = vadd.xlane.f32.xlu1 %v1596_v44  ;;  %1574 = vadd.xlane.f32.xlu0 %v1573_v38 }
 0x54f   :  { %v3520_v56 = vadd.f32 %v3519_v62, %v3518_v61  ;;  %v1770_v44 = vadd.f32 %v1769_v13, %v1768_v49  ;;  %v114_v49 = vld [vmem:[%s7051_s6 + $0x248] sm:$0xff]  ;;  %v115_v13 = vld [vmem:[%s7051_s6 + $0x250] sm:$0xff] }
 0x551   :  { %v3521_v19 = vrot.slane %v3520_v56, 2  ;;  %v1771_v17 = vmul.f32 0.125, %v1770_v44 }
 0x553   :  { %v3522_v34 = vadd.f32 %v3521_v19, %v3520_v56  ;;  %v1772_v4 = vadd.f32 1e-05, %v1771_v17  ;;  %v111_v19 = vld [vmem:[%s7051_s6 + $0x230] sm:$0xff] }
 0x555   :  { %v3523_v50 = vrot.slane %v3522_v34, 1 }
 0x557   :  { %v3524_v39 = vadd.f32 %v3523_v50, %v3522_v34  ;;  %v113_v34 = vld [vmem:[%s7051_s6 + $0x240] sm:$0xff] }
 0x558   :  { %v4459_v50 = vpack.c.bf16 %v114_v49, %v113_v34 }
 0x559   :  { %v3525_v38 = vmul.f32 0.125, %v3524_v39  ;;  %v116_v39 = vld [vmem:[%s7051_s6 + $0x258] sm:$0xff] }
 0x55a   :  { %v4462_v44 = vpack.c.bf16 %v116_v39, %v115_v13 }
 0x55b   :  { %v3526_v12 = vadd.f32 1e-05, %v3525_v38  ;;  %v7155_v38 = vld [vmem:[#allocation9_spill] sm:$0xff] }
 0x55c   :  { %v3556_v17 = vrot.slane %v6886_v30, %v7155_v38 }
 0x55d   :  { %5016 = vrsqrt.f32 %v3526_v12 }
 0x55e   :  { %5018 = vrsqrt.f32 %v1772_v4 }
 0x567   :  { %v5017_v25 = vpop.eup %5016 }
 0x568   :  { %v5019_v20 = vpop.eup %5018  ;;  %v3528_v35 = vmul.f32 %v5017_v25, %v6886_v30 }
 0x569   :  { %v1774_v16 = vmul.f32 %v5033_v26, %v5019_v20 }
 0x56a   :  { %v3529_v1 = vmul.f32 %v3528_v35, %v3515_v27  ;;  %v3537_v22 = vrot.slane %v3528_v35, %v7152_v28 }
 0x56b   :  { %v1775_v36 = vmul.f32 %v1774_v16, %v1761_v55  ;;  %v1783_v14 = vrot.slane %v1774_v16, %v7154_v23 }
 0x56c   :  { %v3531_v11 = vrot.slane %v3529_v1, 7  ;;  %v3538_v37 = vmul.f32 %v3537_v22, %v6906_v59  ;;  %v109_v59 = vld [vmem:[%s7051_s6 + $0x220] sm:$0xff] }
 0x56d   :  { %v1777_v18 = vrot.slane %v1775_v36, 7  ;;  %v1784_v55 = vmul.f32 %v1783_v14, %v6909_v9  ;;  %v110_v9 = vld [vmem:[%s7051_s6 + $0x228] sm:$0xff] }
 0x56e   :  { %v3533_v31 = vsub.f32 %v6886_v30, %v3531_v11  ;;  %v4453_v24 = vpack.c.bf16 %v110_v9, %v109_v59  ;;  %v3671_v59 = vrot.slane %v6886_v30, %v7154_v23 }
 0x56f   :  { %v1779_v42 = vsub.f32 %v6886_v30, %v1777_v18 }
 0x570   :  { %v3542_v63 = vrot.slane %v3533_v31, %v7153_v0  ;;  %4454 = vmatpush3.bf16.msra.mxu0 %v4453_v24 }
 0x571   :  { %v1788_v45 = vrot.slane %v1779_v42, %v5630_v54  ;;  %4455 = vmatprep.subr.bf16.mxu0 %v7146_v3 }
 0x572   :  { %v3543_v27 = vadd.f32 %v3542_v63, %v3538_v37 }
 0x573   :  { %v1789_v47 = vadd.f32 %v1788_v45, %v1784_v55  ;;  %v117_v55 = vld [vmem:[%s7051_s6 + $0x260] sm:$0xff] }
 0x574   :  { %v3544_v43 = vmax.f32 %v3543_v27, 0.0 }
 0x575   :  { %v1790_v61 = vmax.f32 %v1789_v47, 0.0  ;;  %v118_v47 = vld [vmem:[%s7051_s6 + $0x268] sm:$0xff] }
 0x586   :  { %v1561_v51 = vpop.xlane.xlu0 %1560 }
 0x58b   :  { %v1541_v41 = vpop.xlane.xlu1 %1540 }
 0x58c   :  { %v1562_v7 = vsub.f32 %v1541_v41, %v1561_v51 }
 0x5db   :  { %v1575_v33 = vpop.xlane.xlu0 %1574  ;;  %v1598_v21 = vpop.xlane.xlu1 %1597 }
 0x5dc   :  { %v1599_v46 = vsub.f32 %v1575_v33, %v1598_v21 }
 0x5de   :  { %v1600_v52 = vadd.f32 %v1599_v46, %v1562_v7 }
 0x5e0   :  { %v1601_v48 = vmul.f32 0.5, %v1600_v52 }
 0x5e2   :  { %v1602_v10 = vsub.f32 0.0, %v1601_v48 }
 0x5e4   :  { %v1603_v40 = vmul.f32 1.442695, %v1602_v10 }
 0x5e6   :  { %5020 = vpow2.f32 %v1603_v40 }
 0x5f0   :  { %v5021_v60 = vpop.eup %5020 }
 0x5f1   :  { %v1605_v32 = vadd.f32 1.0, %v5021_v60 }
 0x5f3   :  { %5022 = vrcp.f32 %v1605_v32 }
 0x5fd   :  { %v5023_v15 = vpop.eup %5022 }
 0x5fe   :  { %v3547_v2 = vmul.f32 %v5023_v15, %v3544_v43  ;;  %v3545_v53 = vsub.f32 1.0, %v5023_v15  ;;  %v4465_v43 = vpack.c.bf16 %v118_v47, %v117_v55 }
 0x600   :  { %3549 = vrot.lane.b32.xlu0 %v3547_v2, %s5069_s9  ;;  %v3546_v62 = vmul.f32 %v3545_v53, %v1790_v61  ;;  %v121_v2 = vld [vmem:[%s7051_s6 + $0x280] sm:$0xff]  ;;  %v122_v61 = vld [vmem:[%s7051_s6 + $0x288] sm:$0xff] }
 0x601   :  { %v4471_v53 = vpack.c.bf16 %v122_v61, %v121_v2 }
 0x672   :  { %v3550_v58 = vpop.permute.xlu0 %3549 }
 0x673   :  { %v3552_v56 = vsel %vm1753_vm4, %v3546_v62, %v3550_v58  ;;  %v123_v62 = vld [vmem:[%s7051_s6 + $0x290] sm:$0xff]  ;;  %v124_v58 = vld [vmem:[%s7051_s6 + $0x298] sm:$0xff] }
 0x674   :  { %4302 = vmatmul.mubr.msk.f32.vlgmr.msra.gmra.mrb[6].mxu1 %vm3557_vm5, %v3552_v56  ;;  %v4474_v56 = vpack.c.bf16 %v124_v58, %v123_v62 }
 0x675   :  { %4339 = vmatprep.mubr.msk.f32.mxu1 %vm5060_vm0, %v7149_v57  ;;  %v112_v57 = vld [vmem:[%s7051_s6 + $0x238] sm:$0xff]  ;;  %4466 = vmatpush3.bf16.msra.mxu1 %v4465_v43  ;;  %vm3894_vm0 = vcmask 23552  }
 0x676   :  { %v4456_v6 = vpack.c.bf16 %v112_v57, %v111_v19  ;;  %4467 = vmatprep.subr.bf16.mxu1 %v7146_v3 }
 0x678   :  { %4457 = vmatpush3.bf16.msra.mxu0 %v4456_v6 }
 0x679   :  { %4458 = vmatprep.subr.bf16.mxu0 %v7146_v3 }
 0x67c   :  { %4460 = vmatpush3.bf16.msra.mxu0 %v4459_v50 }
 0x67d   :  { %4461 = vmatprep.subr.bf16.mxu0 %v7146_v3 }
 0x680   :  { %4463 = vmatpush3.bf16.msra.mxu0 %v4462_v44 }
 0x747   :  { %v3627_v12 = vpop.f32.mrb[6].mxu1 }
 0x748   :  { %v3628_v4 = vadd.f32 %v3627_v12, %v3556_v17  ;;  %v4303_v51 = vpop.f32.mrb[7].mxu1 }
 0x74a   :  { %v3631_v41 = vsel %vm1324_vm1, %v3628_v4, 0.0 }
 0x74b   :  { %v3632_v33 = vrot.slane %v3631_v41, 4 }
 0x74d   :  { %v3633_v21 = vadd.f32 %v3632_v33, %v3631_v41 }
 0x74f   :  { %v3634_v7 = vrot.slane %v3633_v21, 2 }
 0x751   :  { %v3635_v46 = vadd.f32 %v3634_v7, %v3633_v21  ;;  %v128_v7 = vld [vmem:[%s7052_s7 + $0x20] sm:$0xff] }
 0x753   :  { %v3636_v52 = vrot.slane %v3635_v46, 1 }
 0x755   :  { %v3637_v48 = vadd.f32 %v3636_v52, %v3635_v46 }
 0x757   :  { %v3638_v25 = vmul.f32 0.125, %v3637_v48 }
 0x759   :  { %v3639_v10 = vsub.f32 %v3628_v4, %v3638_v25 }
 0x75b   :  { %v3640_v20 = vmul.f32 %v3639_v10, %v3639_v10 }
 0x75d   :  { %v3641_v35 = vsel %vm1324_vm1, %v3640_v20, 0.0 }
 0x75e   :  { %v3642_v40 = vrot.slane %v3641_v35, 4 }
 0x760   :  { %v3643_v26 = vadd.f32 %v3642_v40, %v3641_v35 }
 0x762   :  { %v3644_v16 = vrot.slane %v3643_v26, 2 }
 0x764   :  { %v3645_v1 = vadd.f32 %v3644_v16, %v3643_v26 }
 0x766   :  { %v3646_v36 = vrot.slane %v3645_v1, 1 }
 0x768   :  { %v3647_v11 = vadd.f32 %v3646_v36, %v3645_v1  ;;  %v3858_v1 = vrot.slane %v128_v7, %v7152_v28 }
 0x76a   :  { %v3648_v18 = vmul.f32 0.125, %v3647_v11 }
 0x76c   :  { %v3649_v60 = vadd.f32 1e-05, %v3648_v18 }
 0x76e   :  { %5024 = vrsqrt.f32 %v3649_v60 }
 0x778   :  { %v5025_v31 = vpop.eup %5024 }
 0x779   :  { %v3651_v32 = vmul.f32 %v5025_v31, %v6886_v30 }
 0x77b   :  { %v3652_v22 = vmul.f32 %v3651_v32, %v3638_v25  ;;  %v3660_v0 = vrot.slane %v3651_v32, %v7145_v29  ;;  %v119_v29 = vld [vmem:[%s7051_s6 + $0x270] sm:$0xff] }
 0x77d   :  { %v3654_v42 = vrot.slane %v3652_v22, 7  ;;  %v3661_v14 = vmul.f32 %v3660_v0, %v3628_v4 }
 0x77f   :  { %v3656_v63 = vsub.f32 %v6886_v30, %v3654_v42 }
 0x781   :  { %v3665_v37 = vrot.slane %v3656_v63, %v7151_v5  ;;  %v120_v5 = vld [vmem:[%s7051_s6 + $0x278] sm:$0xff] }
 0x782   :  { %v4468_v15 = vpack.c.bf16 %v120_v5, %v119_v29 }
 0x783   :  { %v3666_v45 = vadd.f32 %v3665_v37, %v3661_v14 }
 0x784   :  { %4469 = vmatpush3.bf16.msra.mxu1 %v4468_v15 }
 0x785   :  { %v3667_v27 = vmax.f32 %v3666_v45, 0.0  ;;  %4470 = vmatprep.subr.bf16.mxu1 %v7146_v3  ;;  %v5034_v45 = vld [vmem:[%s7047_s2] sm:$0xff] }
 0x787   :  { %4321 = vmatmul.mubr.msk.f32.vlgmr.msra.gmra.mrb[10].mxu0 %vm1324_vm1, %v3667_v27 }
 0x788   :  { %4472 = vmatpush3.bf16.msra.mxu1 %v4471_v53 }
 0x789   :  { %4473 = vmatprep.subr.bf16.mxu1 %v7146_v3 }
 0x78c   :  { %4475 = vmatpush3.bf16.msra.mxu1 %v4474_v56 }
 0x85a   :  { %v3741_v9 = vpop.f32.mrb[10].mxu0 }
 0x85b   :  { %v3742_v24 = vadd.f32 %v3741_v9, %v3671_v59  ;;  %v4322_v19 = vpop.f32.mrb[11].mxu0 }
 0x85d   :  { %v3745_v57 = vsel %vm1324_vm1, %v3742_v24, 0.0 }
 0x85e   :  { %v3746_v6 = vrot.slane %v3745_v57, 4 }
 0x860   :  { %v3747_v3 = vadd.f32 %v3746_v6, %v3745_v57 }
 0x862   :  { %v3748_v34 = vrot.slane %v3747_v3, 2 }
 0x864   :  { %v3749_v49 = vadd.f32 %v3748_v34, %v3747_v3 }
 0x866   :  { %v3750_v50 = vrot.slane %v3749_v49, 1 }
 0x868   :  { %v3751_v13 = vadd.f32 %v3750_v50, %v3749_v49 }
 0x86a   :  { %v3752_v39 = vmul.f32 0.125, %v3751_v13 }
 0x86c   :  { %v3753_v44 = vsub.f32 %v3742_v24, %v3752_v39 }
 0x86e   :  { %v3754_v38 = vmul.f32 %v3753_v44, %v3753_v44 }
 0x870   :  { %v3755_v17 = vsel %vm1324_vm1, %v3754_v38, 0.0 }
 0x871   :  { %v3756_v12 = vrot.slane %v3755_v17, 4 }
 0x873   :  { %v3757_v4 = vadd.f32 %v3756_v12, %v3755_v17 }
 0x875   :  { %v3758_v51 = vrot.slane %v3757_v4, 2 }
 0x877   :  { %v3759_v30 = vadd.f32 %v3758_v51, %v3757_v4 }
 0x879   :  { %v3760_v23 = vrot.slane %v3759_v30, 1 }
 0x87b   :  { %v3761_v41 = vadd.f32 %v3760_v23, %v3759_v30 }
 0x87d   :  { %v3762_v33 = vmul.f32 0.125, %v3761_v41 }
 0x87f   :  { %v3763_v21 = vadd.f32 1e-05, %v3762_v33 }
 0x881   :  { %5026 = vrsqrt.f32 %v3763_v21 }
 0x88b   :  { %v5027_v46 = vpop.eup %5026 }
 0x88c   :  { %v3765_v52 = vmul.f32 %v5027_v46, %v128_v7 }
 0x88e   :  { %v3766_v48 = vmul.f32 %v3765_v52, %v3752_v39  ;;  %v3774_v10 = vrot.slane %v3765_v52, %v5630_v54 }
 0x890   :  { %v3768_v25 = vrot.slane %v3766_v48, 7  ;;  %v3775_v35 = vmul.f32 %v3774_v10, %v3742_v24 }
 0x892   :  { %v3770_v20 = vsub.f32 %v128_v7, %v3768_v25 }
 0x894   :  { %v3779_v40 = vrot.slane %v3770_v20, %v7150_v8 }
 0x896   :  { %v3780_v26 = vadd.f32 %v3779_v40, %v3775_v35 }
 0x898   :  { %v3781_v16 = vmax.f32 %v3780_v26, 0.0 }
 0x89a   :  { %4340 = vmatmul.mubr.msk.f32.vlgmr.msra.gmra.mrb[8].mxu1 %vm1324_vm1, %v3781_v16 }
 0x96d   :  { %v3851_v36 = vpop.f32.mrb[8].mxu1 }
 0x96e   :  { %v3859_v11 = vadd.f32 %v3858_v1, %v3851_v36  ;;  %v4341_v18 = vpop.f32.mrb[9].mxu1 }
 0x970   :  { %v3860_v60 = vsel %vm1538_vm3, %v3859_v11, -inf }
 0x971   :  { %3861 = vmax.xlane.f32.xlu1 %v3860_v60 }
 0x9fe   :  { %v3862_v31 = vpop.xlane.xlu1 %3861 }
 0x9ff   :  { %v3863_v32 = vsub.f32 %v3859_v11, %v3862_v31 }
 0xa01   :  { %v3864_v22 = vmul.f32 1.442695, %v3863_v32 }
 0xa03   :  { %5028 = vpow2.f32 %v3864_v22 }
 0xa0d   :  { %v5029_v54 = vpop.eup %5028 }
 0xa0e   :  { %v3866_v42 = vsel %vm1538_vm3, %v5029_v54, 0.0 }
 0xa0f   :  { %3867 = vadd.xlane.f32.xlu1 %v3866_v42 }
 0xa9c   :  { %v3868_v8 = vpop.xlane.xlu1 %3867 }
 0xa9d   :  { %5030 = vlog2.f32 %v3868_v8 }
 0xaa7   :  { %v5031_v0 = vpop.eup %5030 }
 0xaa8   :  { %v3870_v63 = vmul.f32 0.6931472, %v5031_v0 }
 0xaaa   :  { %v3871_v14 = vadd.f32 %v3870_v63, %v3862_v31 }
 0xaac   :  { %v3872_v28 = vsub.f32 %v3859_v11, %v3871_v14 }
 0xaae   :  { %3874 = vrot.lane.b32.xlu1 %v3872_v28, %s5064_s19  ;;  %s5070_s19 = smov [#allocation2]  }
 0xaaf   :  { %s3903_s15 = sshll.u32 %s5070_s19, 4  ;;  %s3904_s15 = int_to_ptr.vmem [resolvable:$true] %s3903_s15 }
 0xab0   :  { %s5035_s2 = scalar_lea.vmem %s3904_s15, 128  ;;  %p5040_p1 = scmp.lt.s32.totalorder %s3904_s15, %s3904_s15 }
 0xab1   :  { %p5036_p0 = scmp.ne.s32.totalorder %s3904_s15, %s5035_s2  ;;  %p5041_p2 = scmp.lt.s32.totalorder %s5035_s2, %s5035_s2 }
 0xab3   :  { %p5042_p3 = por %p5041_p2, %p5040_p1 }
 0xab5   :  { %p5043_p4 = pnand %p5042_p3, %p5036_p0 }
 0xb20   :  { %v3875_v37 = vpop.permute.xlu1 %3874 }
 0xb21   :  { %v3877_v27 = vmul.f32 %v5034_v45, %v3875_v37 }
 0xb23   :  { %3879 = vrot.lane.b32.xlu0 %v3877_v27, %s5068_s27 }
 0xb95   :  { %v3880_v55 = vpop.permute.xlu0 %3879 }
 0xb96   :  { %v3882_v47 = vsel %vm1538_vm3, %v3880_v55, 0.0 }
 0xb97   :  { %3883 = vadd.xlane.f32.xlu0 %v3882_v47 }
 0xc24   :  { %v3884_v43 = vpop.xlane.xlu0 %3883 }
 0xc25   :  { %v3885_v29 = vsub.f32 0.0, %v3884_v43 }
 0xc27   :  { %v3886_v5 = vrot.slane %v3885_v29, 4 }
 0xc29   :  { %v3887_v15 = vadd.f32 %v3886_v5, %v3885_v29 }
 0xc2b   :  { %v3888_v2 = vrot.slane %v3887_v15, 2 }
 0xc2d   :  { %v3889_v61 = vadd.f32 %v3888_v2, %v3887_v15 }
 0xc2f   :  { %v3890_v53 = vrot.slane %v3889_v61, 1 }
 0xc31   :  { %v3891_v62 = vadd.f32 %v3890_v53, %v3889_v61 }
 0xc33   :  { %v3892_v58 = vmul.f32 0.125, %v3891_v62 }
 0xc35   :  { %v3893_v56 = vsel %vm1538_vm3, %v3859_v11, %v3892_v58 }
 0xc36   :  { %v3895_v59 = vsel %vm3894_vm0, %v3893_v56, 0.0 }
 0xc37   :  { %3896 = vst [vmem:[#allocation2] sm:$0xff] %v3895_v59 }
 0xc38   :  { %5046 = shalt.err (!%p5043_p4)
}
 0xc39   :  { %s5047_s0 = scalar_lea.hbm %s7053_s8, 128 }
 0xc3a   :  { %p5048_p5 = scmp.ne.s32.totalorder %s7053_s8, %s5047_s0  ;;  %p5051_p6 = scmp.lt.u32.totalorder %s5047_s0, %s7053_s8 }
 0xc3c   :  { %p5053_p7 = pnand %p5051_p6, %p5048_p5 }
 0xc3e   :  { %5056 = shalt.err (!%p5053_p7)
}
 0xc3f   :  { %3906 = dma.vmem_to_hbm [thread:$0]  %s3904_s15, 128, %s7053_s8, [#allocation3]  }
 0xc40   :  { %5057 = dma.done.wait [#allocation3], 128  }
 0xc41   :  { %5058 = vsyncadd [#allocation3], 4294967168 }
 0xc42   :  { %3910 = vsyncpa [#allocation3], 1 }

</bundles_post_ra>
